<compile_context>
chip_gen: v7x
topology: tpu7x:2x2x1
jax: 0.10.0
libtpu: 0.0.40
codegen_flags: <defaults>
</compile_context>

<pallas_src>
import functools

import jax
import jax.numpy as jnp
import numpy as np
from jax.experimental import pallas as pl
from jax.experimental.pallas import tpu as pltpu


def _round_up(x, m):
    return (x + m - 1) // m * m


def _mxu_is_128_deep():
    """True on TPU generations whose MXU contraction depth is 128 (v2-v5)."""
    try:
        kind = jax.devices()[0].device_kind.lower()
    except Exception:
        return False
    return any(t in kind for t in ("v2", "v3", "v4", "v5"))


# ----------------------------- fused Pallas kernel -----------------------------


def _make_fused_kernel(layer_meta, W, ker, chunk, split_k, y_off, buf_tops):
    """layer_meta: tuple of (cin, cout, rows_comp, is_tail) static Python ints.

    Invariant: every lane a layer reads from a ping-pong buffer is either written
    earlier in the same grid step or belongs to the zeroed tail [buf_tops[i]:); any
    value computed from lane-pad / right-edge wrap positions only ever feeds output
    columns that the wrapper crops away.
    """
    n_layers = len(layer_meta)
    offsets = tuple(kh * W + kw for kh in range(ker) for kw in range(ker))

    def kernel(*refs):
        x_ref, y_ref = refs[0], refs[1]
        wrefs = refs[2:2 + 2 * n_layers]
        o_ref = refs[2 + 2 * n_layers]
        bufs = (refs[3 + 2 * n_layers], refs[4 + 2 * n_layers])

        # Zero only the never-written tail lanes of each ping-pong buffer (taps read
        # up to (ker-1)*(W+1) lanes past the producer's written range): ~1 vreg store
        # per buffer per image instead of zeroing the whole buffers every grid step.
        for b, top in zip(bufs, buf_tops):
            if top < b.shape[1]:
                b[:, top:] = jnp.zeros((b.shape[0], b.shape[1] - top), b.dtype)

        src = None  # None -> head reads from x_ref
        for li, (cin, cout, rows_comp, is_tail) in enumerate(layer_meta):
            w_ref = wrefs[2 * li]       # (cout, ker*ker*cin) bf16, BN scale folded in
            sh_ref = wrefs[2 * li + 1]  # (cout, 1) f32: conv bias + eval-BN shift

            def read_tap(start, size, _src=src, _cin=cin):
                if _src is None:
                    return x_ref[0, :, start:start + size]
                return _src[0:_cin, start:start + size]

            K = ker * ker * cin
            for c0 in range(0, rows_comp, chunk):
                cs = min(chunk, rows_comp - c0)
                taps = [read_tap(c0 + s, cs) for s in offsets]        # bf16 slices
                if split_k and K > 128:
                    # 128-deep MXU (v5e class): explicit K = 128 + (K-128) split so the
                    # second pass is a cheap shallow matmul, not a nearly-empty full pass.
                    nmaj = 128 // cin
                    xa = jnp.concatenate(taps[:nmaj], axis=0)
                    rest = taps[nmaj:]
                    xb = rest[0] if len(rest) == 1 else jnp.concatenate(rest, axis=0)
                    acc = jnp.dot(w_ref[:, :nmaj * cin], xa,
                                  preferred_element_type=jnp.float32)
                    acc = acc + jnp.dot(w_ref[:, nmaj * cin:], xb,
                                        preferred_element_type=jnp.float32)
                else:
                    xcol = jnp.concatenate(taps, axis=0)              # (K, cs) bf16
                    acc = jnp.dot(w_ref[...], xcol,
                                  preferred_element_type=jnp.float32)
                yv = acc + sh_ref[...]                # conv bias + eval-mode BN shift
                if is_tail:
                    skip = y_ref[0, :, y_off + c0:y_off + c0 + cs]
                    o_ref[0, :, c0:c0 + cs] = (jnp.tanh(yv) + skip).astype(o_ref.dtype)
                else:
                    yv = jnp.maximum(yv, 0.2 * yv)    # LeakyReLU(0.2)
                    bufs[li % 2][0:cout, c0:c0 + cs] = yv.astype(jnp.bfloat16)
            if not is_tail:
                src = bufs[li % 2]

    return kernel


# --------------------------------- forward pass ---------------------------------


def generator_forward(layers, ker, x_nchw, y_nchw):
    """layers: tuple of (w_flat bf16 (Cout, ker*ker*Cin) with BN scale folded in,
                         shift f32 (Cout, 1)).
    x_nchw, y_nchw: (N, nc_im, H, W) float32 (PyTorch NCHW). Returns NCHW output."""
    N, nc_im, H, W = x_nchw.shape
    assert y_nchw.shape == x_nchw.shape, "skip input must match x's shape"
    n_layers = len(layers)
    k2 = ker * ker
    cin0_pad = layers[0][0].shape[1] // k2

    # per-layer output geometry (row stride stays W; invalid right cols cropped once)
    rows = []
    Ho = H
    for _ in range(n_layers):
        Ho -= (ker - 1)
        rows.append(Ho * W)
    Ho_final = Ho
    Wo_final = W - n_layers * (ker - 1)
    rows_final = rows[-1]

    # Lane-padded compute extents -> every chunk store is an unmasked full-width vst.
    rows_comp = [_round_up(r, 128) for r in rows]
    out_lanes = rows_comp[-1]
    halo = (ker - 1) * (W + 1)                 # largest tap offset of the ker x ker window

    is_128 = _mxu_is_128_deep()
    chunk = 128 if is_128 else 256

    # head input: NCHW -> bf16 (N, cin0_pad, x_lanes); channel + lane zero pad.
    x_lanes = _round_up(rows_comp[0] + halo, 128)
    x = x_nchw.reshape(N, nc_im, H * W).astype(jnp.bfloat16)
    x = jnp.pad(x, ((0, 0), (0, cin0_pad - nc_im), (0, x_lanes - H * W)))

    # skip input stays f32 and un-cropped: because every layer keeps row stride W,
    # the center crop is just a constant lane offset applied inside the kernel.
    ind = (H - Ho_final) // 2
    y_off = ind * (W + 1)
    y = y_nchw.reshape(N, nc_im, H * W).astype(jnp.float32)
    if y_off + out_lanes > y.shape[2]:
        y = jnp.pad(y, ((0, 0), (0, 0), (0, y_off + out_lanes - y.shape[2])))

    layer_meta, max_cout = [], 8
    for li, (wf, _) in enumerate(layers):
        cout, kk = wf.shape
        cin = kk // k2
        is_tail = li == n_layers - 1
        layer_meta.append((cin, cout, rows_comp[li], is_tail))
        if not is_tail:
            max_cout = max(max_cout, cout)

    buf_c = _round_up(max_cout, 8)
    buf_len = _round_up(max(rows_comp) + halo, 128)
    # never-written tail of each ping-pong buffer (zeroed once per grid step)
    tops = [buf_len, buf_len]
    for li, (_, _, rc, is_tail) in enumerate(layer_meta):
        if not is_tail:
            tops[li % 2] = min(tops[li % 2], rc)
    buf_tops = tuple(tops)

    # Static guards for the manual-indexing invariants (VMEM reads are unchecked).
    assert rows_comp[0] + halo <= x.shape[2]
    if n_layers > 1:
        assert max(rows_comp[1:]) + halo <= buf_len
    assert y_off + out_lanes <= y.shape[2]

    args = [x, y]
    in_specs = [
        pl.BlockSpec((1, x.shape[1], x.shape[2]), lambda n: (n, 0, 0)),
        pl.BlockSpec((1, y.shape[1], y.shape[2]), lambda n: (n, 0, 0)),
    ]
    for (wf, sh) in layers:
        args += [wf, sh]
        in_specs += [pl.BlockSpec(wf.shape, lambda n: (0, 0)),
                     pl.BlockSpec(sh.shape, lambda n: (0, 0))]

    out = pl.pallas_call(
        _make_fused_kernel(tuple(layer_meta), W, ker, chunk, is_128, y_off, buf_tops),
        out_shape=jax.ShapeDtypeStruct((N, nc_im, out_lanes), jnp.float32),
        grid=(N,),
        in_specs=in_specs,
        out_specs=pl.BlockSpec((1, nc_im, out_lanes), lambda n: (n, 0, 0)),
        scratch_shapes=[pltpu.VMEM((buf_c, buf_len), jnp.bfloat16),
                        pltpu.VMEM((buf_c, buf_len), jnp.bfloat16)],
        # grid=(N,) parallel lets v7x's two TensorCores split the batch;
        # it is a no-op on single-core v5e/v6e.
        compiler_params=pltpu.CompilerParams(
            dimension_semantics=("parallel",)),
    )(*args)

    # (N, C, out_lanes) -> drop lane pad -> (N, C, Ho, W) -> crop invalid right cols.
    return out[:, :, :rows_final].reshape(N, nc_im, Ho_final, W)[:, :, :, :Wo_final]


# ----------------------------- parameters & reference -----------------------------


def init_params(key, opt):
    nc_im, nfc = opt["nc_im"], opt["nfc"]
    min_nfc, ker, num_layer = opt["min_nfc"], opt["ker_size"], opt["num_layer"]
    assert opt["padd_size"] == 0, "only padding=0 (valid conv) is modeled"
    eps = 1e-5

    # channel schedule identical to the PyTorch module
    chans = [(nc_im, nfc)]
    Nc = nfc
    for i in range(num_layer - 2):
        Nc = int(nfc / (2 ** (i + 1)))
        chans.append((max(2 * Nc, min_nfc), max(Nc, min_nfc)))
    chans.append((max(Nc, min_nfc), nc_im))          # tail

    cin0_pad = _round_up(nc_im, 8)
    layers, raw = [], []
    for li, (cin, cout) in enumerate(chans):
        is_tail = li == len(chans) - 1
        key, k1, k2, k3, k4 = jax.random.split(key, 5)
        w = 0.02 * jax.random.normal(k1, (ker, ker, cin, cout), jnp.float32)  # HWIO
        b = 0.02 * jax.random.normal(k2, (cout,), jnp.float32)
        if is_tail:
            scale = jnp.ones((cout,), jnp.float32)   # tail has no BatchNorm
            shift = b
        else:
            gamma = 1.0 + 0.02 * jax.random.normal(k3, (cout,), jnp.float32)
            beta = 0.02 * jax.random.normal(k4, (cout,), jnp.float32)
            # fold conv bias + eval-mode BatchNorm (running_mean=0, running_var=1)
            scale = gamma / jnp.sqrt(1.0 + eps)
            shift = beta + b * scale
        raw.append((w, scale, shift, is_tail))

        # Fold the affine scale into the conv weights (so the kernel epilogue is a
        # single per-channel add), pad head input channels to 8, and pack to
        # (Cout, KH*KW*Cin) matching the in-kernel im2col (tap-major, channel-minor).
        w_k = w * scale[None, None, None, :]
        cin_eff = cin
        if li == 0 and cin0_pad != cin:
            w_k = jnp.pad(w_k, ((0, 0), (0, 0), (0, cin0_pad - cin), (0, 0)))
            cin_eff = cin0_pad
        wf = jnp.transpose(w_k, (3, 0, 1, 2)).reshape(cout, ker * ker * cin_eff)
        layers.append((wf.astype(jnp.bfloat16), shift.reshape(cout, 1)))

    return {"layers": tuple(layers), "raw": tuple(raw), "ker": ker}


def reference_forward(raw, x, y):
    """Pure-JAX (XLA conv) f32 reference of the module's forward."""
    h = x.astype(jnp.float32)
    for (w, scale, shift, is_tail) in raw:
        h = jax.lax.conv_general_dilated(
            h, w, window_strides=(1, 1), padding="VALID",
            dimension_numbers=("NCHW", "HWIO", "NCHW"))
        h = h * scale[None, :, None, None] + shift[None, :, None, None]
        h = jnp.tanh(h) if is_tail else jnp.where(h > 0, h, 0.2 * h)
    ind = (y.shape[2] - h.shape[2]) // 2
    yc = y[:, :, ind:y.shape[2] - ind, ind:y.shape[3] - ind]
    return h + yc.astype(jnp.float32)


# ------------------------------------- main -------------------------------------

if __name__ == "__main__":
    opt = dict(nc_im=3, nfc=16, min_nfc=16, ker_size=3, padd_size=0, num_layer=5)

    key = jax.random.PRNGKey(0)
    kp, kx, ky = jax.random.split(key, 3)
    params = init_params(kp, opt)

    # NCHW inputs like the PyTorch module; 5 valid 3x3 convs: 26 -> 16 spatial.
    x = jax.random.normal(kx, (2, 3, 26, 26), jnp.float32)
    y = jax.random.normal(ky, (2, 3, 26, 26), jnp.float32)

    fwd = jax.jit(functools.partial(generator_forward, params["layers"], params["ker"]))
    out = jax.block_until_ready(fwd(x, y))

    assert out.shape == (2, 3, 16, 16), out.shape
    assert bool(jnp.all(jnp.isfinite(out)))

    # correctness vs an XLA f32 reference (kernel uses bf16 matmul operands with the
    # BN scale folded into the weights, so allow a small absolute tolerance).
    ref = jax.block_until_ready(reference_forward(params["raw"], x, y))
    err = float(np.max(np.abs(np.asarray(out) - np.asarray(ref))))
    assert np.allclose(np.asarray(out), np.asarray(ref), atol=2e-2, rtol=1e-3), err

    print("KERNEL_OK")
</pallas_src>

<mosaic_0001>
module attributes {stable_mosaic.version = 11 : i64} {
  func.func @kernel(%arg0: i32, %arg1: memref<1x8x768xbf16, #tpu.memory_space<vmem>>, %arg2: memref<1x3x676xf32, #tpu.memory_space<vmem>>, %arg3: memref<16x72xbf16, #tpu.memory_space<vmem>>, %arg4: memref<16x1xf32, #tpu.memory_space<vmem>>, %arg5: memref<16x144xbf16, #tpu.memory_space<vmem>>, %arg6: memref<16x1xf32, #tpu.memory_space<vmem>>, %arg7: memref<16x144xbf16, #tpu.memory_space<vmem>>, %arg8: memref<16x1xf32, #tpu.memory_space<vmem>>, %arg9: memref<16x144xbf16, #tpu.memory_space<vmem>>, %arg10: memref<16x1xf32, #tpu.memory_space<vmem>>, %arg11: memref<3x144xbf16, #tpu.memory_space<vmem>>, %arg12: memref<3x1xf32, #tpu.memory_space<vmem>>, %arg13: memref<1x3x512xf32, #tpu.memory_space<vmem>>, %arg14: memref<16x768xbf16, #tpu.memory_space<vmem>>, %arg15: memref<16x768xbf16, #tpu.memory_space<vmem>>) attributes {dimension_semantics = [#tpu.dimension_semantics<parallel>], iteration_bounds = array<i64: 2>, scalar_prefetch = 0 : i64, scratch_operands = 2 : i64, tpu.core_type = #tpu.core_type<tc>, window_params = [{transform_indices = @transform_0, window_bounds = array<i64: 1, 8, 768>}, {transform_indices = @transform_1, window_bounds = array<i64: 1, 3, 676>}, {pipeline_mode = #tpu.pipeline_mode<synchronous>, transform_indices = @transform_2, window_bounds = array<i64: 16, 72>}, {pipeline_mode = #tpu.pipeline_mode<synchronous>, transform_indices = @transform_3, window_bounds = array<i64: 16, 1>}, {pipeline_mode = #tpu.pipeline_mode<synchronous>, transform_indices = @transform_4, window_bounds = array<i64: 16, 144>}, {pipeline_mode = #tpu.pipeline_mode<synchronous>, transform_indices = @transform_5, window_bounds = array<i64: 16, 1>}, {pipeline_mode = #tpu.pipeline_mode<synchronous>, transform_indices = @transform_6, window_bounds = array<i64: 16, 144>}, {pipeline_mode = #tpu.pipeline_mode<synchronous>, transform_indices = @transform_7, window_bounds = array<i64: 16, 1>}, {pipeline_mode = #tpu.pipeline_mode<synchronous>, transform_indices = @transform_8, window_bounds = array<i64: 16, 144>}, {pipeline_mode = #tpu.pipeline_mode<synchronous>, transform_indices = @transform_9, window_bounds = array<i64: 16, 1>}, {pipeline_mode = #tpu.pipeline_mode<synchronous>, transform_indices = @transform_10, window_bounds = array<i64: 3, 144>}, {pipeline_mode = #tpu.pipeline_mode<synchronous>, transform_indices = @transform_11, window_bounds = array<i64: 3, 1>}, {transform_indices = @transform_12, window_bounds = array<i64: 1, 3, 512>}]} {
    %cst = arith.constant 0.000000e+00 : bf16
    %0 = vector.broadcast %cst : bf16 to vector<16x128xbf16>
    %c0 = arith.constant 0 : index
    %c640 = arith.constant 640 : index
    %1 = vector.load %arg14[%c0, %c640] : memref<16x768xbf16, #tpu.memory_space<vmem>>, vector<16x128xbf16>
    tpu.vector_store %arg14[%c0, %c640], %0 {strides = array<i32>} : memref<16x768xbf16, #tpu.memory_space<vmem>>, vector<16x128xbf16>,
    %cst_0 = arith.constant 0.000000e+00 : bf16
    %2 = vector.broadcast %cst_0 : bf16 to vector<16x256xbf16>
    %c0_1 = arith.constant 0 : index
    %c512 = arith.constant 512 : index
    %3 = vector.load %arg15[%c0_1, %c512] : memref<16x768xbf16, #tpu.memory_space<vmem>>, vector<16x256xbf16>
    tpu.vector_store %arg15[%c0_1, %c512], %2 {strides = array<i32>} : memref<16x768xbf16, #tpu.memory_space<vmem>>, vector<16x256xbf16>,
    %c0_2 = arith.constant 0 : index
    %c0_3 = arith.constant 0 : index
    %c0_4 = arith.constant 0 : index
    %4 = vector.load %arg1[%c0_2, %c0_3, %c0_4] : memref<1x8x768xbf16, #tpu.memory_space<vmem>>, vector<1x8x256xbf16>
    %5 = vector.shape_cast %4 : vector<1x8x256xbf16> to vector<8x256xbf16>
    %c0_5 = arith.constant 0 : index
    %c0_6 = arith.constant 0 : index
    %c1 = arith.constant 1 : index
    %6 = vector.load %arg1[%c0_5, %c0_6, %c1] : memref<1x8x768xbf16, #tpu.memory_space<vmem>>, vector<1x8x256xbf16>
    %7 = vector.shape_cast %6 : vector<1x8x256xbf16> to vector<8x256xbf16>
    %c0_7 = arith.constant 0 : index
    %c0_8 = arith.constant 0 : index
    %c2 = arith.constant 2 : index
    %8 = vector.load %arg1[%c0_7, %c0_8, %c2] : memref<1x8x768xbf16, #tpu.memory_space<vmem>>, vector<1x8x256xbf16>
    %9 = vector.shape_cast %8 : vector<1x8x256xbf16> to vector<8x256xbf16>
    %c0_9 = arith.constant 0 : index
    %c0_10 = arith.constant 0 : index
    %c26 = arith.constant 26 : index
    %10 = vector.load %arg1[%c0_9, %c0_10, %c26] : memref<1x8x768xbf16, #tpu.memory_space<vmem>>, vector<1x8x256xbf16>
    %11 = vector.shape_cast %10 : vector<1x8x256xbf16> to vector<8x256xbf16>
    %c0_11 = arith.constant 0 : index
    %c0_12 = arith.constant 0 : index
    %c27 = arith.constant 27 : index
    %12 = vector.load %arg1[%c0_11, %c0_12, %c27] : memref<1x8x768xbf16, #tpu.memory_space<vmem>>, vector<1x8x256xbf16>
    %13 = vector.shape_cast %12 : vector<1x8x256xbf16> to vector<8x256xbf16>
    %c0_13 = arith.constant 0 : index
    %c0_14 = arith.constant 0 : index
    %c28 = arith.constant 28 : index
    %14 = vector.load %arg1[%c0_13, %c0_14, %c28] : memref<1x8x768xbf16, #tpu.memory_space<vmem>>, vector<1x8x256xbf16>
    %15 = vector.shape_cast %14 : vector<1x8x256xbf16> to vector<8x256xbf16>
    %c0_15 = arith.constant 0 : index
    %c0_16 = arith.constant 0 : index
    %c52 = arith.constant 52 : index
    %16 = vector.load %arg1[%c0_15, %c0_16, %c52] : memref<1x8x768xbf16, #tpu.memory_space<vmem>>, vector<1x8x256xbf16>
    %17 = vector.shape_cast %16 : vector<1x8x256xbf16> to vector<8x256xbf16>
    %c0_17 = arith.constant 0 : index
    %c0_18 = arith.constant 0 : index
    %c53 = arith.constant 53 : index
    %18 = vector.load %arg1[%c0_17, %c0_18, %c53] : memref<1x8x768xbf16, #tpu.memory_space<vmem>>, vector<1x8x256xbf16>
    %19 = vector.shape_cast %18 : vector<1x8x256xbf16> to vector<8x256xbf16>
    %c0_19 = arith.constant 0 : index
    %c0_20 = arith.constant 0 : index
    %c54 = arith.constant 54 : index
    %20 = vector.load %arg1[%c0_19, %c0_20, %c54] : memref<1x8x768xbf16, #tpu.memory_space<vmem>>, vector<1x8x256xbf16>
    %21 = vector.shape_cast %20 : vector<1x8x256xbf16> to vector<8x256xbf16>
    %22 = tpu.concatenate %5, %7, %9, %11, %13, %15, %17, %19, %21 in 0 : vector<8x256xbf16>, vector<8x256xbf16>, vector<8x256xbf16>, vector<8x256xbf16>, vector<8x256xbf16>, vector<8x256xbf16>, vector<8x256xbf16>, vector<8x256xbf16>, vector<8x256xbf16> -> vector<72x256xbf16>
    %c0_21 = arith.constant 0 : index
    %c0_22 = arith.constant 0 : index
    %23 = vector.load %arg3[%c0_21, %c0_22] : memref<16x72xbf16, #tpu.memory_space<vmem>>, vector<16x72xbf16>
    %cst_23 = arith.constant dense<0.000000e+00> : vector<16x256xf32>
    %24 = tpu.matmul %23, %22, %cst_23 {dimension_numbers = #tpu.dot_dimension_numbers<[1], [0], [0], [1], [0, 0, 1, 1], [], []>} : vector<16x72xbf16>, vector<72x256xbf16>, vector<16x256xf32> -> vector<16x256xf32>
    %c0_24 = arith.constant 0 : index
    %c0_25 = arith.constant 0 : index
    %25 = vector.load %arg4[%c0_24, %c0_25] : memref<16x1xf32, #tpu.memory_space<vmem>>, vector<16x1xf32>
    %26 = vector.broadcast %25 : vector<16x1xf32> to vector<16x256xf32>
    %27 = arith.addf %24, %26 : vector<16x256xf32>
    %cst_26 = arith.constant 2.000000e-01 : f32
    %28 = vector.broadcast %cst_26 : f32 to vector<16x256xf32>
    %29 = arith.mulf %28, %27 : vector<16x256xf32>
    %30 = arith.maximumf %27, %29 : vector<16x256xf32>
    %31 = arith.truncf %30 : vector<16x256xf32> to vector<16x256xbf16>
    %c0_27 = arith.constant 0 : index
    %c0_28 = arith.constant 0 : index
    %32 = vector.load %arg14[%c0_27, %c0_28] : memref<16x768xbf16, #tpu.memory_space<vmem>>, vector<16x256xbf16>
    tpu.vector_store %arg14[%c0_27, %c0_28], %31 {strides = array<i32>} : memref<16x768xbf16, #tpu.memory_space<vmem>>, vector<16x256xbf16>,
    %c0_29 = arith.constant 0 : index
    %c0_30 = arith.constant 0 : index
    %c256 = arith.constant 256 : index
    %33 = vector.load %arg1[%c0_29, %c0_30, %c256] : memref<1x8x768xbf16, #tpu.memory_space<vmem>>, vector<1x8x256xbf16>
    %34 = vector.shape_cast %33 : vector<1x8x256xbf16> to vector<8x256xbf16>
    %c0_31 = arith.constant 0 : index
    %c0_32 = arith.constant 0 : index
    %c257 = arith.constant 257 : index
    %35 = vector.load %arg1[%c0_31, %c0_32, %c257] : memref<1x8x768xbf16, #tpu.memory_space<vmem>>, vector<1x8x256xbf16>
    %36 = vector.shape_cast %35 : vector<1x8x256xbf16> to vector<8x256xbf16>
    %c0_33 = arith.constant 0 : index
    %c0_34 = arith.constant 0 : index
    %c258 = arith.constant 258 : index
    %37 = vector.load %arg1[%c0_33, %c0_34, %c258] : memref<1x8x768xbf16, #tpu.memory_space<vmem>>, vector<1x8x256xbf16>
    %38 = vector.shape_cast %37 : vector<1x8x256xbf16> to vector<8x256xbf16>
    %c0_35 = arith.constant 0 : index
    %c0_36 = arith.constant 0 : index
    %c282 = arith.constant 282 : index
    %39 = vector.load %arg1[%c0_35, %c0_36, %c282] : memref<1x8x768xbf16, #tpu.memory_space<vmem>>, vector<1x8x256xbf16>
    %40 = vector.shape_cast %39 : vector<1x8x256xbf16> to vector<8x256xbf16>
    %c0_37 = arith.constant 0 : index
    %c0_38 = arith.constant 0 : index
    %c283 = arith.constant 283 : index
    %41 = vector.load %arg1[%c0_37, %c0_38, %c283] : memref<1x8x768xbf16, #tpu.memory_space<vmem>>, vector<1x8x256xbf16>
    %42 = vector.shape_cast %41 : vector<1x8x256xbf16> to vector<8x256xbf16>
    %c0_39 = arith.constant 0 : index
    %c0_40 = arith.constant 0 : index
    %c284 = arith.constant 284 : index
    %43 = vector.load %arg1[%c0_39, %c0_40, %c284] : memref<1x8x768xbf16, #tpu.memory_space<vmem>>, vector<1x8x256xbf16>
    %44 = vector.shape_cast %43 : vector<1x8x256xbf16> to vector<8x256xbf16>
    %c0_41 = arith.constant 0 : index
    %c0_42 = arith.constant 0 : index
    %c308 = arith.constant 308 : index
    %45 = vector.load %arg1[%c0_41, %c0_42, %c308] : memref<1x8x768xbf16, #tpu.memory_space<vmem>>, vector<1x8x256xbf16>
    %46 = vector.shape_cast %45 : vector<1x8x256xbf16> to vector<8x256xbf16>
    %c0_43 = arith.constant 0 : index
    %c0_44 = arith.constant 0 : index
    %c309 = arith.constant 309 : index
    %47 = vector.load %arg1[%c0_43, %c0_44, %c309] : memref<1x8x768xbf16, #tpu.memory_space<vmem>>, vector<1x8x256xbf16>
    %48 = vector.shape_cast %47 : vector<1x8x256xbf16> to vector<8x256xbf16>
    %c0_45 = arith.constant 0 : index
    %c0_46 = arith.constant 0 : index
    %c310 = arith.constant 310 : index
    %49 = vector.load %arg1[%c0_45, %c0_46, %c310] : memref<1x8x768xbf16, #tpu.memory_space<vmem>>, vector<1x8x256xbf16>
    %50 = vector.shape_cast %49 : vector<1x8x256xbf16> to vector<8x256xbf16>
    %51 = tpu.concatenate %34, %36, %38, %40, %42, %44, %46, %48, %50 in 0 : vector<8x256xbf16>, vector<8x256xbf16>, vector<8x256xbf16>, vector<8x256xbf16>, vector<8x256xbf16>, vector<8x256xbf16>, vector<8x256xbf16>, vector<8x256xbf16>, vector<8x256xbf16> -> vector<72x256xbf16>
    %c0_47 = arith.constant 0 : index
    %c0_48 = arith.constant 0 : index
    %52 = vector.load %arg3[%c0_47, %c0_48] : memref<16x72xbf16, #tpu.memory_space<vmem>>, vector<16x72xbf16>
    %cst_49 = arith.constant dense<0.000000e+00> : vector<16x256xf32>
    %53 = tpu.matmul %52, %51, %cst_49 {dimension_numbers = #tpu.dot_dimension_numbers<[1], [0], [0], [1], [0, 0, 1, 1], [], []>} : vector<16x72xbf16>, vector<72x256xbf16>, vector<16x256xf32> -> vector<16x256xf32>
    %c0_50 = arith.constant 0 : index
    %c0_51 = arith.constant 0 : index
    %54 = vector.load %arg4[%c0_50, %c0_51] : memref<16x1xf32, #tpu.memory_space<vmem>>, vector<16x1xf32>
    %55 = vector.broadcast %54 : vector<16x1xf32> to vector<16x256xf32>
    %56 = arith.addf %53, %55 : vector<16x256xf32>
    %cst_52 = arith.constant 2.000000e-01 : f32
    %57 = vector.broadcast %cst_52 : f32 to vector<16x256xf32>
    %58 = arith.mulf %57, %56 : vector<16x256xf32>
    %59 = arith.maximumf %56, %58 : vector<16x256xf32>
    %60 = arith.truncf %59 : vector<16x256xf32> to vector<16x256xbf16>
    %c0_53 = arith.constant 0 : index
    %c256_54 = arith.constant 256 : index
    %61 = vector.load %arg14[%c0_53, %c256_54] : memref<16x768xbf16, #tpu.memory_space<vmem>>, vector<16x256xbf16>
    tpu.vector_store %arg14[%c0_53, %c256_54], %60 {strides = array<i32>} : memref<16x768xbf16, #tpu.memory_space<vmem>>, vector<16x256xbf16>,
    %c0_55 = arith.constant 0 : index
    %c0_56 = arith.constant 0 : index
    %c512_57 = arith.constant 512 : index
    %62 = vector.load %arg1[%c0_55, %c0_56, %c512_57] : memref<1x8x768xbf16, #tpu.memory_space<vmem>>, vector<1x8x128xbf16>
    %63 = vector.shape_cast %62 : vector<1x8x128xbf16> to vector<8x128xbf16>
    %c0_58 = arith.constant 0 : index
    %c0_59 = arith.constant 0 : index
    %c513 = arith.constant 513 : index
    %64 = vector.load %arg1[%c0_58, %c0_59, %c513] : memref<1x8x768xbf16, #tpu.memory_space<vmem>>, vector<1x8x128xbf16>
    %65 = vector.shape_cast %64 : vector<1x8x128xbf16> to vector<8x128xbf16>
    %c0_60 = arith.constant 0 : index
    %c0_61 = arith.constant 0 : index
    %c514 = arith.constant 514 : index
    %66 = vector.load %arg1[%c0_60, %c0_61, %c514] : memref<1x8x768xbf16, #tpu.memory_space<vmem>>, vector<1x8x128xbf16>
    %67 = vector.shape_cast %66 : vector<1x8x128xbf16> to vector<8x128xbf16>
    %c0_62 = arith.constant 0 : index
    %c0_63 = arith.constant 0 : index
    %c538 = arith.constant 538 : index
    %68 = vector.load %arg1[%c0_62, %c0_63, %c538] : memref<1x8x768xbf16, #tpu.memory_space<vmem>>, vector<1x8x128xbf16>
    %69 = vector.shape_cast %68 : vector<1x8x128xbf16> to vector<8x128xbf16>
    %c0_64 = arith.constant 0 : index
    %c0_65 = arith.constant 0 : index
    %c539 = arith.constant 539 : index
    %70 = vector.load %arg1[%c0_64, %c0_65, %c539] : memref<1x8x768xbf16, #tpu.memory_space<vmem>>, vector<1x8x128xbf16>
    %71 = vector.shape_cast %70 : vector<1x8x128xbf16> to vector<8x128xbf16>
    %c0_66 = arith.constant 0 : index
    %c0_67 = arith.constant 0 : index
    %c540 = arith.constant 540 : index
    %72 = vector.load %arg1[%c0_66, %c0_67, %c540] : memref<1x8x768xbf16, #tpu.memory_space<vmem>>, vector<1x8x128xbf16>
    %73 = vector.shape_cast %72 : vector<1x8x128xbf16> to vector<8x128xbf16>
    %c0_68 = arith.constant 0 : index
    %c0_69 = arith.constant 0 : index
    %c564 = arith.constant 564 : index
    %74 = vector.load %arg1[%c0_68, %c0_69, %c564] : memref<1x8x768xbf16, #tpu.memory_space<vmem>>, vector<1x8x128xbf16>
    %75 = vector.shape_cast %74 : vector<1x8x128xbf16> to vector<8x128xbf16>
    %c0_70 = arith.constant 0 : index
    %c0_71 = arith.constant 0 : index
    %c565 = arith.constant 565 : index
    %76 = vector.load %arg1[%c0_70, %c0_71, %c565] : memref<1x8x768xbf16, #tpu.memory_space<vmem>>, vector<1x8x128xbf16>
    %77 = vector.shape_cast %76 : vector<1x8x128xbf16> to vector<8x128xbf16>
    %c0_72 = arith.constant 0 : index
    %c0_73 = arith.constant 0 : index
    %c566 = arith.constant 566 : index
    %78 = vector.load %arg1[%c0_72, %c0_73, %c566] : memref<1x8x768xbf16, #tpu.memory_space<vmem>>, vector<1x8x128xbf16>
    %79 = vector.shape_cast %78 : vector<1x8x128xbf16> to vector<8x128xbf16>
    %80 = tpu.concatenate %63, %65, %67, %69, %71, %73, %75, %77, %79 in 0 : vector<8x128xbf16>, vector<8x128xbf16>, vector<8x128xbf16>, vector<8x128xbf16>, vector<8x128xbf16>, vector<8x128xbf16>, vector<8x128xbf16>, vector<8x128xbf16>, vector<8x128xbf16> -> vector<72x128xbf16>
    %c0_74 = arith.constant 0 : index
    %c0_75 = arith.constant 0 : index
    %81 = vector.load %arg3[%c0_74, %c0_75] : memref<16x72xbf16, #tpu.memory_space<vmem>>, vector<16x72xbf16>
    %cst_76 = arith.constant dense<0.000000e+00> : vector<16x128xf32>
    %82 = tpu.matmul %81, %80, %cst_76 {dimension_numbers = #tpu.dot_dimension_numbers<[1], [0], [0], [1], [0, 0, 1, 1], [], []>} : vector<16x72xbf16>, vector<72x128xbf16>, vector<16x128xf32> -> vector<16x128xf32>
    %c0_77 = arith.constant 0 : index
    %c0_78 = arith.constant 0 : index
    %83 = vector.load %arg4[%c0_77, %c0_78] : memref<16x1xf32, #tpu.memory_space<vmem>>, vector<16x1xf32>
    %84 = vector.broadcast %83 : vector<16x1xf32> to vector<16x128xf32>
    %85 = arith.addf %82, %84 : vector<16x128xf32>
    %cst_79 = arith.constant 2.000000e-01 : f32
    %86 = vector.broadcast %cst_79 : f32 to vector<16x128xf32>
    %87 = arith.mulf %86, %85 : vector<16x128xf32>
    %88 = arith.maximumf %85, %87 : vector<16x128xf32>
    %89 = arith.truncf %88 : vector<16x128xf32> to vector<16x128xbf16>
    %c0_80 = arith.constant 0 : index
    %c512_81 = arith.constant 512 : index
    %90 = vector.load %arg14[%c0_80, %c512_81] : memref<16x768xbf16, #tpu.memory_space<vmem>>, vector<16x128xbf16>
    tpu.vector_store %arg14[%c0_80, %c512_81], %89 {strides = array<i32>} : memref<16x768xbf16, #tpu.memory_space<vmem>>, vector<16x128xbf16>,
    %c0_82 = arith.constant 0 : index
    %c0_83 = arith.constant 0 : index
    %91 = vector.load %arg14[%c0_82, %c0_83] : memref<16x768xbf16, #tpu.memory_space<vmem>>, vector<16x256xbf16>
    %c0_84 = arith.constant 0 : index
    %c1_85 = arith.constant 1 : index
    %92 = vector.load %arg14[%c0_84, %c1_85] : memref<16x768xbf16, #tpu.memory_space<vmem>>, vector<16x256xbf16>
    %c0_86 = arith.constant 0 : index
    %c2_87 = arith.constant 2 : index
    %93 = vector.load %arg14[%c0_86, %c2_87] : memref<16x768xbf16, #tpu.memory_space<vmem>>, vector<16x256xbf16>
    %c0_88 = arith.constant 0 : index
    %c26_89 = arith.constant 26 : index
    %94 = vector.load %arg14[%c0_88, %c26_89] : memref<16x768xbf16, #tpu.memory_space<vmem>>, vector<16x256xbf16>
    %c0_90 = arith.constant 0 : index
    %c27_91 = arith.constant 27 : index
    %95 = vector.load %arg14[%c0_90, %c27_91] : memref<16x768xbf16, #tpu.memory_space<vmem>>, vector<16x256xbf16>
    %c0_92 = arith.constant 0 : index
    %c28_93 = arith.constant 28 : index
    %96 = vector.load %arg14[%c0_92, %c28_93] : memref<16x768xbf16, #tpu.memory_space<vmem>>, vector<16x256xbf16>
    %c0_94 = arith.constant 0 : index
    %c52_95 = arith.constant 52 : index
    %97 = vector.load %arg14[%c0_94, %c52_95] : memref<16x768xbf16, #tpu.memory_space<vmem>>, vector<16x256xbf16>
    %c0_96 = arith.constant 0 : index
    %c53_97 = arith.constant 53 : index
    %98 = vector.load %arg14[%c0_96, %c53_97] : memref<16x768xbf16, #tpu.memory_space<vmem>>, vector<16x256xbf16>
    %c0_98 = arith.constant 0 : index
    %c54_99 = arith.constant 54 : index
    %99 = vector.load %arg14[%c0_98, %c54_99] : memref<16x768xbf16, #tpu.memory_space<vmem>>, vector<16x256xbf16>
    %100 = tpu.concatenate %91, %92, %93, %94, %95, %96, %97, %98, %99 in 0 : vector<16x256xbf16>, vector<16x256xbf16>, vector<16x256xbf16>, vector<16x256xbf16>, vector<16x256xbf16>, vector<16x256xbf16>, vector<16x256xbf16>, vector<16x256xbf16>, vector<16x256xbf16> -> vector<144x256xbf16>
    %c0_100 = arith.constant 0 : index
    %c0_101 = arith.constant 0 : index
    %101 = vector.load %arg5[%c0_100, %c0_101] : memref<16x144xbf16, #tpu.memory_space<vmem>>, vector<16x144xbf16>
    %cst_102 = arith.constant dense<0.000000e+00> : vector<16x256xf32>
    %102 = tpu.matmul %101, %100, %cst_102 {dimension_numbers = #tpu.dot_dimension_numbers<[1], [0], [0], [1], [0, 0, 1, 1], [], []>} : vector<16x144xbf16>, vector<144x256xbf16>, vector<16x256xf32> -> vector<16x256xf32>
    %c0_103 = arith.constant 0 : index
    %c0_104 = arith.constant 0 : index
    %103 = vector.load %arg6[%c0_103, %c0_104] : memref<16x1xf32, #tpu.memory_space<vmem>>, vector<16x1xf32>
    %104 = vector.broadcast %103 : vector<16x1xf32> to vector<16x256xf32>
    %105 = arith.addf %102, %104 : vector<16x256xf32>
    %cst_105 = arith.constant 2.000000e-01 : f32
    %106 = vector.broadcast %cst_105 : f32 to vector<16x256xf32>
    %107 = arith.mulf %106, %105 : vector<16x256xf32>
    %108 = arith.maximumf %105, %107 : vector<16x256xf32>
    %109 = arith.truncf %108 : vector<16x256xf32> to vector<16x256xbf16>
    %c0_106 = arith.constant 0 : index
    %c0_107 = arith.constant 0 : index
    %110 = vector.load %arg15[%c0_106, %c0_107] : memref<16x768xbf16, #tpu.memory_space<vmem>>, vector<16x256xbf16>
    tpu.vector_store %arg15[%c0_106, %c0_107], %109 {strides = array<i32>} : memref<16x768xbf16, #tpu.memory_space<vmem>>, vector<16x256xbf16>,
    %c0_108 = arith.constant 0 : index
    %c256_109 = arith.constant 256 : index
    %111 = vector.load %arg14[%c0_108, %c256_109] : memref<16x768xbf16, #tpu.memory_space<vmem>>, vector<16x256xbf16>
    %c0_110 = arith.constant 0 : index
    %c257_111 = arith.constant 257 : index
    %112 = vector.load %arg14[%c0_110, %c257_111] : memref<16x768xbf16, #tpu.memory_space<vmem>>, vector<16x256xbf16>
    %c0_112 = arith.constant 0 : index
    %c258_113 = arith.constant 258 : index
    %113 = vector.load %arg14[%c0_112, %c258_113] : memref<16x768xbf16, #tpu.memory_space<vmem>>, vector<16x256xbf16>
    %c0_114 = arith.constant 0 : index
    %c282_115 = arith.constant 282 : index
    %114 = vector.load %arg14[%c0_114, %c282_115] : memref<16x768xbf16, #tpu.memory_space<vmem>>, vector<16x256xbf16>
    %c0_116 = arith.constant 0 : index
    %c283_117 = arith.constant 283 : index
    %115 = vector.load %arg14[%c0_116, %c283_117] : memref<16x768xbf16, #tpu.memory_space<vmem>>, vector<16x256xbf16>
    %c0_118 = arith.constant 0 : index
    %c284_119 = arith.constant 284 : index
    %116 = vector.load %arg14[%c0_118, %c284_119] : memref<16x768xbf16, #tpu.memory_space<vmem>>, vector<16x256xbf16>
    %c0_120 = arith.constant 0 : index
    %c308_121 = arith.constant 308 : index
    %117 = vector.load %arg14[%c0_120, %c308_121] : memref<16x768xbf16, #tpu.memory_space<vmem>>, vector<16x256xbf16>
    %c0_122 = arith.constant 0 : index
    %c309_123 = arith.constant 309 : index
    %118 = vector.load %arg14[%c0_122, %c309_123] : memref<16x768xbf16, #tpu.memory_space<vmem>>, vector<16x256xbf16>
    %c0_124 = arith.constant 0 : index
    %c310_125 = arith.constant 310 : index
    %119 = vector.load %arg14[%c0_124, %c310_125] : memref<16x768xbf16, #tpu.memory_space<vmem>>, vector<16x256xbf16>
    %120 = tpu.concatenate %111, %112, %113, %114, %115, %116, %117, %118, %119 in 0 : vector<16x256xbf16>, vector<16x256xbf16>, vector<16x256xbf16>, vector<16x256xbf16>, vector<16x256xbf16>, vector<16x256xbf16>, vector<16x256xbf16>, vector<16x256xbf16>, vector<16x256xbf16> -> vector<144x256xbf16>
    %c0_126 = arith.constant 0 : index
    %c0_127 = arith.constant 0 : index
    %121 = vector.load %arg5[%c0_126, %c0_127] : memref<16x144xbf16, #tpu.memory_space<vmem>>, vector<16x144xbf16>
    %cst_128 = arith.constant dense<0.000000e+00> : vector<16x256xf32>
    %122 = tpu.matmul %121, %120, %cst_128 {dimension_numbers = #tpu.dot_dimension_numbers<[1], [0], [0], [1], [0, 0, 1, 1], [], []>} : vector<16x144xbf16>, vector<144x256xbf16>, vector<16x256xf32> -> vector<16x256xf32>
    %c0_129 = arith.constant 0 : index
    %c0_130 = arith.constant 0 : index
    %123 = vector.load %arg6[%c0_129, %c0_130] : memref<16x1xf32, #tpu.memory_space<vmem>>, vector<16x1xf32>
    %124 = vector.broadcast %123 : vector<16x1xf32> to vector<16x256xf32>
    %125 = arith.addf %122, %124 : vector<16x256xf32>
    %cst_131 = arith.constant 2.000000e-01 : f32
    %126 = vector.broadcast %cst_131 : f32 to vector<16x256xf32>
    %127 = arith.mulf %126, %125 : vector<16x256xf32>
    %128 = arith.maximumf %125, %127 : vector<16x256xf32>
    %129 = arith.truncf %128 : vector<16x256xf32> to vector<16x256xbf16>
    %c0_132 = arith.constant 0 : index
    %c256_133 = arith.constant 256 : index
    %130 = vector.load %arg15[%c0_132, %c256_133] : memref<16x768xbf16, #tpu.memory_space<vmem>>, vector<16x256xbf16>
    tpu.vector_store %arg15[%c0_132, %c256_133], %129 {strides = array<i32>} : memref<16x768xbf16, #tpu.memory_space<vmem>>, vector<16x256xbf16>,
    %c0_134 = arith.constant 0 : index
    %c512_135 = arith.constant 512 : index
    %131 = vector.load %arg14[%c0_134, %c512_135] : memref<16x768xbf16, #tpu.memory_space<vmem>>, vector<16x128xbf16>
    %c0_136 = arith.constant 0 : index
    %c513_137 = arith.constant 513 : index
    %132 = vector.load %arg14[%c0_136, %c513_137] : memref<16x768xbf16, #tpu.memory_space<vmem>>, vector<16x128xbf16>
    %c0_138 = arith.constant 0 : index
    %c514_139 = arith.constant 514 : index
    %133 = vector.load %arg14[%c0_138, %c514_139] : memref<16x768xbf16, #tpu.memory_space<vmem>>, vector<16x128xbf16>
    %c0_140 = arith.constant 0 : index
    %c538_141 = arith.constant 538 : index
    %134 = vector.load %arg14[%c0_140, %c538_141] : memref<16x768xbf16, #tpu.memory_space<vmem>>, vector<16x128xbf16>
    %c0_142 = arith.constant 0 : index
    %c539_143 = arith.constant 539 : index
    %135 = vector.load %arg14[%c0_142, %c539_143] : memref<16x768xbf16, #tpu.memory_space<vmem>>, vector<16x128xbf16>
    %c0_144 = arith.constant 0 : index
    %c540_145 = arith.constant 540 : index
    %136 = vector.load %arg14[%c0_144, %c540_145] : memref<16x768xbf16, #tpu.memory_space<vmem>>, vector<16x128xbf16>
    %c0_146 = arith.constant 0 : index
    %c564_147 = arith.constant 564 : index
    %137 = vector.load %arg14[%c0_146, %c564_147] : memref<16x768xbf16, #tpu.memory_space<vmem>>, vector<16x128xbf16>
    %c0_148 = arith.constant 0 : index
    %c565_149 = arith.constant 565 : index
    %138 = vector.load %arg14[%c0_148, %c565_149] : memref<16x768xbf16, #tpu.memory_space<vmem>>, vector<16x128xbf16>
    %c0_150 = arith.constant 0 : index
    %c566_151 = arith.constant 566 : index
    %139 = vector.load %arg14[%c0_150, %c566_151] : memref<16x768xbf16, #tpu.memory_space<vmem>>, vector<16x128xbf16>
    %140 = tpu.concatenate %131, %132, %133, %134, %135, %136, %137, %138, %139 in 0 : vector<16x128xbf16>, vector<16x128xbf16>, vector<16x128xbf16>, vector<16x128xbf16>, vector<16x128xbf16>, vector<16x128xbf16>, vector<16x128xbf16>, vector<16x128xbf16>, vector<16x128xbf16> -> vector<144x128xbf16>
    %c0_152 = arith.constant 0 : index
    %c0_153 = arith.constant 0 : index
    %141 = vector.load %arg5[%c0_152, %c0_153] : memref<16x144xbf16, #tpu.memory_space<vmem>>, vector<16x144xbf16>
    %cst_154 = arith.constant dense<0.000000e+00> : vector<16x128xf32>
    %142 = tpu.matmul %141, %140, %cst_154 {dimension_numbers = #tpu.dot_dimension_numbers<[1], [0], [0], [1], [0, 0, 1, 1], [], []>} : vector<16x144xbf16>, vector<144x128xbf16>, vector<16x128xf32> -> vector<16x128xf32>
    %c0_155 = arith.constant 0 : index
    %c0_156 = arith.constant 0 : index
    %143 = vector.load %arg6[%c0_155, %c0_156] : memref<16x1xf32, #tpu.memory_space<vmem>>, vector<16x1xf32>
    %144 = vector.broadcast %143 : vector<16x1xf32> to vector<16x128xf32>
    %145 = arith.addf %142, %144 : vector<16x128xf32>
    %cst_157 = arith.constant 2.000000e-01 : f32
    %146 = vector.broadcast %cst_157 : f32 to vector<16x128xf32>
    %147 = arith.mulf %146, %145 : vector<16x128xf32>
    %148 = arith.maximumf %145, %147 : vector<16x128xf32>
    %149 = arith.truncf %148 : vector<16x128xf32> to vector<16x128xbf16>
    %c0_158 = arith.constant 0 : index
    %c512_159 = arith.constant 512 : index
    %150 = vector.load %arg15[%c0_158, %c512_159] : memref<16x768xbf16, #tpu.memory_space<vmem>>, vector<16x128xbf16>
    tpu.vector_store %arg15[%c0_158, %c512_159], %149 {strides = array<i32>} : memref<16x768xbf16, #tpu.memory_space<vmem>>, vector<16x128xbf16>,
    %c0_160 = arith.constant 0 : index
    %c0_161 = arith.constant 0 : index
    %151 = vector.load %arg15[%c0_160, %c0_161] : memref<16x768xbf16, #tpu.memory_space<vmem>>, vector<16x256xbf16>
    %c0_162 = arith.constant 0 : index
    %c1_163 = arith.constant 1 : index
    %152 = vector.load %arg15[%c0_162, %c1_163] : memref<16x768xbf16, #tpu.memory_space<vmem>>, vector<16x256xbf16>
    %c0_164 = arith.constant 0 : index
    %c2_165 = arith.constant 2 : index
    %153 = vector.load %arg15[%c0_164, %c2_165] : memref<16x768xbf16, #tpu.memory_space<vmem>>, vector<16x256xbf16>
    %c0_166 = arith.constant 0 : index
    %c26_167 = arith.constant 26 : index
    %154 = vector.load %arg15[%c0_166, %c26_167] : memref<16x768xbf16, #tpu.memory_space<vmem>>, vector<16x256xbf16>
    %c0_168 = arith.constant 0 : index
    %c27_169 = arith.constant 27 : index
    %155 = vector.load %arg15[%c0_168, %c27_169] : memref<16x768xbf16, #tpu.memory_space<vmem>>, vector<16x256xbf16>
    %c0_170 = arith.constant 0 : index
    %c28_171 = arith.constant 28 : index
    %156 = vector.load %arg15[%c0_170, %c28_171] : memref<16x768xbf16, #tpu.memory_space<vmem>>, vector<16x256xbf16>
    %c0_172 = arith.constant 0 : index
    %c52_173 = arith.constant 52 : index
    %157 = vector.load %arg15[%c0_172, %c52_173] : memref<16x768xbf16, #tpu.memory_space<vmem>>, vector<16x256xbf16>
    %c0_174 = arith.constant 0 : index
    %c53_175 = arith.constant 53 : index
    %158 = vector.load %arg15[%c0_174, %c53_175] : memref<16x768xbf16, #tpu.memory_space<vmem>>, vector<16x256xbf16>
    %c0_176 = arith.constant 0 : index
    %c54_177 = arith.constant 54 : index
    %159 = vector.load %arg15[%c0_176, %c54_177] : memref<16x768xbf16, #tpu.memory_space<vmem>>, vector<16x256xbf16>
    %160 = tpu.concatenate %151, %152, %153, %154, %155, %156, %157, %158, %159 in 0 : vector<16x256xbf16>, vector<16x256xbf16>, vector<16x256xbf16>, vector<16x256xbf16>, vector<16x256xbf16>, vector<16x256xbf16>, vector<16x256xbf16>, vector<16x256xbf16>, vector<16x256xbf16> -> vector<144x256xbf16>
    %c0_178 = arith.constant 0 : index
    %c0_179 = arith.constant 0 : index
    %161 = vector.load %arg7[%c0_178, %c0_179] : memref<16x144xbf16, #tpu.memory_space<vmem>>, vector<16x144xbf16>
    %cst_180 = arith.constant dense<0.000000e+00> : vector<16x256xf32>
    %162 = tpu.matmul %161, %160, %cst_180 {dimension_numbers = #tpu.dot_dimension_numbers<[1], [0], [0], [1], [0, 0, 1, 1], [], []>} : vector<16x144xbf16>, vector<144x256xbf16>, vector<16x256xf32> -> vector<16x256xf32>
    %c0_181 = arith.constant 0 : index
    %c0_182 = arith.constant 0 : index
    %163 = vector.load %arg8[%c0_181, %c0_182] : memref<16x1xf32, #tpu.memory_space<vmem>>, vector<16x1xf32>
    %164 = vector.broadcast %163 : vector<16x1xf32> to vector<16x256xf32>
    %165 = arith.addf %162, %164 : vector<16x256xf32>
    %cst_183 = arith.constant 2.000000e-01 : f32
    %166 = vector.broadcast %cst_183 : f32 to vector<16x256xf32>
    %167 = arith.mulf %166, %165 : vector<16x256xf32>
    %168 = arith.maximumf %165, %167 : vector<16x256xf32>
    %169 = arith.truncf %168 : vector<16x256xf32> to vector<16x256xbf16>
    %c0_184 = arith.constant 0 : index
    %c0_185 = arith.constant 0 : index
    %170 = vector.load %arg14[%c0_184, %c0_185] : memref<16x768xbf16, #tpu.memory_space<vmem>>, vector<16x256xbf16>
    tpu.vector_store %arg14[%c0_184, %c0_185], %169 {strides = array<i32>} : memref<16x768xbf16, #tpu.memory_space<vmem>>, vector<16x256xbf16>,
    %c0_186 = arith.constant 0 : index
    %c256_187 = arith.constant 256 : index
    %171 = vector.load %arg15[%c0_186, %c256_187] : memref<16x768xbf16, #tpu.memory_space<vmem>>, vector<16x256xbf16>
    %c0_188 = arith.constant 0 : index
    %c257_189 = arith.constant 257 : index
    %172 = vector.load %arg15[%c0_188, %c257_189] : memref<16x768xbf16, #tpu.memory_space<vmem>>, vector<16x256xbf16>
    %c0_190 = arith.constant 0 : index
    %c258_191 = arith.constant 258 : index
    %173 = vector.load %arg15[%c0_190, %c258_191] : memref<16x768xbf16, #tpu.memory_space<vmem>>, vector<16x256xbf16>
    %c0_192 = arith.constant 0 : index
    %c282_193 = arith.constant 282 : index
    %174 = vector.load %arg15[%c0_192, %c282_193] : memref<16x768xbf16, #tpu.memory_space<vmem>>, vector<16x256xbf16>
    %c0_194 = arith.constant 0 : index
    %c283_195 = arith.constant 283 : index
    %175 = vector.load %arg15[%c0_194, %c283_195] : memref<16x768xbf16, #tpu.memory_space<vmem>>, vector<16x256xbf16>
    %c0_196 = arith.constant 0 : index
    %c284_197 = arith.constant 284 : index
    %176 = vector.load %arg15[%c0_196, %c284_197] : memref<16x768xbf16, #tpu.memory_space<vmem>>, vector<16x256xbf16>
    %c0_198 = arith.constant 0 : index
    %c308_199 = arith.constant 308 : index
    %177 = vector.load %arg15[%c0_198, %c308_199] : memref<16x768xbf16, #tpu.memory_space<vmem>>, vector<16x256xbf16>
    %c0_200 = arith.constant 0 : index
    %c309_201 = arith.constant 309 : index
    %178 = vector.load %arg15[%c0_200, %c309_201] : memref<16x768xbf16, #tpu.memory_space<vmem>>, vector<16x256xbf16>
    %c0_202 = arith.constant 0 : index
    %c310_203 = arith.constant 310 : index
    %179 = vector.load %arg15[%c0_202, %c310_203] : memref<16x768xbf16, #tpu.memory_space<vmem>>, vector<16x256xbf16>
    %180 = tpu.concatenate %171, %172, %173, %174, %175, %176, %177, %178, %179 in 0 : vector<16x256xbf16>, vector<16x256xbf16>, vector<16x256xbf16>, vector<16x256xbf16>, vector<16x256xbf16>, vector<16x256xbf16>, vector<16x256xbf16>, vector<16x256xbf16>, vector<16x256xbf16> -> vector<144x256xbf16>
    %c0_204 = arith.constant 0 : index
    %c0_205 = arith.constant 0 : index
    %181 = vector.load %arg7[%c0_204, %c0_205] : memref<16x144xbf16, #tpu.memory_space<vmem>>, vector<16x144xbf16>
    %cst_206 = arith.constant dense<0.000000e+00> : vector<16x256xf32>
    %182 = tpu.matmul %181, %180, %cst_206 {dimension_numbers = #tpu.dot_dimension_numbers<[1], [0], [0], [1], [0, 0, 1, 1], [], []>} : vector<16x144xbf16>, vector<144x256xbf16>, vector<16x256xf32> -> vector<16x256xf32>
    %c0_207 = arith.constant 0 : index
    %c0_208 = arith.constant 0 : index
    %183 = vector.load %arg8[%c0_207, %c0_208] : memref<16x1xf32, #tpu.memory_space<vmem>>, vector<16x1xf32>
    %184 = vector.broadcast %183 : vector<16x1xf32> to vector<16x256xf32>
    %185 = arith.addf %182, %184 : vector<16x256xf32>
    %cst_209 = arith.constant 2.000000e-01 : f32
    %186 = vector.broadcast %cst_209 : f32 to vector<16x256xf32>
    %187 = arith.mulf %186, %185 : vector<16x256xf32>
    %188 = arith.maximumf %185, %187 : vector<16x256xf32>
    %189 = arith.truncf %188 : vector<16x256xf32> to vector<16x256xbf16>
    %c0_210 = arith.constant 0 : index
    %c256_211 = arith.constant 256 : index
    %190 = vector.load %arg14[%c0_210, %c256_211] : memref<16x768xbf16, #tpu.memory_space<vmem>>, vector<16x256xbf16>
    tpu.vector_store %arg14[%c0_210, %c256_211], %189 {strides = array<i32>} : memref<16x768xbf16, #tpu.memory_space<vmem>>, vector<16x256xbf16>,
    %c0_212 = arith.constant 0 : index
    %c512_213 = arith.constant 512 : index
    %191 = vector.load %arg15[%c0_212, %c512_213] : memref<16x768xbf16, #tpu.memory_space<vmem>>, vector<16x128xbf16>
    %c0_214 = arith.constant 0 : index
    %c513_215 = arith.constant 513 : index
    %192 = vector.load %arg15[%c0_214, %c513_215] : memref<16x768xbf16, #tpu.memory_space<vmem>>, vector<16x128xbf16>
    %c0_216 = arith.constant 0 : index
    %c514_217 = arith.constant 514 : index
    %193 = vector.load %arg15[%c0_216, %c514_217] : memref<16x768xbf16, #tpu.memory_space<vmem>>, vector<16x128xbf16>
    %c0_218 = arith.constant 0 : index
    %c538_219 = arith.constant 538 : index
    %194 = vector.load %arg15[%c0_218, %c538_219] : memref<16x768xbf16, #tpu.memory_space<vmem>>, vector<16x128xbf16>
    %c0_220 = arith.constant 0 : index
    %c539_221 = arith.constant 539 : index
    %195 = vector.load %arg15[%c0_220, %c539_221] : memref<16x768xbf16, #tpu.memory_space<vmem>>, vector<16x128xbf16>
    %c0_222 = arith.constant 0 : index
    %c540_223 = arith.constant 540 : index
    %196 = vector.load %arg15[%c0_222, %c540_223] : memref<16x768xbf16, #tpu.memory_space<vmem>>, vector<16x128xbf16>
    %c0_224 = arith.constant 0 : index
    %c564_225 = arith.constant 564 : index
    %197 = vector.load %arg15[%c0_224, %c564_225] : memref<16x768xbf16, #tpu.memory_space<vmem>>, vector<16x128xbf16>
    %c0_226 = arith.constant 0 : index
    %c565_227 = arith.constant 565 : index
    %198 = vector.load %arg15[%c0_226, %c565_227] : memref<16x768xbf16, #tpu.memory_space<vmem>>, vector<16x128xbf16>
    %c0_228 = arith.constant 0 : index
    %c566_229 = arith.constant 566 : index
    %199 = vector.load %arg15[%c0_228, %c566_229] : memref<16x768xbf16, #tpu.memory_space<vmem>>, vector<16x128xbf16>
    %200 = tpu.concatenate %191, %192, %193, %194, %195, %196, %197, %198, %199 in 0 : vector<16x128xbf16>, vector<16x128xbf16>, vector<16x128xbf16>, vector<16x128xbf16>, vector<16x128xbf16>, vector<16x128xbf16>, vector<16x128xbf16>, vector<16x128xbf16>, vector<16x128xbf16> -> vector<144x128xbf16>
    %c0_230 = arith.constant 0 : index
    %c0_231 = arith.constant 0 : index
    %201 = vector.load %arg7[%c0_230, %c0_231] : memref<16x144xbf16, #tpu.memory_space<vmem>>, vector<16x144xbf16>
    %cst_232 = arith.constant dense<0.000000e+00> : vector<16x128xf32>
    %202 = tpu.matmul %201, %200, %cst_232 {dimension_numbers = #tpu.dot_dimension_numbers<[1], [0], [0], [1], [0, 0, 1, 1], [], []>} : vector<16x144xbf16>, vector<144x128xbf16>, vector<16x128xf32> -> vector<16x128xf32>
    %c0_233 = arith.constant 0 : index
    %c0_234 = arith.constant 0 : index
    %203 = vector.load %arg8[%c0_233, %c0_234] : memref<16x1xf32, #tpu.memory_space<vmem>>, vector<16x1xf32>
    %204 = vector.broadcast %203 : vector<16x1xf32> to vector<16x128xf32>
    %205 = arith.addf %202, %204 : vector<16x128xf32>
    %cst_235 = arith.constant 2.000000e-01 : f32
    %206 = vector.broadcast %cst_235 : f32 to vector<16x128xf32>
    %207 = arith.mulf %206, %205 : vector<16x128xf32>
    %208 = arith.maximumf %205, %207 : vector<16x128xf32>
    %209 = arith.truncf %208 : vector<16x128xf32> to vector<16x128xbf16>
    %c0_236 = arith.constant 0 : index
    %c512_237 = arith.constant 512 : index
    %210 = vector.load %arg14[%c0_236, %c512_237] : memref<16x768xbf16, #tpu.memory_space<vmem>>, vector<16x128xbf16>
    tpu.vector_store %arg14[%c0_236, %c512_237], %209 {strides = array<i32>} : memref<16x768xbf16, #tpu.memory_space<vmem>>, vector<16x128xbf16>,
    %c0_238 = arith.constant 0 : index
    %c0_239 = arith.constant 0 : index
    %211 = vector.load %arg14[%c0_238, %c0_239] : memref<16x768xbf16, #tpu.memory_space<vmem>>, vector<16x256xbf16>
    %c0_240 = arith.constant 0 : index
    %c1_241 = arith.constant 1 : index
    %212 = vector.load %arg14[%c0_240, %c1_241] : memref<16x768xbf16, #tpu.memory_space<vmem>>, vector<16x256xbf16>
    %c0_242 = arith.constant 0 : index
    %c2_243 = arith.constant 2 : index
    %213 = vector.load %arg14[%c0_242, %c2_243] : memref<16x768xbf16, #tpu.memory_space<vmem>>, vector<16x256xbf16>
    %c0_244 = arith.constant 0 : index
    %c26_245 = arith.constant 26 : index
    %214 = vector.load %arg14[%c0_244, %c26_245] : memref<16x768xbf16, #tpu.memory_space<vmem>>, vector<16x256xbf16>
    %c0_246 = arith.constant 0 : index
    %c27_247 = arith.constant 27 : index
    %215 = vector.load %arg14[%c0_246, %c27_247] : memref<16x768xbf16, #tpu.memory_space<vmem>>, vector<16x256xbf16>
    %c0_248 = arith.constant 0 : index
    %c28_249 = arith.constant 28 : index
    %216 = vector.load %arg14[%c0_248, %c28_249] : memref<16x768xbf16, #tpu.memory_space<vmem>>, vector<16x256xbf16>
    %c0_250 = arith.constant 0 : index
    %c52_251 = arith.constant 52 : index
    %217 = vector.load %arg14[%c0_250, %c52_251] : memref<16x768xbf16, #tpu.memory_space<vmem>>, vector<16x256xbf16>
    %c0_252 = arith.constant 0 : index
    %c53_253 = arith.constant 53 : index
    %218 = vector.load %arg14[%c0_252, %c53_253] : memref<16x768xbf16, #tpu.memory_space<vmem>>, vector<16x256xbf16>
    %c0_254 = arith.constant 0 : index
    %c54_255 = arith.constant 54 : index
    %219 = vector.load %arg14[%c0_254, %c54_255] : memref<16x768xbf16, #tpu.memory_space<vmem>>, vector<16x256xbf16>
    %220 = tpu.concatenate %211, %212, %213, %214, %215, %216, %217, %218, %219 in 0 : vector<16x256xbf16>, vector<16x256xbf16>, vector<16x256xbf16>, vector<16x256xbf16>, vector<16x256xbf16>, vector<16x256xbf16>, vector<16x256xbf16>, vector<16x256xbf16>, vector<16x256xbf16> -> vector<144x256xbf16>
    %c0_256 = arith.constant 0 : index
    %c0_257 = arith.constant 0 : index
    %221 = vector.load %arg9[%c0_256, %c0_257] : memref<16x144xbf16, #tpu.memory_space<vmem>>, vector<16x144xbf16>
    %cst_258 = arith.constant dense<0.000000e+00> : vector<16x256xf32>
    %222 = tpu.matmul %221, %220, %cst_258 {dimension_numbers = #tpu.dot_dimension_numbers<[1], [0], [0], [1], [0, 0, 1, 1], [], []>} : vector<16x144xbf16>, vector<144x256xbf16>, vector<16x256xf32> -> vector<16x256xf32>
    %c0_259 = arith.constant 0 : index
    %c0_260 = arith.constant 0 : index
    %223 = vector.load %arg10[%c0_259, %c0_260] : memref<16x1xf32, #tpu.memory_space<vmem>>, vector<16x1xf32>
    %224 = vector.broadcast %223 : vector<16x1xf32> to vector<16x256xf32>
    %225 = arith.addf %222, %224 : vector<16x256xf32>
    %cst_261 = arith.constant 2.000000e-01 : f32
    %226 = vector.broadcast %cst_261 : f32 to vector<16x256xf32>
    %227 = arith.mulf %226, %225 : vector<16x256xf32>
    %228 = arith.maximumf %225, %227 : vector<16x256xf32>
    %229 = arith.truncf %228 : vector<16x256xf32> to vector<16x256xbf16>
    %c0_262 = arith.constant 0 : index
    %c0_263 = arith.constant 0 : index
    %230 = vector.load %arg15[%c0_262, %c0_263] : memref<16x768xbf16, #tpu.memory_space<vmem>>, vector<16x256xbf16>
    tpu.vector_store %arg15[%c0_262, %c0_263], %229 {strides = array<i32>} : memref<16x768xbf16, #tpu.memory_space<vmem>>, vector<16x256xbf16>,
    %c0_264 = arith.constant 0 : index
    %c256_265 = arith.constant 256 : index
    %231 = vector.load %arg14[%c0_264, %c256_265] : memref<16x768xbf16, #tpu.memory_space<vmem>>, vector<16x256xbf16>
    %c0_266 = arith.constant 0 : index
    %c257_267 = arith.constant 257 : index
    %232 = vector.load %arg14[%c0_266, %c257_267] : memref<16x768xbf16, #tpu.memory_space<vmem>>, vector<16x256xbf16>
    %c0_268 = arith.constant 0 : index
    %c258_269 = arith.constant 258 : index
    %233 = vector.load %arg14[%c0_268, %c258_269] : memref<16x768xbf16, #tpu.memory_space<vmem>>, vector<16x256xbf16>
    %c0_270 = arith.constant 0 : index
    %c282_271 = arith.constant 282 : index
    %234 = vector.load %arg14[%c0_270, %c282_271] : memref<16x768xbf16, #tpu.memory_space<vmem>>, vector<16x256xbf16>
    %c0_272 = arith.constant 0 : index
    %c283_273 = arith.constant 283 : index
    %235 = vector.load %arg14[%c0_272, %c283_273] : memref<16x768xbf16, #tpu.memory_space<vmem>>, vector<16x256xbf16>
    %c0_274 = arith.constant 0 : index
    %c284_275 = arith.constant 284 : index
    %236 = vector.load %arg14[%c0_274, %c284_275] : memref<16x768xbf16, #tpu.memory_space<vmem>>, vector<16x256xbf16>
    %c0_276 = arith.constant 0 : index
    %c308_277 = arith.constant 308 : index
    %237 = vector.load %arg14[%c0_276, %c308_277] : memref<16x768xbf16, #tpu.memory_space<vmem>>, vector<16x256xbf16>
    %c0_278 = arith.constant 0 : index
    %c309_279 = arith.constant 309 : index
    %238 = vector.load %arg14[%c0_278, %c309_279] : memref<16x768xbf16, #tpu.memory_space<vmem>>, vector<16x256xbf16>
    %c0_280 = arith.constant 0 : index
    %c310_281 = arith.constant 310 : index
    %239 = vector.load %arg14[%c0_280, %c310_281] : memref<16x768xbf16, #tpu.memory_space<vmem>>, vector<16x256xbf16>
    %240 = tpu.concatenate %231, %232, %233, %234, %235, %236, %237, %238, %239 in 0 : vector<16x256xbf16>, vector<16x256xbf16>, vector<16x256xbf16>, vector<16x256xbf16>, vector<16x256xbf16>, vector<16x256xbf16>, vector<16x256xbf16>, vector<16x256xbf16>, vector<16x256xbf16> -> vector<144x256xbf16>
    %c0_282 = arith.constant 0 : index
    %c0_283 = arith.constant 0 : index
    %241 = vector.load %arg9[%c0_282, %c0_283] : memref<16x144xbf16, #tpu.memory_space<vmem>>, vector<16x144xbf16>
    %cst_284 = arith.constant dense<0.000000e+00> : vector<16x256xf32>
    %242 = tpu.matmul %241, %240, %cst_284 {dimension_numbers = #tpu.dot_dimension_numbers<[1], [0], [0], [1], [0, 0, 1, 1], [], []>} : vector<16x144xbf16>, vector<144x256xbf16>, vector<16x256xf32> -> vector<16x256xf32>
    %c0_285 = arith.constant 0 : index
    %c0_286 = arith.constant 0 : index
    %243 = vector.load %arg10[%c0_285, %c0_286] : memref<16x1xf32, #tpu.memory_space<vmem>>, vector<16x1xf32>
    %244 = vector.broadcast %243 : vector<16x1xf32> to vector<16x256xf32>
    %245 = arith.addf %242, %244 : vector<16x256xf32>
    %cst_287 = arith.constant 2.000000e-01 : f32
    %246 = vector.broadcast %cst_287 : f32 to vector<16x256xf32>
    %247 = arith.mulf %246, %245 : vector<16x256xf32>
    %248 = arith.maximumf %245, %247 : vector<16x256xf32>
    %249 = arith.truncf %248 : vector<16x256xf32> to vector<16x256xbf16>
    %c0_288 = arith.constant 0 : index
    %c256_289 = arith.constant 256 : index
    %250 = vector.load %arg15[%c0_288, %c256_289] : memref<16x768xbf16, #tpu.memory_space<vmem>>, vector<16x256xbf16>
    tpu.vector_store %arg15[%c0_288, %c256_289], %249 {strides = array<i32>} : memref<16x768xbf16, #tpu.memory_space<vmem>>, vector<16x256xbf16>,
    %c0_290 = arith.constant 0 : index
    %c0_291 = arith.constant 0 : index
    %251 = vector.load %arg15[%c0_290, %c0_291] : memref<16x768xbf16, #tpu.memory_space<vmem>>, vector<16x256xbf16>
    %c0_292 = arith.constant 0 : index
    %c1_293 = arith.constant 1 : index
    %252 = vector.load %arg15[%c0_292, %c1_293] : memref<16x768xbf16, #tpu.memory_space<vmem>>, vector<16x256xbf16>
    %c0_294 = arith.constant 0 : index
    %c2_295 = arith.constant 2 : index
    %253 = vector.load %arg15[%c0_294, %c2_295] : memref<16x768xbf16, #tpu.memory_space<vmem>>, vector<16x256xbf16>
    %c0_296 = arith.constant 0 : index
    %c26_297 = arith.constant 26 : index
    %254 = vector.load %arg15[%c0_296, %c26_297] : memref<16x768xbf16, #tpu.memory_space<vmem>>, vector<16x256xbf16>
    %c0_298 = arith.constant 0 : index
    %c27_299 = arith.constant 27 : index
    %255 = vector.load %arg15[%c0_298, %c27_299] : memref<16x768xbf16, #tpu.memory_space<vmem>>, vector<16x256xbf16>
    %c0_300 = arith.constant 0 : index
    %c28_301 = arith.constant 28 : index
    %256 = vector.load %arg15[%c0_300, %c28_301] : memref<16x768xbf16, #tpu.memory_space<vmem>>, vector<16x256xbf16>
    %c0_302 = arith.constant 0 : index
    %c52_303 = arith.constant 52 : index
    %257 = vector.load %arg15[%c0_302, %c52_303] : memref<16x768xbf16, #tpu.memory_space<vmem>>, vector<16x256xbf16>
    %c0_304 = arith.constant 0 : index
    %c53_305 = arith.constant 53 : index
    %258 = vector.load %arg15[%c0_304, %c53_305] : memref<16x768xbf16, #tpu.memory_space<vmem>>, vector<16x256xbf16>
    %c0_306 = arith.constant 0 : index
    %c54_307 = arith.constant 54 : index
    %259 = vector.load %arg15[%c0_306, %c54_307] : memref<16x768xbf16, #tpu.memory_space<vmem>>, vector<16x256xbf16>
    %260 = tpu.concatenate %251, %252, %253, %254, %255, %256, %257, %258, %259 in 0 : vector<16x256xbf16>, vector<16x256xbf16>, vector<16x256xbf16>, vector<16x256xbf16>, vector<16x256xbf16>, vector<16x256xbf16>, vector<16x256xbf16>, vector<16x256xbf16>, vector<16x256xbf16> -> vector<144x256xbf16>
    %c0_308 = arith.constant 0 : index
    %c0_309 = arith.constant 0 : index
    %261 = vector.load %arg11[%c0_308, %c0_309] : memref<3x144xbf16, #tpu.memory_space<vmem>>, vector<3x144xbf16>
    %cst_310 = arith.constant dense<0.000000e+00> : vector<3x256xf32>
    %262 = tpu.matmul %261, %260, %cst_310 {dimension_numbers = #tpu.dot_dimension_numbers<[1], [0], [0], [1], [0, 0, 1, 1], [], []>} : vector<3x144xbf16>, vector<144x256xbf16>, vector<3x256xf32> -> vector<3x256xf32>
    %c0_311 = arith.constant 0 : index
    %c0_312 = arith.constant 0 : index
    %263 = vector.load %arg12[%c0_311, %c0_312] : memref<3x1xf32, #tpu.memory_space<vmem>>, vector<3x1xf32>
    %264 = vector.broadcast %263 : vector<3x1xf32> to vector<3x256xf32>
    %265 = arith.addf %262, %264 : vector<3x256xf32>
    %c0_313 = arith.constant 0 : index
    %c0_314 = arith.constant 0 : index
    %c135 = arith.constant 135 : index
    %266 = vector.load %arg2[%c0_313, %c0_314, %c135] : memref<1x3x676xf32, #tpu.memory_space<vmem>>, vector<1x3x256xf32>
    %267 = vector.shape_cast %266 : vector<1x3x256xf32> to vector<3x256xf32>
    %268 = math.tanh %265 : vector<3x256xf32>
    %269 = arith.addf %268, %267 : vector<3x256xf32>
    %c0_315 = arith.constant 0 : index
    %c0_316 = arith.constant 0 : index
    %c0_317 = arith.constant 0 : index
    %270 = vector.load %arg13[%c0_315, %c0_316, %c0_317] : memref<1x3x512xf32, #tpu.memory_space<vmem>>, vector<1x3x256xf32>
    %271 = vector.shape_cast %270 : vector<1x3x256xf32> to vector<3x256xf32>
    %272 = vector.shape_cast %269 : vector<3x256xf32> to vector<1x3x256xf32>
    tpu.vector_store %arg13[%c0_315, %c0_316, %c0_317], %272 {strides = array<i32>} : memref<1x3x512xf32, #tpu.memory_space<vmem>>, vector<1x3x256xf32>,
    %c0_318 = arith.constant 0 : index
    %c256_319 = arith.constant 256 : index
    %273 = vector.load %arg15[%c0_318, %c256_319] : memref<16x768xbf16, #tpu.memory_space<vmem>>, vector<16x256xbf16>
    %c0_320 = arith.constant 0 : index
    %c257_321 = arith.constant 257 : index
    %274 = vector.load %arg15[%c0_320, %c257_321] : memref<16x768xbf16, #tpu.memory_space<vmem>>, vector<16x256xbf16>
    %c0_322 = arith.constant 0 : index
    %c258_323 = arith.constant 258 : index
    %275 = vector.load %arg15[%c0_322, %c258_323] : memref<16x768xbf16, #tpu.memory_space<vmem>>, vector<16x256xbf16>
    %c0_324 = arith.constant 0 : index
    %c282_325 = arith.constant 282 : index
    %276 = vector.load %arg15[%c0_324, %c282_325] : memref<16x768xbf16, #tpu.memory_space<vmem>>, vector<16x256xbf16>
    %c0_326 = arith.constant 0 : index
    %c283_327 = arith.constant 283 : index
    %277 = vector.load %arg15[%c0_326, %c283_327] : memref<16x768xbf16, #tpu.memory_space<vmem>>, vector<16x256xbf16>
    %c0_328 = arith.constant 0 : index
    %c284_329 = arith.constant 284 : index
    %278 = vector.load %arg15[%c0_328, %c284_329] : memref<16x768xbf16, #tpu.memory_space<vmem>>, vector<16x256xbf16>
    %c0_330 = arith.constant 0 : index
    %c308_331 = arith.constant 308 : index
    %279 = vector.load %arg15[%c0_330, %c308_331] : memref<16x768xbf16, #tpu.memory_space<vmem>>, vector<16x256xbf16>
    %c0_332 = arith.constant 0 : index
    %c309_333 = arith.constant 309 : index
    %280 = vector.load %arg15[%c0_332, %c309_333] : memref<16x768xbf16, #tpu.memory_space<vmem>>, vector<16x256xbf16>
    %c0_334 = arith.constant 0 : index
    %c310_335 = arith.constant 310 : index
    %281 = vector.load %arg15[%c0_334, %c310_335] : memref<16x768xbf16, #tpu.memory_space<vmem>>, vector<16x256xbf16>
    %282 = tpu.concatenate %273, %274, %275, %276, %277, %278, %279, %280, %281 in 0 : vector<16x256xbf16>, vector<16x256xbf16>, vector<16x256xbf16>, vector<16x256xbf16>, vector<16x256xbf16>, vector<16x256xbf16>, vector<16x256xbf16>, vector<16x256xbf16>, vector<16x256xbf16> -> vector<144x256xbf16>
    %c0_336 = arith.constant 0 : index
    %c0_337 = arith.constant 0 : index
    %283 = vector.load %arg11[%c0_336, %c0_337] : memref<3x144xbf16, #tpu.memory_space<vmem>>, vector<3x144xbf16>
    %cst_338 = arith.constant dense<0.000000e+00> : vector<3x256xf32>
    %284 = tpu.matmul %283, %282, %cst_338 {dimension_numbers = #tpu.dot_dimension_numbers<[1], [0], [0], [1], [0, 0, 1, 1], [], []>} : vector<3x144xbf16>, vector<144x256xbf16>, vector<3x256xf32> -> vector<3x256xf32>
    %c0_339 = arith.constant 0 : index
    %c0_340 = arith.constant 0 : index
    %285 = vector.load %arg12[%c0_339, %c0_340] : memref<3x1xf32, #tpu.memory_space<vmem>>, vector<3x1xf32>
    %286 = vector.broadcast %285 : vector<3x1xf32> to vector<3x256xf32>
    %287 = arith.addf %284, %286 : vector<3x256xf32>
    %c0_341 = arith.constant 0 : index
    %c0_342 = arith.constant 0 : index
    %c391 = arith.constant 391 : index
    %288 = vector.load %arg2[%c0_341, %c0_342, %c391] : memref<1x3x676xf32, #tpu.memory_space<vmem>>, vector<1x3x256xf32>
    %289 = vector.shape_cast %288 : vector<1x3x256xf32> to vector<3x256xf32>
    %290 = math.tanh %287 : vector<3x256xf32>
    %291 = arith.addf %290, %289 : vector<3x256xf32>
    %c0_343 = arith.constant 0 : index
    %c0_344 = arith.constant 0 : index
    %c256_345 = arith.constant 256 : index
    %292 = vector.load %arg13[%c0_343, %c0_344, %c256_345] : memref<1x3x512xf32, #tpu.memory_space<vmem>>, vector<1x3x256xf32>
    %293 = vector.shape_cast %292 : vector<1x3x256xf32> to vector<3x256xf32>
    %294 = vector.shape_cast %291 : vector<3x256xf32> to vector<1x3x256xf32>
    tpu.vector_store %arg13[%c0_343, %c0_344, %c256_345], %294 {strides = array<i32>} : memref<1x3x512xf32, #tpu.memory_space<vmem>>, vector<1x3x256xf32>,
    return
  }
  func.func @transform_0(%arg0: i32) -> (i32, i32, i32) {
    %c0_i32 = arith.constant 0 : i32
    %c0_i32_0 = arith.constant 0 : i32
    %c0_i32_1 = arith.constant 0 : i32
    return %arg0, %c0_i32, %c0_i32_0 : i32, i32, i32
  }
  func.func @transform_1(%arg0: i32) -> (i32, i32, i32) {
    %c0_i32 = arith.constant 0 : i32
    %c0_i32_0 = arith.constant 0 : i32
    %c0_i32_1 = arith.constant 0 : i32
    return %arg0, %c0_i32, %c0_i32_0 : i32, i32, i32
  }
  func.func @transform_2(%arg0: i32) -> (i32, i32) {
    %c0_i32 = arith.constant 0 : i32
    %c0_i32_0 = arith.constant 0 : i32
    %c0_i32_1 = arith.constant 0 : i32
    return %c0_i32, %c0_i32_0 : i32, i32
  }
  func.func @transform_3(%arg0: i32) -> (i32, i32) {
    %c0_i32 = arith.constant 0 : i32
    %c0_i32_0 = arith.constant 0 : i32
    %c0_i32_1 = arith.constant 0 : i32
    return %c0_i32, %c0_i32_0 : i32, i32
  }
  func.func @transform_4(%arg0: i32) -> (i32, i32) {
    %c0_i32 = arith.constant 0 : i32
    %c0_i32_0 = arith.constant 0 : i32
    %c0_i32_1 = arith.constant 0 : i32
    return %c0_i32, %c0_i32_0 : i32, i32
  }
  func.func @transform_5(%arg0: i32) -> (i32, i32) {
    %c0_i32 = arith.constant 0 : i32
    %c0_i32_0 = arith.constant 0 : i32
    %c0_i32_1 = arith.constant 0 : i32
    return %c0_i32, %c0_i32_0 : i32, i32
  }
  func.func @transform_6(%arg0: i32) -> (i32, i32) {
    %c0_i32 = arith.constant 0 : i32
    %c0_i32_0 = arith.constant 0 : i32
    %c0_i32_1 = arith.constant 0 : i32
    return %c0_i32, %c0_i32_0 : i32, i32
  }
  func.func @transform_7(%arg0: i32) -> (i32, i32) {
    %c0_i32 = arith.constant 0 : i32
    %c0_i32_0 = arith.constant 0 : i32
    %c0_i32_1 = arith.constant 0 : i32
    return %c0_i32, %c0_i32_0 : i32, i32
  }
  func.func @transform_8(%arg0: i32) -> (i32, i32) {
    %c0_i32 = arith.constant 0 : i32
    %c0_i32_0 = arith.constant 0 : i32
    %c0_i32_1 = arith.constant 0 : i32
    return %c0_i32, %c0_i32_0 : i32, i32
  }
  func.func @transform_9(%arg0: i32) -> (i32, i32) {
    %c0_i32 = arith.constant 0 : i32
    %c0_i32_0 = arith.constant 0 : i32
    %c0_i32_1 = arith.constant 0 : i32
    return %c0_i32, %c0_i32_0 : i32, i32
  }
  func.func @transform_10(%arg0: i32) -> (i32, i32) {
    %c0_i32 = arith.constant 0 : i32
    %c0_i32_0 = arith.constant 0 : i32
    %c0_i32_1 = arith.constant 0 : i32
    return %c0_i32, %c0_i32_0 : i32, i32
  }
  func.func @transform_11(%arg0: i32) -> (i32, i32) {
    %c0_i32 = arith.constant 0 : i32
    %c0_i32_0 = arith.constant 0 : i32
    %c0_i32_1 = arith.constant 0 : i32
    return %c0_i32, %c0_i32_0 : i32, i32
  }
  func.func @transform_12(%arg0: i32) -> (i32, i32, i32) {
    %c0_i32 = arith.constant 0 : i32
    %c0_i32_0 = arith.constant 0 : i32
    %c0_i32_1 = arith.constant 0 : i32
    return %arg0, %c0_i32, %c0_i32_0 : i32, i32, i32
  }
}

</mosaic_0001>

<bundles_post_ra>
// kernel: generator_forward.1
= control target key start
LH: loop header
LB: loop body
LE: loop exit
PB: predicated region body
PF: predicated region fallthrough
CT: control target
= control target key end

     0   :  { %s2840_s21 = smov 0   ;;  %s3730_s0 = inlined_call_operand.vmem [shape: bf16[2,8,768], index: 0, kind: input, shape index: {}]   ;;  %s3731_s1 = inlined_call_operand.vmem [shape: f32[2,3,676], index: 1, kind: input, shape index: {}]   ;;  %s3732_s2 = inlined_call_operand.vmem [shape: bf16[16,72], index: 2, kind: input, shape index: {}]   ;;  %s3733_s3 = inlined_call_operand.vmem [shape: f32[16,1], index: 3, kind: input, shape index: {}]   ;;  %s3734_s4 = inlined_call_operand.vmem [shape: bf16[16,144], index: 4, kind: input, shape index: {}]   ;;  %s3735_s5 = inlined_call_operand.vmem [shape: f32[16,1], index: 5, kind: input, shape index: {}]   ;;  %s3736_s6 = inlined_call_operand.vmem [shape: bf16[16,144], index: 6, kind: input, shape index: {}]   ;;  %s3737_s7 = inlined_call_operand.vmem [shape: f32[16,1], index: 7, kind: input, shape index: {}]   ;;  %s3738_s8 = inlined_call_operand.vmem [shape: bf16[16,144], index: 8, kind: input, shape index: {}]   ;;  %s3739_s9 = inlined_call_operand.vmem [shape: f32[16,1], index: 9, kind: input, shape index: {}]   ;;  %s3740_s10 = inlined_call_operand.vmem [shape: bf16[3,144], index: 10, kind: input, shape index: {}]   ;;  %s3741_s11 = inlined_call_operand.vmem [shape: f32[3,1], index: 11, kind: input, shape index: {}]   ;;  %s3742_s12 = inlined_call_operand.vmem [shape: f32[2,3,512], index: 12, kind: output, shape index: {}]  }
   0x1 LB: > { %s2626_s22 = sadd.s32 4294967295, %s2761_s21   ;;  %p2630_p0 = scmp.ge.s32.totalorder %s2761_s21, 1  ;;  %s2761_s21 = sphi %s2840_s21, %s22_s21  }
   0x2   : > { %p372_p1 = scmp.lt.s32.totalorder %s2761_s21, 3 }
   0x4   : > { %p373_p2 = pnand %p2630_p0, %p372_p1 }
   0x5   : > { %p419_p3 = scmp.lt.s32.totalorder (!%p373_p2), %s2626_s22, 1  ;;  %s2763_s27 = smov (!%p373_p2), 127   ;;  %v2771_v8 = vmov (!%p373_p2), 0   ;;  %vm454_vm0 = vcmask (!%p373_p2), 1039360   ;;  %vm520_vm1 = vcmask (!%p373_p2), 1043456   ;;  %vm463_vm2 = vcmask (!%p373_p2), 1031168  }
   0x6   : > { %376 = sbr.rel (%p373_p2) target bundleno = 2176 (0x880), region = 68  ;;  %s2764_s28 = smov (!%p373_p2), 126   ;;  %614 = vmatprep.mubr.bf16.mxu0 (!%p373_p2), %v2771_v8  ;;  %803 = vmatprep.mubr.bf16.mxu1 (!%p373_p2), %v2771_v8  ;;  %vm472_vm3 = vcmask (!%p373_p2), 834560   ;;  %v555_v22 = vld [vmem:[%s3733_s3] sm:$0xff] (!%p373_p2)  ;;  %v556_v23 = vld [vmem:[%s3733_s3 + $0x8] sm:$0xff] (!%p373_p2)  ;;  %vm481_vm4 = vcmask (!%p373_p2), 826368  }
   0x7   : > { %s2765_s29 = smov (!%p373_p2), 102   ;;  %s2766_s30 = smov (!%p373_p2), 101   ;;  %2724 = vset.pattern.permute.xlu1 (!%p373_p2), %v2771_v8  ;;  %2723 = vset.pattern.permute.xlu0 (!%p373_p2), %v2771_v8  ;;  %vm490_vm5 = vcmask (!%p373_p2), 818176   ;;  %vm499_vm6 = vcmask (!%p373_p2), 621568   ;;  %vm508_vm7 = vcmask (!%p373_p2), 613376   ;;  %vm517_vm8 = vcmask (!%p373_p2), 605184  }
   0x8   : > { %s2767_s13 = smov (!%p373_p2), 100   ;;  %s2768_s14 = smov (!%p373_p2), 76   ;;  %v2733_v63 = vld [vmem:[%s3732_s2] sm:$0xff] (!%p373_p2)   ;;  %vm572_vm9 = vcmask (!%p373_p2), 588800   ;;  %vm2773_vm10 = vmmov (!%p373_p2), 0   ;;  %vm1070_vm11 = vcmask (!%p373_p2), 130048  }
   0x9   : > { %s2769_s15 = smov (!%p373_p2), 75   ;;  %s2770_s16 = smov (!%p373_p2), 74   ;;  %vm2376_vm12 = vcmask (!%p373_p2), 990208  }
   0xa   : > { %s2774_s18 = smov (!%p373_p2), 121  }
   0xd   : > { %s3744_s22 = smov (!%p419_p3, %s2626_s22), 1 }
   0xe   : > { %s2702_s23 = smul.u32 24, %s3744_s22 }
  0x10   : > { %s2856_s26 = scalar_lea.vmem %s3730_s0, %s2702_s23  ;;  %s428_s17 = scalar_lea.vmem %s3731_s1, %s2702_s23 }
  0x11   : > { %v438_v0 = vld [vmem:[%s2856_s26] sm:$0xff]  ;;  %v2727_v3 = vld [vmem:[%s2856_s26 + $0x8] ss:$0 sps:$4 sm:$0xff]   ;;  %v2729_v6 = vld [vmem:[%s2856_s26 + $0x10] ss:$0 sps:$4 sm:$0xff]   ;;  %s2681_s23 = sshll.u32 %s3744_s22, 4 }
  0x12   : > { %v2859_v1 = vcombine.high %v438_v0, %v438_v0  ;;  %v2861_v2 = vcombine.low %v438_v0, %v438_v0  ;;  %v637_v4 = vld [vmem:[%s2856_s26 + $0x8] sm:$0xff]  ;;  %v827_v7 = vld [vmem:[%s2856_s26 + $0x10] sm:$0xff]  ;;  %s433_s20 = scalar_lea.vmem %s3742_s12, %s2681_s23 }
  0x13   : > { %v2905_v5 = vcombine.high %v637_v4, %v637_v4  ;;  %v2916_v9 = vcombine.low %v637_v4, %v637_v4  ;;  %v2647_v10 = vcombine.low %v827_v7, %v827_v7  ;;  %v2648_v11 = vcombine.high %v827_v7, %v827_v7 }
  0x14   : > { %450 = vrot.lane.b32.xlu0 %v2859_v1, %s2763_s27  ;;  %448 = vrot.lane.b32.xlu1 %v2861_v2, %s2763_s27 }
  0x18   : > { %452 = vrot.lane.b32.xlu0 %v2727_v3, %s2763_s27  ;;  %459 = vrot.lane.b32.xlu1 %v2859_v1, %s2764_s28 }
  0x1c   : > { %461 = vrot.lane.b32.xlu0 %v2727_v3, %s2764_s28  ;;  %468 = vrot.lane.b32.xlu1 %v2859_v1, %s2765_s29 }
  0x20   : > { %470 = vrot.lane.b32.xlu0 %v2727_v3, %s2765_s29  ;;  %457 = vrot.lane.b32.xlu1 %v2861_v2, %s2764_s28 }
  0x24   : > { %466 = vrot.lane.b32.xlu0 %v2861_v2, %s2765_s29  ;;  %477 = vrot.lane.b32.xlu1 %v2859_v1, %s2766_s30 }
  0x28   : > { %479 = vrot.lane.b32.xlu0 %v2727_v3, %s2766_s30  ;;  %486 = vrot.lane.b32.xlu1 %v2859_v1, %s2767_s13 }
  0x2c   : > { %488 = vrot.lane.b32.xlu0 %v2727_v3, %s2767_s13  ;;  %475 = vrot.lane.b32.xlu1 %v2861_v2, %s2766_s30 }
  0x30   : > { %484 = vrot.lane.b32.xlu0 %v2861_v2, %s2767_s13  ;;  %495 = vrot.lane.b32.xlu1 %v2859_v1, %s2768_s14 }
  0x34   : > { %497 = vrot.lane.b32.xlu0 %v2727_v3, %s2768_s14  ;;  %504 = vrot.lane.b32.xlu1 %v2859_v1, %s2769_s15 }
  0x38   : > { %506 = vrot.lane.b32.xlu0 %v2727_v3, %s2769_s15  ;;  %493 = vrot.lane.b32.xlu1 %v2861_v2, %s2768_s14 }
  0x3c   : > { %502 = vrot.lane.b32.xlu0 %v2861_v2, %s2769_s15  ;;  %511 = vrot.lane.b32.xlu1 %v2861_v2, %s2770_s16 }
  0x40   : > { %513 = vrot.lane.b32.xlu0 %v2859_v1, %s2770_s16  ;;  %515 = vrot.lane.b32.xlu1 %v2727_v3, %s2770_s16 }
  0x44   : > { %649 = vrot.lane.b32.xlu0 %v2905_v5, %s2763_s27  ;;  %651 = vrot.lane.b32.xlu1 %v2729_v6, %s2763_s27 }
  0x48   : > { %647 = vrot.lane.b32.xlu0 %v2916_v9, %s2763_s27  ;;  %833 = vrot.lane.b32.xlu1 %v2647_v10, %s2763_s27 }
  0x4c   : > { %835 = vrot.lane.b32.xlu0 %v2648_v11, %s2763_s27  ;;  %657 = vrot.lane.b32.xlu1 %v2905_v5, %s2764_s28 }
  0x50   : > { %659 = vrot.lane.b32.xlu0 %v2729_v6, %s2764_s28  ;;  %665 = vrot.lane.b32.xlu1 %v2905_v5, %s2765_s29 }
  0x54   : > { %667 = vrot.lane.b32.xlu0 %v2729_v6, %s2765_s29  ;;  %655 = vrot.lane.b32.xlu1 %v2916_v9, %s2764_s28 }
  0x58   : > { %663 = vrot.lane.b32.xlu0 %v2916_v9, %s2765_s29  ;;  %838 = vrot.lane.b32.xlu1 %v2647_v10, %s2764_s28 }
  0x5c   : > { %840 = vrot.lane.b32.xlu0 %v2648_v11, %s2764_s28  ;;  %843 = vrot.lane.b32.xlu1 %v2647_v10, %s2765_s29 }
  0x60   : > { %845 = vrot.lane.b32.xlu0 %v2648_v11, %s2765_s29  ;;  %673 = vrot.lane.b32.xlu1 %v2905_v5, %s2766_s30 }
  0x64   : > { %675 = vrot.lane.b32.xlu0 %v2729_v6, %s2766_s30  ;;  %681 = vrot.lane.b32.xlu1 %v2905_v5, %s2767_s13 }
  0x68   : > { %683 = vrot.lane.b32.xlu0 %v2729_v6, %s2767_s13  ;;  %671 = vrot.lane.b32.xlu1 %v2916_v9, %s2766_s30 }
  0x6c   : > { %679 = vrot.lane.b32.xlu0 %v2916_v9, %s2767_s13  ;;  %848 = vrot.lane.b32.xlu1 %v2647_v10, %s2766_s30 }
  0x70   : > { %850 = vrot.lane.b32.xlu0 %v2648_v11, %s2766_s30  ;;  %853 = vrot.lane.b32.xlu1 %v2647_v10, %s2767_s13 }
  0x74   : > { %855 = vrot.lane.b32.xlu0 %v2648_v11, %s2767_s13  ;;  %689 = vrot.lane.b32.xlu1 %v2905_v5, %s2768_s14 }
  0x78   : > { %691 = vrot.lane.b32.xlu0 %v2729_v6, %s2768_s14  ;;  %697 = vrot.lane.b32.xlu1 %v2905_v5, %s2769_s15 }
  0x7c   : > { %699 = vrot.lane.b32.xlu0 %v2729_v6, %s2769_s15  ;;  %687 = vrot.lane.b32.xlu1 %v2916_v9, %s2768_s14 }
  0x80   : > { %695 = vrot.lane.b32.xlu0 %v2916_v9, %s2769_s15  ;;  %858 = vrot.lane.b32.xlu1 %v2647_v10, %s2768_s14 }
  0x84   : > { %860 = vrot.lane.b32.xlu0 %v2648_v11, %s2768_s14  ;;  %863 = vrot.lane.b32.xlu1 %v2647_v10, %s2769_s15 }
  0x86   : > { %v451_v12 = vpop.permute.xlu0 %450  ;;  %v449_v13 = vpop.permute.xlu1 %448 }
  0x87   : > { %v455_v14 = vsel %vm454_vm0, %v449_v13, %v451_v12 }
  0x88   : > { %865 = vrot.lane.b32.xlu0 %v2648_v11, %s2769_s15  ;;  %703 = vrot.lane.b32.xlu1 %v2916_v9, %s2770_s16  ;;  %v523_v19 = vsel %vm520_vm1, %v2861_v2, %v455_v14  ;;  %v2772_v2 = vmov 0.0  }
  0x8a   : > { %v453_v15 = vpop.permute.xlu0 %452  ;;  %v460_v16 = vpop.permute.xlu1 %459 }
  0x8b   : > { %v456_v17 = vsel %vm454_vm0, %v451_v12, %v453_v15  ;;  %v826_v12 = vld [vmem:[%s2856_s26 + $0x10] sm:$0xf] }
  0x8c   : > { %705 = vrot.lane.b32.xlu0 %v2905_v5, %s2770_s16  ;;  %707 = vrot.lane.b32.xlu1 %v2729_v6, %s2770_s16  ;;  %v527_v18 = vsel %vm520_vm1, %v2859_v1, %v456_v17 }
  0x8d   : > { %582 = vmatprep.subr.bf16.mxu0 %v527_v18 }
  0x8e   : > { %v462_v20 = vpop.permute.xlu0 %461  ;;  %583 = vmatpush1.bf16.msra.mxu0 %v523_v19  ;;  %v469_v21 = vpop.permute.xlu1 %468 }
  0x8f   : > { %v465_v26 = vsel %vm463_vm2, %v460_v16, %v462_v20 }
  0x90   : > { %868 = vrot.lane.b32.xlu0 %v2647_v10, %s2770_s16  ;;  %870 = vrot.lane.b32.xlu1 %v2648_v11, %s2770_s16 }
  0x92   : > { %v471_v24 = vpop.permute.xlu0 %470  ;;  %v458_v25 = vpop.permute.xlu1 %457 }
  0x93   : > { %v474_v27 = vsel %vm472_vm3, %v469_v21, %v471_v24  ;;  %v464_v31 = vsel %vm463_vm2, %v458_v25, %v460_v16 }
  0x94   : > { %v535_v28 = vsel %vm520_vm1, %v465_v26, %v474_v27  ;;  %559 = vperm.xlu0 %2723, %v555_v22   ;;  %564 = vperm.xlu1 %2724, %v556_v23  }
  0x95   : > { %584 = vmatprep.subr.bf16.mxu0 %v535_v28 }
  0x96   : > { %v467_v29 = vpop.permute.xlu0 %466  ;;  %v478_v30 = vpop.permute.xlu1 %477 }
  0x97   : > { %v473_v32 = vsel %vm472_vm3, %v467_v29, %v469_v21 }
  0x98   : > { %v531_v33 = vsel %vm520_vm1, %v464_v31, %v473_v32  ;;  %754 = vperm.xlu0 %2723, %v556_v23   ;;  %749 = vperm.xlu1 %2724, %v555_v22  }
  0x99   : > { %585 = vmatpush1.bf16.msra.mxu0 %v531_v33 }
  0x9a   : > { %v480_v34 = vpop.permute.xlu0 %479  ;;  %v487_v35 = vpop.permute.xlu1 %486 }
  0x9b   : > { %v483_v38 = vsel %vm481_vm4, %v478_v30, %v480_v34 }
  0x9c   : > { %900 = vperm.xlu0 %2723, %v556_v23   ;;  %895 = vperm.xlu1 %2724, %v555_v22  }
  0x9e   : > { %v489_v36 = vpop.permute.xlu0 %488  ;;  %v476_v37 = vpop.permute.xlu1 %475 }
  0x9f   : > { %v492_v39 = vsel %vm490_vm5, %v487_v35, %v489_v36  ;;  %v482_v43 = vsel %vm481_vm4, %v476_v37, %v478_v30 }
  0xa0   : > { %v543_v40 = vsel %vm520_vm1, %v483_v38, %v492_v39 }
  0xa1   : > { %586 = vmatprep.subr.bf16.mxu0 %v543_v40 }
  0xa2   : > { %v485_v41 = vpop.permute.xlu0 %484  ;;  %v496_v42 = vpop.permute.xlu1 %495 }
  0xa3   : > { %v491_v44 = vsel %vm490_vm5, %v485_v41, %v487_v35 }
  0xa4   : > { %v539_v45 = vsel %vm520_vm1, %v482_v43, %v491_v44 }
  0xa5   : > { %587 = vmatpush1.bf16.msra.mxu0 %v539_v45 }
  0xa6   : > { %v498_v46 = vpop.permute.xlu0 %497  ;;  %v505_v47 = vpop.permute.xlu1 %504 }
  0xa7   : > { %v501_v50 = vsel %vm499_vm6, %v496_v42, %v498_v46 }
  0xaa   : > { %v507_v48 = vpop.permute.xlu0 %506  ;;  %v494_v49 = vpop.permute.xlu1 %493 }
  0xab   : > { %v510_v51 = vsel %vm508_vm7, %v505_v47, %v507_v48  ;;  %v500_v55 = vsel %vm499_vm6, %v494_v49, %v496_v42 }
  0xac   : > { %v551_v52 = vsel %vm520_vm1, %v501_v50, %v510_v51 }
  0xad   : > { %588 = vmatprep.subr.bf16.mxu0 %v551_v52 }
  0xae   : > { %v503_v53 = vpop.permute.xlu0 %502  ;;  %v512_v54 = vpop.permute.xlu1 %511 }
  0xaf   : > { %v509_v56 = vsel %vm508_vm7, %v503_v53, %v505_v47 }
  0xb0   : > { %v547_v57 = vsel %vm520_vm1, %v500_v55, %v509_v56 }
  0xb1   : > { %589 = vmatpush1.bf16.msra.mxu0 %v547_v57 }
  0xb2   : > { %v514_v58 = vpop.permute.xlu0 %513  ;;  %v516_v59 = vpop.permute.xlu1 %515 }
  0xb3   : > { %v519_v60 = vsel %vm517_vm8, %v514_v58, %v516_v59  ;;  %v518_v61 = vsel %vm517_vm8, %v512_v54, %v514_v58 }
  0xb4   : > { %2639 = vmatprep.subr.msk.bf16.mxu0 %vm520_vm1, %v519_v60  ;;  %v577_v62 = vsel %vm520_vm1, %v518_v61, 0 }
  0xb5   : > { %591 = vmatpush1.bf16.msra.mxu0 %v577_v62 }
  0xb6   : > { %v650_v0 = vpop.permute.xlu0 %649  ;;  %v652_v1 = vpop.permute.xlu1 %651  ;;  %2688 = vmatprep.subr.bf16.mxu0 %v2772_v2 }
  0xb7   : > { %v654_v3 = vsel %vm454_vm0, %v650_v0, %v652_v1 }
  0xb8   : > { %v717_v4 = vsel %vm520_vm1, %v2905_v5, %v654_v3  ;;  %2640 = vmatmul.mubr.msk.bf16.vlgmr.msra.gmra.mrb[0].mxu0 %vm572_vm9, %v2733_v63 }
  0xb9   : > { %771 = vmatprep.subr.bf16.mxu1 %v717_v4  ;;  %2698 = vmatprep.mubr.msk.bf16.mxu0 %vm2773_vm10, %v2772_v2 }
  0xba   : > { %v648_v6 = vpop.permute.xlu0 %647  ;;  %v834_v7 = vpop.permute.xlu1 %833 }
  0xbb   : > { %v653_v10 = vsel %vm454_vm0, %v648_v6, %v650_v0 }
  0xbc   : > { %v713_v11 = vsel %vm520_vm1, %v2916_v9, %v653_v10 }
  0xbd   : > { %772 = vmatpush1.bf16.msra.mxu1 %v713_v11 }
  0xbe   : > { %v836_v13 = vpop.permute.xlu0 %835  ;;  %v658_v14 = vpop.permute.xlu1 %657 }
  0xbf   : > { %v837_v15 = vsel %vm454_vm0, %v834_v7, %v836_v13 }
  0xc0   : > { %v875_v5 = vsel %vm520_vm1, %v826_v12, %v837_v15 }
  0xc1   : > { %2689 = vmatpush3.bf16.msra.mxu0 %v875_v5 }
  0xc2   : > { %v660_v16 = vpop.permute.xlu0 %659  ;;  %v666_v17 = vpop.permute.xlu1 %665  ;;  %2690 = vmatprep.subr.bf16.mxu0 %v2772_v2 }
  0xc3   : > { %v662_v20 = vsel %vm463_vm2, %v658_v14, %v660_v16  ;;  %v2734_v16 = vld [vmem:[%s3732_s2] sm:$0xff]  }
  0xc6   : > { %v668_v18 = vpop.permute.xlu0 %667  ;;  %v656_v19 = vpop.permute.xlu1 %655 }
  0xc7   : > { %v670_v21 = vsel %vm472_vm3, %v666_v17, %v668_v18  ;;  %v661_v24 = vsel %vm463_vm2, %v656_v19, %v658_v14 }
  0xc8   : > { %v725_v9 = vsel %vm520_vm1, %v662_v20, %v670_v21 }
  0xc9   : > { %773 = vmatprep.subr.bf16.mxu1 %v725_v9 }
  0xca   : > { %v664_v22 = vpop.permute.xlu0 %663  ;;  %v839_v23 = vpop.permute.xlu1 %838 }
  0xcb   : > { %v669_v25 = vsel %vm472_vm3, %v664_v22, %v666_v17 }
  0xcc   : > { %v721_v26 = vsel %vm520_vm1, %v661_v24, %v669_v25 }
  0xcd   : > { %774 = vmatpush1.bf16.msra.mxu1 %v721_v26 }
  0xce   : > { %v841_v27 = vpop.permute.xlu0 %840  ;;  %v844_v28 = vpop.permute.xlu1 %843 }
  0xcf   : > { %v842_v31 = vsel %vm463_vm2, %v839_v23, %v841_v27 }
  0xd2   : > { %v846_v29 = vpop.permute.xlu0 %845  ;;  %v674_v30 = vpop.permute.xlu1 %673 }
  0xd3   : > { %v847_v32 = vsel %vm472_vm3, %v844_v28, %v846_v29 }
  0xd4   : > { %v879_v33 = vsel %vm520_vm1, %v842_v31, %v847_v32 }
  0xd5   : > { %2691 = vmatpush3.bf16.msra.mxu0 %v879_v33 }
  0xd6   : > { %v676_v34 = vpop.permute.xlu0 %675  ;;  %v682_v35 = vpop.permute.xlu1 %681  ;;  %2692 = vmatprep.subr.bf16.mxu0 %v2772_v2 }
  0xd7   : > { %v678_v38 = vsel %vm481_vm4, %v674_v30, %v676_v34 }
  0xda   : > { %v684_v36 = vpop.permute.xlu0 %683  ;;  %v672_v37 = vpop.permute.xlu1 %671 }
  0xdb   : > { %v686_v39 = vsel %vm490_vm5, %v682_v35, %v684_v36  ;;  %v677_v43 = vsel %vm481_vm4, %v672_v37, %v674_v30 }
  0xdc   : > { %v733_v40 = vsel %vm520_vm1, %v678_v38, %v686_v39 }
  0xdd   : > { %775 = vmatprep.subr.bf16.mxu1 %v733_v40 }
  0xde   : > { %v680_v41 = vpop.permute.xlu0 %679  ;;  %v849_v42 = vpop.permute.xlu1 %848 }
  0xdf   : > { %v685_v44 = vsel %vm490_vm5, %v680_v41, %v682_v35 }
  0xe0   : > { %v729_v45 = vsel %vm520_vm1, %v677_v43, %v685_v44 }
  0xe1   : > { %776 = vmatpush1.bf16.msra.mxu1 %v729_v45 }
  0xe2   : > { %v851_v46 = vpop.permute.xlu0 %850  ;;  %v854_v47 = vpop.permute.xlu1 %853 }
  0xe3   : > { %v852_v50 = vsel %vm481_vm4, %v849_v42, %v851_v46 }
  0xe6   : > { %v856_v48 = vpop.permute.xlu0 %855  ;;  %v690_v49 = vpop.permute.xlu1 %689 }
  0xe7   : > { %v857_v51 = vsel %vm490_vm5, %v854_v47, %v856_v48 }
  0xe8   : > { %v883_v52 = vsel %vm520_vm1, %v852_v50, %v857_v51 }
  0xe9   : > { %2693 = vmatpush3.bf16.msra.mxu0 %v883_v52 }
  0xea   : > { %v692_v53 = vpop.permute.xlu0 %691  ;;  %v698_v54 = vpop.permute.xlu1 %697  ;;  %2694 = vmatprep.subr.bf16.mxu0 %v2772_v2 }
  0xeb   : > { %v694_v57 = vsel %vm499_vm6, %v690_v49, %v692_v53 }
  0xee   : > { %v700_v55 = vpop.permute.xlu0 %699  ;;  %v688_v56 = vpop.permute.xlu1 %687 }
  0xef   : > { %v702_v58 = vsel %vm508_vm7, %v698_v54, %v700_v55  ;;  %v693_v62 = vsel %vm499_vm6, %v688_v56, %v690_v49 }
  0xf0   : > { %v741_v59 = vsel %vm520_vm1, %v694_v57, %v702_v58 }
  0xf1   : > { %777 = vmatprep.subr.bf16.mxu1 %v741_v59 }
  0xf2   : > { %v696_v60 = vpop.permute.xlu0 %695  ;;  %v859_v61 = vpop.permute.xlu1 %858 }
  0xf3   : > { %v701_v63 = vsel %vm508_vm7, %v696_v60, %v698_v54 }
  0xf4   : > { %v737_v0 = vsel %vm520_vm1, %v693_v62, %v701_v63 }
  0xf5   : > { %778 = vmatpush1.bf16.msra.mxu1 %v737_v0 }
  0xf6   : > { %v861_v1 = vpop.permute.xlu0 %860  ;;  %v864_v3 = vpop.permute.xlu1 %863 }
  0xf7   : > { %v862_v7 = vsel %vm499_vm6, %v859_v61, %v861_v1 }
  0xfa   : > { %v866_v4 = vpop.permute.xlu0 %865  ;;  %v704_v6 = vpop.permute.xlu1 %703 }
  0xfb   : > { %v867_v10 = vsel %vm508_vm7, %v864_v3, %v866_v4 }
  0xfc   : > { %v887_v11 = vsel %vm520_vm1, %v862_v7, %v867_v10 }
  0xfd   : > { %2695 = vmatpush3.bf16.msra.mxu0 %v887_v11 }
  0xfe   : > { %v706_v12 = vpop.permute.xlu0 %705  ;;  %v708_v13 = vpop.permute.xlu1 %707  ;;  %2696 = vmatprep.subr.bf16.mxu0 %v2772_v2  ;;  %v2735_v2 = vld [vmem:[%s3732_s2] sm:$0xff]  }
  0xff   : > { %v710_v14 = vsel %vm517_vm8, %v706_v12, %v708_v13  ;;  %v709_v15 = vsel %vm517_vm8, %v704_v6, %v706_v12  ;;  %v3135_v13 = vld [vmem:[%s3734_s4 + $0x4] ss:$8 sps:$4 sm:$0xff]  }
 0x100   : > { %2645 = vmatprep.subr.msk.bf16.mxu1 %vm520_vm1, %v710_v14  ;;  %v766_v5 = vsel %vm520_vm1, %v709_v15, 0 }
 0x101   : > { %780 = vmatpush1.bf16.msra.mxu1 %v766_v5  ;;  %v1049_v5 = vld [vmem:[%s3735_s5] sm:$0xff] }
 0x102   : > { %v869_v17 = vpop.permute.xlu0 %868  ;;  %v871_v18 = vpop.permute.xlu1 %870 }
 0x103   : > { %v872_v19 = vsel %vm517_vm8, %v869_v17, %v871_v18 }
 0x104   : > { %v912_v20 = vsel %vm520_vm1, %v872_v19, 0  ;;  %2646 = vmatmul.mubr.msk.bf16.vlgmr.msra.gmra.mrb[0].mxu1 %vm572_vm9, %v2734_v16 }
 0x105   : > { %2697 = vmatpush3.bf16.msra.mxu0 %v912_v20  ;;  %2653 = vmatprep.mubr.msk.bf16.mxu1 %vm1070_vm11, %v3135_v13 }
 0x108   : > { %2699 = vmatmul.mubr.msk.bf16.vlgmr.msra.gmra.mrb[4].mxu0 %vm572_vm9, %v2735_v2 }
 0x109   : > { %2656 = vmatprep.mubr.msk.bf16.mxu0 %vm1070_vm11, %v3135_v13 }
 0x113   : > { %v560_v21 = vpop.permute.xlu0 %559  ;;  %v565_v22 = vpop.permute.xlu1 %564 }
 0x117   : > { %v750_v40 = vpop.permute.xlu1 %749  ;;  %v755_v41 = vpop.permute.xlu0 %754 }
 0x11b   : > { %v896_v50 = vpop.permute.xlu1 %895  ;;  %v901_v57 = vpop.permute.xlu0 %900 }
 0x18b   : > { %v616_v9 = vpop.f32.mrb[0].mxu0 }
 0x18c   : > { %v618_v23 = vpop.f32.mrb[1].mxu0  ;;  %v617_v24 = vadd.f32 %v616_v9, %v560_v21 }
 0x18d   : > { %v619_v25 = vadd.f32 %v618_v23, %v560_v21  ;;  %v620_v26 = vpop.f32.mrb[2].mxu0 }
 0x18e   : > { %v625_v27 = vmul.f32 0.2, %v617_v24  ;;  %v621_v28 = vadd.f32 %v620_v26, %v565_v22  ;;  %v622_v29 = vpop.f32.mrb[3].mxu0 }
 0x18f   : > { %v626_v30 = vmul.f32 0.2, %v619_v25  ;;  %v623_v31 = vadd.f32 %v622_v29, %v565_v22 }
 0x190   : > { %v629_v32 = vmax.f32 %v617_v24, %v625_v27  ;;  %v627_v33 = vmul.f32 0.2, %v621_v28 }
 0x191   : > { %v630_v34 = vmax.f32 %v619_v25, %v626_v30  ;;  %v628_v35 = vmul.f32 0.2, %v623_v31 }
 0x192   : > { %v631_v36 = vmax.f32 %v621_v28, %v627_v33 }
 0x193   : > { %v632_v37 = vmax.f32 %v623_v31, %v628_v35  ;;  %v1050_v31 = vld [vmem:[%s3735_s5 + $0x8] sm:$0xff] }
 0x194   : > { %v633_v38 = vpack.c.bf16 %v631_v36, %v629_v32 }
 0x195   : > { %v634_v39 = vpack.c.bf16 %v632_v37, %v630_v34 }
 0x196   : > { %967 = vrot.lane.b32.xlu1 %v633_v38, %s2763_s27 }
 0x197   : > { %1074 = vmatprep.subr.bf16.mxu1 %v634_v39 }
 0x198   : > { %1075 = vmatpush1.bf16.msra.mxu1 %v633_v38 }
 0x19a   : > { %977 = vrot.lane.b32.xlu1 %v633_v38, %s2764_s28 }
 0x19e   : > { %987 = vrot.lane.b32.xlu1 %v633_v38, %s2765_s29 }
 0x1a2   : > { %997 = vrot.lane.b32.xlu1 %v633_v38, %s2766_s30 }
 0x1a6   : > { %1007 = vrot.lane.b32.xlu1 %v633_v38, %s2767_s13 }
 0x1aa   : > { %1017 = vrot.lane.b32.xlu1 %v633_v38, %s2768_s14 }
 0x1ae   : > { %1027 = vrot.lane.b32.xlu1 %v633_v38, %s2769_s15 }
 0x1b2   : > { %1037 = vrot.lane.b32.xlu1 %v633_v38, %s2770_s16 }
 0x1b6   : > { %969 = vrot.lane.b32.xlu1 %v634_v39, %s2763_s27 }
 0x1ba   : > { %979 = vrot.lane.b32.xlu1 %v634_v39, %s2764_s28 }
 0x1be   : > { %989 = vrot.lane.b32.xlu1 %v634_v39, %s2765_s29 }
 0x1c2   : > { %999 = vrot.lane.b32.xlu1 %v634_v39, %s2766_s30 }
 0x1c6   : > { %1009 = vrot.lane.b32.xlu1 %v634_v39, %s2767_s13 }
 0x1ca   : > { %1019 = vrot.lane.b32.xlu1 %v634_v39, %s2768_s14 }
 0x1ce   : > { %1029 = vrot.lane.b32.xlu1 %v634_v39, %s2769_s15 }
 0x1d2   : > { %1039 = vrot.lane.b32.xlu1 %v634_v39, %s2770_s16 }
 0x1d7   : > { %v805_v42 = vpop.f32.mrb[0].mxu1 }
 0x1d8   : > { %v806_v43 = vadd.f32 %v805_v42, %v750_v40  ;;  %v807_v44 = vpop.f32.mrb[1].mxu1 }
 0x1d9   : > { %v808_v45 = vadd.f32 %v807_v44, %v750_v40  ;;  %v809_v46 = vpop.f32.mrb[2].mxu1 }
 0x1da   : > { %v814_v47 = vmul.f32 0.2, %v806_v43  ;;  %v810_v48 = vadd.f32 %v809_v46, %v755_v41  ;;  %v811_v49 = vpop.f32.mrb[3].mxu1 }
 0x1db   : > { %v815_v51 = vmul.f32 0.2, %v808_v45  ;;  %v812_v52 = vadd.f32 %v811_v49, %v755_v41  ;;  %v948_v53 = vpop.f32.mrb[4].mxu0 }
 0x1dc   : > { %v816_v54 = vmul.f32 0.2, %v810_v48  ;;  %v949_v55 = vadd.f32 %v948_v53, %v896_v50  ;;  %v2700_v56 = vpop.f32.mrb[5].mxu0  ;;  %v818_v60 = vmax.f32 %v806_v43, %v814_v47 }
 0x1dd   : > { %v817_v58 = vmul.f32 0.2, %v812_v52  ;;  %v951_v59 = vpop.f32.mrb[6].mxu0  ;;  %v819_v1 = vmax.f32 %v808_v45, %v815_v51 }
 0x1de   : > { %v820_v61 = vmax.f32 %v810_v48, %v816_v54  ;;  %v955_v62 = vmul.f32 0.2, %v949_v55  ;;  %v952_v63 = vadd.f32 %v951_v59, %v901_v57  ;;  %v2701_v0 = vpop.f32.mrb[7].mxu0 }
 0x1df   : > { %v821_v3 = vmax.f32 %v812_v52, %v817_v58 }
 0x1e0   : > { %v3081_v4 = vpack.c.bf16 %v820_v61, %v818_v60  ;;  %v956_v6 = vmul.f32 0.2, %v952_v63  ;;  %v957_v10 = vmax.f32 %v949_v55, %v955_v62 }
 0x1e1   : > { %v823_v7 = vpack.c.bf16 %v821_v3, %v819_v1  ;;  %v3238_v1 = vld [vmem:[%s3734_s4] ss:$8 sps:$4 sm:$0xff]  }
 0x1e2   : > { %v958_v11 = vmax.f32 %v952_v63, %v956_v6  ;;  %971 = vrot.lane.b32.xlu0 %v3081_v4, %s2763_s27 }
 0x1e3   : > { %1241 = vmatprep.subr.bf16.mxu0 %v823_v7 }
 0x1e4   : > { %v3085_v12 = vpack.c.bf16 %v958_v11, %v957_v10  ;;  %1242 = vmatpush1.bf16.msra.mxu0 %v3081_v4 }
 0x1e6   : > { %1135 = vrot.lane.b32.xlu0 %v3081_v4, %s2763_s27  ;;  %1139 = vrot.lane.b32.xlu1 %v3085_v12, %s2763_s27 }
 0x1ea   : > { %981 = vrot.lane.b32.xlu0 %v3081_v4, %s2764_s28  ;;  %1149 = vrot.lane.b32.xlu1 %v3085_v12, %s2764_s28 }
 0x1ee   : > { %1145 = vrot.lane.b32.xlu0 %v3081_v4, %s2764_s28  ;;  %1159 = vrot.lane.b32.xlu1 %v3085_v12, %s2765_s29 }
 0x1f2   : > { %991 = vrot.lane.b32.xlu0 %v3081_v4, %s2765_s29  ;;  %1169 = vrot.lane.b32.xlu1 %v3085_v12, %s2766_s30 }
 0x1f6   : > { %1155 = vrot.lane.b32.xlu0 %v3081_v4, %s2765_s29  ;;  %1179 = vrot.lane.b32.xlu1 %v3085_v12, %s2767_s13 }
 0x1fa   : > { %1001 = vrot.lane.b32.xlu0 %v3081_v4, %s2766_s30  ;;  %1189 = vrot.lane.b32.xlu1 %v3085_v12, %s2768_s14 }
 0x1fe   : > { %1165 = vrot.lane.b32.xlu0 %v3081_v4, %s2766_s30  ;;  %1199 = vrot.lane.b32.xlu1 %v3085_v12, %s2769_s15 }
 0x202   : > { %1011 = vrot.lane.b32.xlu0 %v3081_v4, %s2767_s13  ;;  %1209 = vrot.lane.b32.xlu1 %v3085_v12, %s2770_s16 }
 0x206   : > { %1175 = vrot.lane.b32.xlu0 %v3081_v4, %s2767_s13  ;;  %1301 = vrot.lane.b32.xlu1 %v3085_v12, %s2763_s27 }
 0x208   : > { %v968_v14 = vpop.permute.xlu1 %967 }
 0x20a   : > { %1021 = vrot.lane.b32.xlu0 %v3081_v4, %s2768_s14  ;;  %1307 = vrot.lane.b32.xlu1 %v3085_v12, %s2764_s28 }
 0x20c   : > { %v978_v15 = vpop.permute.xlu1 %977 }
 0x20e   : > { %1185 = vrot.lane.b32.xlu0 %v3081_v4, %s2768_s14  ;;  %1313 = vrot.lane.b32.xlu1 %v3085_v12, %s2765_s29 }
 0x210   : > { %v988_v16 = vpop.permute.xlu1 %987 }
 0x212   : > { %1031 = vrot.lane.b32.xlu0 %v3081_v4, %s2769_s15  ;;  %1319 = vrot.lane.b32.xlu1 %v3085_v12, %s2766_s30 }
 0x214   : > { %v998_v17 = vpop.permute.xlu1 %997 }
 0x216   : > { %1195 = vrot.lane.b32.xlu0 %v3081_v4, %s2769_s15  ;;  %1325 = vrot.lane.b32.xlu1 %v3085_v12, %s2767_s13 }
 0x218   : > { %v3165_v18 = vpop.permute.xlu1 %1007 }
 0x21a   : > { %1041 = vrot.lane.b32.xlu0 %v3081_v4, %s2770_s16  ;;  %1331 = vrot.lane.b32.xlu1 %v3085_v12, %s2768_s14 }
 0x21c   : > { %v3170_v19 = vpop.permute.xlu1 %1017 }
 0x21e   : > { %1137 = vrot.lane.b32.xlu0 %v823_v7, %s2763_s27  ;;  %1337 = vrot.lane.b32.xlu1 %v3085_v12, %s2769_s15 }
 0x220   : > { %v3178_v20 = vpop.permute.xlu1 %1027 }
 0x222   : > { %1147 = vrot.lane.b32.xlu0 %v823_v7, %s2764_s28  ;;  %1343 = vrot.lane.b32.xlu1 %v3085_v12, %s2770_s16 }
 0x224   : > { %v3184_v2 = vpop.permute.xlu1 %1037 }
 0x226   : > { %1157 = vrot.lane.b32.xlu0 %v823_v7, %s2765_s29  ;;  %1053 = vperm.xlu1 %2724, %v1049_v5  }
 0x228   : > { %v970_v21 = vpop.permute.xlu1 %969 }
 0x229   : > { %v973_v25 = vsel %vm454_vm0, %v968_v14, %v970_v21 }
 0x22a   : > { %1167 = vrot.lane.b32.xlu0 %v823_v7, %s2766_s30  ;;  %1221 = vperm.xlu1 %2724, %v1049_v5  }
 0x22c   : > { %v980_v9 = vpop.permute.xlu1 %979 }
 0x22d   : > { %v983_v30 = vsel %vm463_vm2, %v978_v15, %v980_v9 }
 0x22e   : > { %1177 = vrot.lane.b32.xlu0 %v823_v7, %s2767_s13  ;;  %1355 = vperm.xlu1 %2724, %v1049_v5  }
 0x230   : > { %v990_v22 = vpop.permute.xlu1 %989 }
 0x231   : > { %v993_v37 = vsel %vm472_vm3, %v988_v16, %v990_v22 }
 0x232   : > { %1187 = vrot.lane.b32.xlu0 %v823_v7, %s2768_s14  ;;  %1763 = vrot.lane.b32.xlu1 %v2771_v8, %s2763_s27 }
 0x234   : > { %v1000_v27 = vpop.permute.xlu1 %999 }
 0x235   : > { %v1003_v42 = vsel %vm481_vm4, %v998_v17, %v1000_v27 }
 0x236   : > { %1197 = vrot.lane.b32.xlu0 %v823_v7, %s2769_s15  ;;  %1775 = vrot.lane.b32.xlu1 %v2771_v8, %s2765_s29 }
 0x238   : > { %v1010_v32 = vpop.permute.xlu1 %1009 }
 0x239   : > { %v1013_v48 = vsel %vm490_vm5, %v3165_v18, %v1010_v32 }
 0x23a   : > { %1207 = vrot.lane.b32.xlu0 %v823_v7, %s2770_s16  ;;  %1787 = vrot.lane.b32.xlu1 %v2771_v8, %s2767_s13 }
 0x23c   : > { %v1020_v36 = vpop.permute.xlu1 %1019 }
 0x23d   : > { %v1023_v53 = vsel %vm499_vm6, %v3170_v19, %v1020_v36 }
 0x23e   : > { %1205 = vrot.lane.b32.xlu0 %v3081_v4, %s2770_s16  ;;  %1799 = vrot.lane.b32.xlu1 %v2771_v8, %s2769_s15 }
 0x240   : > { %v1030_v39 = vpop.permute.xlu1 %1029 }
 0x241   : > { %v1033_v58 = vsel %vm508_vm7, %v3178_v20, %v1030_v39 }
 0x242   : > { %1303 = vrot.lane.b32.xlu0 %v2771_v8, %s2763_s27 }
 0x244   : > { %v1040_v44 = vpop.permute.xlu1 %1039 }
 0x245   : > { %v1043_v0 = vsel %vm517_vm8, %v3184_v2, %v1040_v44 }
 0x246   : > { %1309 = vrot.lane.b32.xlu0 %v2771_v8, %s2764_s28 }
 0x24a   : > { %1315 = vrot.lane.b32.xlu0 %v2771_v8, %s2765_s29 }
 0x24e   : > { %1321 = vrot.lane.b32.xlu0 %v2771_v8, %s2766_s30 }
 0x252   : > { %1327 = vrot.lane.b32.xlu0 %v2771_v8, %s2767_s13 }
 0x254   : > { %v972_v23 = vpop.permute.xlu0 %971 }
 0x255   : > { %v974_v24 = vsel %vm454_vm0, %v970_v21, %v972_v23 }
 0x256   : > { %1333 = vrot.lane.b32.xlu0 %v2771_v8, %s2768_s14  ;;  %1076 = vmatprep.subr.bf16.mxu1 %v974_v24 }
 0x257   : > { %1077 = vmatpush1.bf16.msra.mxu1 %v973_v25 }
 0x258   : > { %v3200_v26 = vpop.permute.xlu0 %1135  ;;  %v1140_v47 = vpop.permute.xlu1 %1139 }
 0x25a   : > { %1339 = vrot.lane.b32.xlu0 %v2771_v8, %s2769_s15 }
 0x25c   : > { %v982_v28 = vpop.permute.xlu0 %981  ;;  %v1150_v50 = vpop.permute.xlu1 %1149 }
 0x25d   : > { %v984_v29 = vsel %vm463_vm2, %v980_v9, %v982_v28 }
 0x25e   : > { %1345 = vrot.lane.b32.xlu0 %v2771_v8, %s2770_s16  ;;  %1078 = vmatprep.subr.bf16.mxu1 %v984_v29 }
 0x25f   : > { %1079 = vmatpush1.bf16.msra.mxu1 %v983_v30 }
 0x260   : > { %v3211_v33 = vpop.permute.xlu0 %1145  ;;  %v1160_v55 = vpop.permute.xlu1 %1159 }
 0x262   : > { %1058 = vperm.xlu0 %2723, %v1050_v31  }
 0x264   : > { %v992_v34 = vpop.permute.xlu0 %991  ;;  %v1170_v59 = vpop.permute.xlu1 %1169 }
 0x265   : > { %v994_v35 = vsel %vm472_vm3, %v990_v22, %v992_v34 }
 0x266   : > { %1226 = vperm.xlu0 %2723, %v1050_v31   ;;  %1080 = vmatprep.subr.bf16.mxu1 %v994_v35 }
 0x267   : > { %1081 = vmatpush1.bf16.msra.mxu1 %v993_v37 }
 0x268   : > { %v1156_v38 = vpop.permute.xlu0 %1155  ;;  %v1180_v63 = vpop.permute.xlu1 %1179 }
 0x26a   : > { %1360 = vperm.xlu0 %2723, %v1050_v31  }
 0x26c   : > { %v1002_v40 = vpop.permute.xlu0 %1001  ;;  %v1190_v7 = vpop.permute.xlu1 %1189 }
 0x26d   : > { %v1004_v41 = vsel %vm481_vm4, %v1000_v27, %v1002_v40 }
 0x26e   : > { %1082 = vmatprep.subr.bf16.mxu1 %v1004_v41  ;;  %1769 = vrot.lane.b32.xlu0 %v2771_v8, %s2764_s28 }
 0x26f   : > { %1083 = vmatpush1.bf16.msra.mxu1 %v1003_v42 }
 0x270   : > { %v1166_v43 = vpop.permute.xlu0 %1165 }
 0x272   : > { %1781 = vrot.lane.b32.xlu0 %v2771_v8, %s2766_s30 }
 0x274   : > { %v1012_v45 = vpop.permute.xlu0 %1011 }
 0x275   : > { %v1014_v46 = vsel %vm490_vm5, %v1010_v32, %v1012_v45 }
 0x276   : > { %1084 = vmatprep.subr.bf16.mxu1 %v1014_v46  ;;  %1793 = vrot.lane.b32.xlu0 %v2771_v8, %s2768_s14 }
 0x277   : > { %1085 = vmatpush1.bf16.msra.mxu1 %v1013_v48 }
 0x278   : > { %v1176_v49 = vpop.permute.xlu0 %1175 }
 0x27c   : > { %v1022_v51 = vpop.permute.xlu0 %1021 }
 0x27d   : > { %v1024_v52 = vsel %vm499_vm6, %v1020_v36, %v1022_v51 }
 0x27e   : > { %1086 = vmatprep.subr.bf16.mxu1 %v1024_v52 }
 0x27f   : > { %1087 = vmatpush1.bf16.msra.mxu1 %v1023_v53 }
 0x280   : > { %v1186_v54 = vpop.permute.xlu0 %1185 }
 0x284   : > { %v1032_v56 = vpop.permute.xlu0 %1031 }
 0x285   : > { %v1034_v57 = vsel %vm508_vm7, %v1030_v39, %v1032_v56 }
 0x286   : > { %1088 = vmatprep.subr.bf16.mxu1 %v1034_v57 }
 0x287   : > { %1089 = vmatpush1.bf16.msra.mxu1 %v1033_v58 }
 0x288   : > { %v1196_v60 = vpop.permute.xlu0 %1195 }
 0x28c   : > { %v1042_v61 = vpop.permute.xlu0 %1041 }
 0x28d   : > { %v1044_v62 = vsel %vm517_vm8, %v1040_v44, %v1042_v61 }
 0x28e   : > { %1090 = vmatprep.subr.bf16.mxu1 %v1044_v62 }
 0x28f   : > { %1091 = vmatpush1.bf16.msra.mxu1 %v1043_v0 }
 0x290   : > { %v1138_v3 = vpop.permute.xlu0 %1137  ;;  %1375 = vmatprep.subr.bf16.mxu1 %v2771_v8 }
 0x291   : > { %v1142_v4 = vsel %vm454_vm0, %v1138_v3, %v1140_v47  ;;  %v1141_v6 = vsel %vm454_vm0, %v3200_v26, %v1138_v3 }
 0x292   : > { %1107 = vmatmul.mubr.bf16.vlgmr.msra.gmra.mrb[4].mxu1 %v3238_v1  ;;  %1243 = vmatprep.subr.bf16.mxu0 %v1142_v4 }
 0x293   : > { %1244 = vmatpush1.bf16.msra.mxu0 %v1141_v6  ;;  %1376 = vmatpush1.bf16.msra.mxu1 %v3085_v12  ;;  %v1200_v12 = vpop.permute.xlu1 %1199 }
 0x294   : > { %v1148_v10 = vpop.permute.xlu0 %1147  ;;  %1377 = vmatprep.subr.bf16.mxu1 %v2771_v8  ;;  %2659 = vmatprep.mubr.msk.bf16.mxu1 %vm1070_vm11, %v3135_v13 }
 0x295   : > { %v1152_v11 = vsel %vm463_vm2, %v1148_v10, %v1150_v50  ;;  %v1151_v14 = vsel %vm463_vm2, %v3211_v33, %v1148_v10 }
 0x296   : > { %1245 = vmatprep.subr.bf16.mxu0 %v1152_v11 }
 0x297   : > { %1246 = vmatpush1.bf16.msra.mxu0 %v1151_v14  ;;  %v1210_v19 = vpop.permute.xlu1 %1209 }
 0x298   : > { %v1158_v15 = vpop.permute.xlu0 %1157 }
 0x299   : > { %v1162_v5 = vsel %vm472_vm3, %v1158_v15, %v1160_v55  ;;  %v1161_v16 = vsel %vm472_vm3, %v1156_v38, %v1158_v15 }
 0x29a   : > { %1247 = vmatprep.subr.bf16.mxu0 %v1162_v5 }
 0x29b   : > { %1248 = vmatpush1.bf16.msra.mxu0 %v1161_v16  ;;  %v1302_v24 = vpop.permute.xlu1 %1301 }
 0x29c   : > { %v1168_v17 = vpop.permute.xlu0 %1167 }
 0x29d   : > { %v1172_v18 = vsel %vm481_vm4, %v1168_v17, %v1170_v59  ;;  %v1171_v13 = vsel %vm481_vm4, %v1166_v43, %v1168_v17 }
 0x29e   : > { %1249 = vmatprep.subr.bf16.mxu0 %v1172_v18 }
 0x29f   : > { %1250 = vmatpush1.bf16.msra.mxu0 %v1171_v13  ;;  %v1308_v28 = vpop.permute.xlu1 %1307 }
 0x2a0   : > { %v1178_v20 = vpop.permute.xlu0 %1177 }
 0x2a1   : > { %v1182_v2 = vsel %vm490_vm5, %v1178_v20, %v1180_v63  ;;  %v1181_v21 = vsel %vm490_vm5, %v1176_v49, %v1178_v20 }
 0x2a2   : > { %1251 = vmatprep.subr.bf16.mxu0 %v1182_v2 }
 0x2a3   : > { %1252 = vmatpush1.bf16.msra.mxu0 %v1181_v21  ;;  %v1314_v33 = vpop.permute.xlu1 %1313 }
 0x2a4   : > { %v1188_v9 = vpop.permute.xlu0 %1187 }
 0x2a5   : > { %v1192_v22 = vsel %vm499_vm6, %v1188_v9, %v1190_v7  ;;  %v1191_v23 = vsel %vm499_vm6, %v1186_v54, %v1188_v9 }
 0x2a6   : > { %1253 = vmatprep.subr.bf16.mxu0 %v1192_v22 }
 0x2a7   : > { %1254 = vmatpush1.bf16.msra.mxu0 %v1191_v23  ;;  %v1320_v36 = vpop.permute.xlu1 %1319 }
 0x2a8   : > { %v1198_v25 = vpop.permute.xlu0 %1197 }
 0x2a9   : > { %v1202_v26 = vsel %vm508_vm7, %v1198_v25, %v1200_v12  ;;  %v1201_v27 = vsel %vm508_vm7, %v1196_v60, %v1198_v25 }
 0x2aa   : > { %1255 = vmatprep.subr.bf16.mxu0 %v1202_v26 }
 0x2ab   : > { %1256 = vmatpush1.bf16.msra.mxu0 %v1201_v27  ;;  %v1326_v41 = vpop.permute.xlu1 %1325 }
 0x2ac   : > { %v1208_v29 = vpop.permute.xlu0 %1207 }
 0x2ad   : > { %v1212_v30 = vsel %vm517_vm8, %v1208_v29, %v1210_v19 }
 0x2ae   : > { %1257 = vmatprep.subr.bf16.mxu0 %v1212_v30 }
 0x2af   : > { %v1332_v44 = vpop.permute.xlu1 %1331 }
 0x2b0   : > { %v1206_v31 = vpop.permute.xlu0 %1205 }
 0x2b1   : > { %v1211_v32 = vsel %vm517_vm8, %v1206_v31, %v1208_v29 }
 0x2b2   : > { %1258 = vmatpush1.bf16.msra.mxu0 %v1211_v32  ;;  %v3310_v32 = vld [vmem:[%s3736_s6 + $0x4] ss:$8 sps:$4 sm:$0xff]  }
 0x2b3   : > { %v1338_v49 = vpop.permute.xlu1 %1337 }
 0x2b4   : > { %v1304_v34 = vpop.permute.xlu0 %1303 }
 0x2b5   : > { %v1305_v35 = vsel %vm454_vm0, %v1302_v24, %v1304_v34  ;;  %1274 = vmatmul.mubr.bf16.vlgmr.msra.gmra.mrb[8].mxu0 %v3238_v1 }
 0x2b6   : > { %1378 = vmatpush1.bf16.msra.mxu1 %v1305_v35  ;;  %2662 = vmatprep.mubr.msk.bf16.mxu0 %vm1070_vm11, %v3310_v32 }
 0x2b7   : > { %1379 = vmatprep.subr.bf16.mxu1 %v2771_v8  ;;  %v1344_v52 = vpop.permute.xlu1 %1343 }
 0x2b8   : > { %v1310_v37 = vpop.permute.xlu0 %1309 }
 0x2b9   : > { %v1311_v38 = vsel %vm463_vm2, %v1308_v28, %v1310_v37 }
 0x2ba   : > { %1380 = vmatpush1.bf16.msra.mxu1 %v1311_v38 }
 0x2bb   : > { %1381 = vmatprep.subr.bf16.mxu1 %v2771_v8  ;;  %v1054_v55 = vpop.permute.xlu1 %1053 }
 0x2bc   : > { %v1316_v39 = vpop.permute.xlu0 %1315 }
 0x2bd   : > { %v1317_v40 = vsel %vm472_vm3, %v1314_v33, %v1316_v39 }
 0x2be   : > { %1382 = vmatpush1.bf16.msra.mxu1 %v1317_v40 }
 0x2bf   : > { %1383 = vmatprep.subr.bf16.mxu1 %v2771_v8  ;;  %v1222_v16 = vpop.permute.xlu1 %1221 }
 0x2c0   : > { %v1322_v42 = vpop.permute.xlu0 %1321 }
 0x2c1   : > { %v1323_v43 = vsel %vm481_vm4, %v1320_v36, %v1322_v42 }
 0x2c2   : > { %1384 = vmatpush1.bf16.msra.mxu1 %v1323_v43 }
 0x2c3   : > { %1385 = vmatprep.subr.bf16.mxu1 %v2771_v8  ;;  %v1356_v33 = vpop.permute.xlu1 %1355 }
 0x2c4   : > { %v1328_v45 = vpop.permute.xlu0 %1327 }
 0x2c5   : > { %v1329_v46 = vsel %vm490_vm5, %v1326_v41, %v1328_v45 }
 0x2c6   : > { %1386 = vmatpush1.bf16.msra.mxu1 %v1329_v46 }
 0x2c7   : > { %1387 = vmatprep.subr.bf16.mxu1 %v2771_v8  ;;  %v3340_v46 = vpop.permute.xlu1 %1763 }
 0x2c8   : > { %v1334_v47 = vpop.permute.xlu0 %1333 }
 0x2c9   : > { %v1335_v48 = vsel %vm499_vm6, %v1332_v44, %v1334_v47 }
 0x2ca   : > { %1388 = vmatpush1.bf16.msra.mxu1 %v1335_v48 }
 0x2cb   : > { %1389 = vmatprep.subr.bf16.mxu1 %v2771_v8  ;;  %v3352_v48 = vpop.permute.xlu1 %1775 }
 0x2cc   : > { %v1340_v50 = vpop.permute.xlu0 %1339 }
 0x2cd   : > { %v1341_v51 = vsel %vm508_vm7, %v1338_v49, %v1340_v50 }
 0x2ce   : > { %1390 = vmatpush1.bf16.msra.mxu1 %v1341_v51 }
 0x2cf   : > { %1391 = vmatprep.subr.bf16.mxu1 %v2771_v8  ;;  %v3360_v50 = vpop.permute.xlu1 %1787 }
 0x2d0   : > { %v1346_v53 = vpop.permute.xlu0 %1345 }
 0x2d1   : > { %v1347_v54 = vsel %vm517_vm8, %v1344_v52, %v1346_v53  ;;  %v1510_v53 = vld [vmem:[%s3737_s7] sm:$0xff] }
 0x2d2   : > { %1392 = vmatpush1.bf16.msra.mxu1 %v1347_v54 }
 0x2d3   : > { %v3372_v52 = vpop.permute.xlu1 %1799 }
 0x2d5   : > { %1408 = vmatmul.mubr.bf16.vlgmr.msra.gmra.mrb[8].mxu1 %v3238_v1 }
 0x2d6   : > { %2665 = vmatprep.mubr.msk.bf16.mxu1 %vm1070_vm11, %v3310_v32 }
 0x2e1   : > { %v1059_v59 = vpop.permute.xlu0 %1058 }
 0x2e5   : > { %v1227_v13 = vpop.permute.xlu0 %1226 }
 0x2e9   : > { %v1361_v37 = vpop.permute.xlu0 %1360 }
 0x2ed   : > { %v3350_v47 = vpop.permute.xlu0 %1769 }
 0x2f1   : > { %v3358_v49 = vpop.permute.xlu0 %1781 }
 0x2f5   : > { %v3370_v51 = vpop.permute.xlu0 %1793 }
 0x365   : > { %v1108_v56 = vpop.f32.mrb[4].mxu1 }
 0x366   : > { %v1109_v57 = vadd.f32 %v1108_v56, %v1054_v55  ;;  %v1110_v58 = vpop.f32.mrb[5].mxu1  ;;  %v1511_v56 = vld [vmem:[%s3737_s7 + $0x8] sm:$0xff] }
 0x367   : > { %v1111_v60 = vadd.f32 %v1110_v58, %v1054_v55  ;;  %v1112_v61 = vpop.f32.mrb[6].mxu1 }
 0x368   : > { %v1117_v62 = vmul.f32 0.2, %v1109_v57  ;;  %v1113_v63 = vadd.f32 %v1112_v61, %v1059_v59  ;;  %v1114_v0 = vpop.f32.mrb[7].mxu1 }
 0x369   : > { %v1118_v3 = vmul.f32 0.2, %v1111_v60  ;;  %v1115_v4 = vadd.f32 %v1114_v0, %v1059_v59 }
 0x36a   : > { %v1119_v6 = vmul.f32 0.2, %v1113_v63  ;;  %v1121_v10 = vmax.f32 %v1109_v57, %v1117_v62 }
 0x36b   : > { %v1120_v7 = vmul.f32 0.2, %v1115_v4  ;;  %v1122_v14 = vmax.f32 %v1111_v60, %v1118_v3 }
 0x36c   : > { %v1123_v11 = vmax.f32 %v1113_v63, %v1119_v6 }
 0x36d   : > { %v1124_v15 = vmax.f32 %v1115_v4, %v1120_v7 }
 0x36e   : > { %v1125_v5 = vpack.c.bf16 %v1123_v11, %v1121_v10 }
 0x36f   : > { %v1126_v1 = vpack.c.bf16 %v1124_v15, %v1122_v14 }
 0x370   : > { %1438 = vrot.lane.b32.xlu0 %v1125_v5, %s2764_s28  ;;  %1428 = vrot.lane.b32.xlu1 %v1125_v5, %s2763_s27 }
 0x371   : > { %1534 = vmatprep.subr.bf16.mxu0 %v1126_v1 }
 0x372   : > { %1535 = vmatpush1.bf16.msra.mxu0 %v1125_v5 }
 0x374   : > { %1458 = vrot.lane.b32.xlu0 %v1125_v5, %s2766_s30  ;;  %1448 = vrot.lane.b32.xlu1 %v1125_v5, %s2765_s29 }
 0x378   : > { %1478 = vrot.lane.b32.xlu0 %v1125_v5, %s2768_s14  ;;  %1468 = vrot.lane.b32.xlu1 %v1125_v5, %s2767_s13 }
 0x37c   : > { %1498 = vrot.lane.b32.xlu0 %v1125_v5, %s2770_s16  ;;  %1488 = vrot.lane.b32.xlu1 %v1125_v5, %s2769_s15 }
 0x380   : > { %1440 = vrot.lane.b32.xlu0 %v1126_v1, %s2764_s28  ;;  %1430 = vrot.lane.b32.xlu1 %v1126_v1, %s2763_s27 }
 0x384   : > { %1460 = vrot.lane.b32.xlu0 %v1126_v1, %s2766_s30  ;;  %1450 = vrot.lane.b32.xlu1 %v1126_v1, %s2765_s29 }
 0x388   : > { %v1275_v12 = vpop.f32.mrb[8].mxu0  ;;  %1480 = vrot.lane.b32.xlu0 %v1126_v1, %s2768_s14  ;;  %1470 = vrot.lane.b32.xlu1 %v1126_v1, %s2767_s13 }
 0x389   : > { %v1276_v17 = vadd.f32 %v1275_v12, %v1222_v16  ;;  %v1277_v18 = vpop.f32.mrb[9].mxu0 }
 0x38a   : > { %v1278_v19 = vadd.f32 %v1277_v18, %v1222_v16  ;;  %v1279_v20 = vpop.f32.mrb[10].mxu0 }
 0x38b   : > { %v1284_v2 = vmul.f32 0.2, %v1276_v17  ;;  %v1280_v21 = vadd.f32 %v1279_v20, %v1227_v13  ;;  %v1281_v9 = vpop.f32.mrb[11].mxu0 }
 0x38c   : > { %v1285_v22 = vmul.f32 0.2, %v1278_v19  ;;  %v1282_v23 = vadd.f32 %v1281_v9, %v1227_v13  ;;  %1500 = vrot.lane.b32.xlu0 %v1126_v1, %s2770_s16  ;;  %1490 = vrot.lane.b32.xlu1 %v1126_v1, %s2769_s15 }
 0x38d   : > { %v1286_v24 = vmul.f32 0.2, %v1280_v21  ;;  %v1288_v26 = vmax.f32 %v1276_v17, %v1284_v2 }
 0x38e   : > { %v1287_v25 = vmul.f32 0.2, %v1282_v23  ;;  %v1289_v28 = vmax.f32 %v1278_v19, %v1285_v22 }
 0x38f   : > { %v1290_v27 = vmax.f32 %v1280_v21, %v1286_v24 }
 0x390   : > { %v1291_v29 = vmax.f32 %v1282_v23, %v1287_v25 }
 0x391   : > { %v1292_v30 = vpack.c.bf16 %v1290_v27, %v1288_v26 }
 0x392   : > { %v1293_v31 = vpack.c.bf16 %v1291_v29, %v1289_v28 }
 0x393   : > { %1442 = vrot.lane.b32.xlu1 %v1292_v30, %s2764_s28  ;;  %1432 = vrot.lane.b32.xlu0 %v1292_v30, %s2763_s27 }
 0x394   : > { %1701 = vmatprep.subr.bf16.mxu1 %v1293_v31 }
 0x395   : > { %1702 = vmatpush1.bf16.msra.mxu1 %v1292_v30 }
 0x397   : > { %1462 = vrot.lane.b32.xlu1 %v1292_v30, %s2766_s30  ;;  %1452 = vrot.lane.b32.xlu0 %v1292_v30, %s2765_s29 }
 0x39b   : > { %1482 = vrot.lane.b32.xlu1 %v1292_v30, %s2768_s14  ;;  %1472 = vrot.lane.b32.xlu0 %v1292_v30, %s2767_s13 }
 0x39f   : > { %1502 = vrot.lane.b32.xlu1 %v1292_v30, %s2770_s16  ;;  %1492 = vrot.lane.b32.xlu0 %v1292_v30, %s2769_s15 }
 0x3a3   : > { %1595 = vrot.lane.b32.xlu1 %v1292_v30, %s2763_s27  ;;  %1605 = vrot.lane.b32.xlu0 %v1292_v30, %s2764_s28 }
 0x3a7   : > { %1615 = vrot.lane.b32.xlu1 %v1292_v30, %s2765_s29  ;;  %1625 = vrot.lane.b32.xlu0 %v1292_v30, %s2766_s30 }
 0x3a8   : > { %v1409_v34 = vpop.f32.mrb[8].mxu1 }
 0x3a9   : > { %v1410_v35 = vadd.f32 %v1409_v34, %v1356_v33  ;;  %v1411_v36 = vpop.f32.mrb[9].mxu1 }
 0x3aa   : > { %v1412_v38 = vpop.f32.mrb[10].mxu1 }
 0x3ab   : > { %v1416_v39 = vmul.f32 0.2, %v1410_v35  ;;  %v1413_v40 = vadd.f32 %v1412_v38, %v1361_v37  ;;  %1635 = vrot.lane.b32.xlu1 %v1292_v30, %s2767_s13  ;;  %1645 = vrot.lane.b32.xlu0 %v1292_v30, %s2768_s14  ;;  %v1414_v41 = vpop.f32.mrb[11].mxu1 }
 0x3ac   : > { %v3413_v41 = vld [vmem:[%s3736_s6] ss:$8 sps:$4 sm:$0xff]  }
 0x3ad   : > { %v1417_v42 = vmul.f32 0.2, %v1413_v40  ;;  %v1418_v43 = vmax.f32 %v1410_v35, %v1416_v39 }
 0x3af   : > { %v1419_v44 = vmax.f32 %v1413_v40, %v1417_v42  ;;  %1655 = vrot.lane.b32.xlu1 %v1292_v30, %s2769_s15  ;;  %1665 = vrot.lane.b32.xlu0 %v1292_v30, %s2770_s16 }
 0x3b1   : > { %v3322_v45 = vpack.c.bf16 %v1419_v44, %v1418_v43 }
 0x3b3   : > { %1597 = vrot.lane.b32.xlu1 %v1293_v31, %s2763_s27  ;;  %1607 = vrot.lane.b32.xlu0 %v1293_v31, %s2764_s28 }
 0x3b7   : > { %1617 = vrot.lane.b32.xlu1 %v1293_v31, %s2765_s29  ;;  %1627 = vrot.lane.b32.xlu0 %v1293_v31, %s2766_s30 }
 0x3bb   : > { %1637 = vrot.lane.b32.xlu1 %v1293_v31, %s2767_s13  ;;  %1647 = vrot.lane.b32.xlu0 %v1293_v31, %s2768_s14 }
 0x3bf   : > { %1657 = vrot.lane.b32.xlu1 %v1293_v31, %s2769_s15  ;;  %1667 = vrot.lane.b32.xlu0 %v1293_v31, %s2770_s16 }
 0x3c3   : > { %1609 = vrot.lane.b32.xlu1 %v3322_v45, %s2764_s28  ;;  %1599 = vrot.lane.b32.xlu0 %v3322_v45, %s2763_s27 }
 0x3c7   : > { %1767 = vrot.lane.b32.xlu1 %v3322_v45, %s2764_s28  ;;  %1761 = vrot.lane.b32.xlu0 %v3322_v45, %s2763_s27 }
 0x3cb   : > { %1629 = vrot.lane.b32.xlu1 %v3322_v45, %s2766_s30  ;;  %1619 = vrot.lane.b32.xlu0 %v3322_v45, %s2765_s29 }
 0x3cf   : > { %1779 = vrot.lane.b32.xlu1 %v3322_v45, %s2766_s30  ;;  %1773 = vrot.lane.b32.xlu0 %v3322_v45, %s2765_s29 }
 0x3d3   : > { %1649 = vrot.lane.b32.xlu1 %v3322_v45, %s2768_s14  ;;  %1639 = vrot.lane.b32.xlu0 %v3322_v45, %s2767_s13 }
 0x3d7   : > { %1791 = vrot.lane.b32.xlu1 %v3322_v45, %s2768_s14  ;;  %1785 = vrot.lane.b32.xlu0 %v3322_v45, %s2767_s13 }
 0x3db   : > { %1669 = vrot.lane.b32.xlu1 %v3322_v45, %s2770_s16  ;;  %1659 = vrot.lane.b32.xlu0 %v3322_v45, %s2769_s15 }
 0x3df   : > { %1803 = vrot.lane.b32.xlu1 %v3322_v45, %s2770_s16  ;;  %1797 = vrot.lane.b32.xlu0 %v3322_v45, %s2769_s15 }
 0x3e2   : > { %v1439_v54 = vpop.permute.xlu0 %1438  ;;  %v1429_v55 = vpop.permute.xlu1 %1428 }
 0x3e3   : > { %1514 = vperm.xlu1 %2724, %v1510_v53   ;;  %1805 = vrot.lane.b32.xlu0 %v2771_v8, %s2770_s16 }
 0x3e6   : > { %v1459_v57 = vpop.permute.xlu0 %1458  ;;  %v1449_v58 = vpop.permute.xlu1 %1448 }
 0x3e7   : > { %1681 = vperm.xlu1 %2724, %v1510_v53   ;;  %1519 = vperm.xlu0 %2723, %v1511_v56  }
 0x3ea   : > { %v1479_v59 = vpop.permute.xlu0 %1478  ;;  %v1469_v60 = vpop.permute.xlu1 %1468 }
 0x3eb   : > { %1815 = vperm.xlu1 %2724, %v1510_v53   ;;  %1686 = vperm.xlu0 %2723, %v1511_v56  }
 0x3ee   : > { %v1499_v61 = vpop.permute.xlu0 %1498  ;;  %v1489_v62 = vpop.permute.xlu1 %1488 }
 0x3ef   : > { %1820 = vperm.xlu0 %2723, %v1511_v56  }
 0x3f2   : > { %v1441_v63 = vpop.permute.xlu0 %1440  ;;  %v1431_v0 = vpop.permute.xlu1 %1430 }
 0x3f3   : > { %v1434_v1 = vsel %vm454_vm0, %v1429_v55, %v1431_v0  ;;  %v1444_v18 = vsel %vm463_vm2, %v1439_v54, %v1441_v63 }
 0x3f6   : > { %v1461_v3 = vpop.permute.xlu0 %1460  ;;  %v1451_v4 = vpop.permute.xlu1 %1450 }
 0x3f7   : > { %v1454_v2 = vsel %vm472_vm3, %v1449_v58, %v1451_v4  ;;  %v1464_v23 = vsel %vm481_vm4, %v1459_v57, %v1461_v3 }
 0x3fa   : > { %v1481_v6 = vpop.permute.xlu0 %1480  ;;  %v1471_v7 = vpop.permute.xlu1 %1470 }
 0x3fb   : > { %v1474_v27 = vsel %vm490_vm5, %v1469_v60, %v1471_v7  ;;  %v1484_v31 = vsel %vm499_vm6, %v1479_v59, %v1481_v6 }
 0x3fe   : > { %v1501_v10 = vpop.permute.xlu0 %1500  ;;  %v1491_v11 = vpop.permute.xlu1 %1490 }
 0x3ff   : > { %v1494_v36 = vsel %vm508_vm7, %v1489_v62, %v1491_v11  ;;  %v1504_v40 = vsel %vm517_vm8, %v1499_v61, %v1501_v10 }
 0x405   : > { %v1433_v14 = vpop.permute.xlu0 %1432  ;;  %v1443_v15 = vpop.permute.xlu1 %1442 }
 0x406   : > { %v1435_v5 = vsel %vm454_vm0, %v1431_v0, %v1433_v14  ;;  %v1445_v16 = vsel %vm463_vm2, %v1441_v63, %v1443_v15 }
 0x407   : > { %1536 = vmatprep.subr.bf16.mxu0 %v1435_v5 }
 0x408   : > { %1537 = vmatpush1.bf16.msra.mxu0 %v1434_v1 }
 0x409   : > { %v1453_v12 = vpop.permute.xlu0 %1452  ;;  %1538 = vmatprep.subr.bf16.mxu0 %v1445_v16  ;;  %v1463_v17 = vpop.permute.xlu1 %1462 }
 0x40a   : > { %v1455_v13 = vsel %vm472_vm3, %v1451_v4, %v1453_v12  ;;  %v1465_v21 = vsel %vm481_vm4, %v1461_v3, %v1463_v17 }
 0x40c   : > { %1539 = vmatpush1.bf16.msra.mxu0 %v1444_v18 }
 0x40d   : > { %v1473_v19 = vpop.permute.xlu0 %1472  ;;  %1540 = vmatprep.subr.bf16.mxu0 %v1455_v13  ;;  %v1483_v20 = vpop.permute.xlu1 %1482 }
 0x40e   : > { %v1475_v24 = vsel %vm490_vm5, %v1471_v7, %v1473_v19  ;;  %v1485_v28 = vsel %vm499_vm6, %v1481_v6, %v1483_v20 }
 0x410   : > { %1541 = vmatpush1.bf16.msra.mxu0 %v1454_v2 }
 0x411   : > { %v1493_v9 = vpop.permute.xlu0 %1492  ;;  %1542 = vmatprep.subr.bf16.mxu0 %v1465_v21  ;;  %v1503_v22 = vpop.permute.xlu1 %1502 }
 0x412   : > { %v1495_v33 = vsel %vm508_vm7, %v1491_v11, %v1493_v9  ;;  %v1505_v37 = vsel %vm517_vm8, %v1501_v10, %v1503_v22 }
 0x414   : > { %1543 = vmatpush1.bf16.msra.mxu0 %v1464_v23 }
 0x415   : > { %v1606_v25 = vpop.permute.xlu0 %1605  ;;  %1544 = vmatprep.subr.bf16.mxu0 %v1475_v24  ;;  %v1596_v26 = vpop.permute.xlu1 %1595 }
 0x418   : > { %1545 = vmatpush1.bf16.msra.mxu0 %v1474_v27 }
 0x419   : > { %v1626_v29 = vpop.permute.xlu0 %1625  ;;  %1546 = vmatprep.subr.bf16.mxu0 %v1485_v28  ;;  %v1616_v30 = vpop.permute.xlu1 %1615 }
 0x41c   : > { %1547 = vmatpush1.bf16.msra.mxu0 %v1484_v31 }
 0x41d   : > { %v3399_v34 = vpop.permute.xlu0 %1645  ;;  %1548 = vmatprep.subr.bf16.mxu0 %v1495_v33  ;;  %v3401_v35 = vpop.permute.xlu1 %1635 }
 0x420   : > { %1549 = vmatpush1.bf16.msra.mxu0 %v1494_v36 }
 0x421   : > { %v3405_v38 = vpop.permute.xlu0 %1665  ;;  %1550 = vmatprep.subr.bf16.mxu0 %v1505_v37  ;;  %v3407_v39 = vpop.permute.xlu1 %1655 }
 0x424   : > { %1551 = vmatpush1.bf16.msra.mxu0 %v1504_v40 }
 0x425   : > { %v1608_v42 = vpop.permute.xlu0 %1607  ;;  %v1598_v43 = vpop.permute.xlu1 %1597  ;;  %1835 = vmatprep.subr.bf16.mxu0 %v2771_v8 }
 0x426   : > { %v1601_v61 = vsel %vm454_vm0, %v1596_v26, %v1598_v43  ;;  %v1611_v3 = vsel %vm463_vm2, %v1606_v25, %v1608_v42 }
 0x427   : > { %1567 = vmatmul.mubr.bf16.vlgmr.msra.gmra.mrb[12].mxu0 %v3413_v41 }
 0x428   : > { %1836 = vmatpush1.bf16.msra.mxu0 %v3322_v45  ;;  %2668 = vmatprep.mubr.msk.bf16.mxu0 %vm1070_vm11, %v3310_v32 }
 0x429   : > { %v1628_v44 = vpop.permute.xlu0 %1627  ;;  %v1618_v53 = vpop.permute.xlu1 %1617  ;;  %1837 = vmatprep.subr.bf16.mxu0 %v2771_v8 }
 0x42a   : > { %v1621_v11 = vsel %vm472_vm3, %v1616_v30, %v1618_v53 }
 0x42d   : > { %v1648_v54 = vpop.permute.xlu0 %1647  ;;  %v1638_v55 = vpop.permute.xlu1 %1637 }
 0x42e   : > { %v1641_v18 = vsel %vm490_vm5, %v3401_v35, %v1638_v55 }
 0x431   : > { %v3421_v56 = vpop.permute.xlu0 %1667  ;;  %v1658_v57 = vpop.permute.xlu1 %1657 }
 0x432   : > { %v1661_v23 = vsel %vm508_vm7, %v3407_v39, %v1658_v57 }
 0x435   : > { %v1600_v58 = vpop.permute.xlu0 %1599  ;;  %v1610_v59 = vpop.permute.xlu1 %1609 }
 0x436   : > { %v1602_v60 = vsel %vm454_vm0, %v1598_v43, %v1600_v58  ;;  %v1612_v62 = vsel %vm463_vm2, %v1608_v42, %v1610_v59 }
 0x437   : > { %1703 = vmatprep.subr.bf16.mxu1 %v1602_v60 }
 0x438   : > { %1704 = vmatpush1.bf16.msra.mxu1 %v1601_v61 }
 0x439   : > { %v1762_v32 = vpop.permute.xlu0 %1761  ;;  %1705 = vmatprep.subr.bf16.mxu1 %v1612_v62  ;;  %v1768_v63 = vpop.permute.xlu1 %1767 }
 0x43a   : > { %v1765_v0 = vsel %vm454_vm0, %v1762_v32, %v3340_v46  ;;  %v1771_v7 = vsel %vm463_vm2, %v1768_v63, %v3350_v47  ;;  %v1631_v47 = vsel %vm481_vm4, %v1626_v29, %v1628_v44 }
 0x43b   : > { %1838 = vmatpush1.bf16.msra.mxu0 %v1765_v0 }
 0x43c   : > { %1706 = vmatpush1.bf16.msra.mxu1 %v1611_v3  ;;  %1839 = vmatprep.subr.bf16.mxu0 %v2771_v8 }
 0x43d   : > { %v1620_v4 = vpop.permute.xlu0 %1619  ;;  %v1630_v6 = vpop.permute.xlu1 %1629 }
 0x43e   : > { %v1622_v10 = vsel %vm472_vm3, %v1618_v53, %v1620_v4  ;;  %v1632_v46 = vsel %vm481_vm4, %v1628_v44, %v1630_v6 }
 0x43f   : > { %1707 = vmatprep.subr.bf16.mxu1 %v1622_v10  ;;  %1840 = vmatpush1.bf16.msra.mxu0 %v1771_v7 }
 0x440   : > { %1708 = vmatpush1.bf16.msra.mxu1 %v1621_v11  ;;  %1841 = vmatprep.subr.bf16.mxu0 %v2771_v8 }
 0x441   : > { %v1774_v14 = vpop.permute.xlu0 %1773  ;;  %1709 = vmatprep.subr.bf16.mxu1 %v1632_v46  ;;  %v1780_v15 = vpop.permute.xlu1 %1779 }
 0x442   : > { %v1777_v5 = vsel %vm472_vm3, %v1774_v14, %v3352_v48  ;;  %v1783_v12 = vsel %vm481_vm4, %v1780_v15, %v3358_v49  ;;  %v1651_v49 = vsel %vm499_vm6, %v3399_v34, %v1648_v54 }
 0x443   : > { %1842 = vmatpush1.bf16.msra.mxu0 %v1777_v5 }
 0x444   : > { %1710 = vmatpush1.bf16.msra.mxu1 %v1631_v47  ;;  %1843 = vmatprep.subr.bf16.mxu0 %v2771_v8 }
 0x445   : > { %v1640_v1 = vpop.permute.xlu0 %1639  ;;  %v1650_v16 = vpop.permute.xlu1 %1649 }
 0x446   : > { %v1642_v17 = vsel %vm490_vm5, %v1638_v55, %v1640_v1  ;;  %v1652_v48 = vsel %vm499_vm6, %v1648_v54, %v1650_v16 }
 0x447   : > { %1711 = vmatprep.subr.bf16.mxu1 %v1642_v17  ;;  %1844 = vmatpush1.bf16.msra.mxu0 %v1783_v12 }
 0x448   : > { %1712 = vmatpush1.bf16.msra.mxu1 %v1641_v18  ;;  %1845 = vmatprep.subr.bf16.mxu0 %v2771_v8 }
 0x449   : > { %v1786_v13 = vpop.permute.xlu0 %1785  ;;  %1713 = vmatprep.subr.bf16.mxu1 %v1652_v48  ;;  %v1792_v19 = vpop.permute.xlu1 %1791 }
 0x44a   : > { %v1789_v20 = vsel %vm490_vm5, %v1786_v13, %v3360_v50  ;;  %v1795_v9 = vsel %vm499_vm6, %v1792_v19, %v3370_v51  ;;  %v1671_v51 = vsel %vm517_vm8, %v3405_v38, %v3421_v56 }
 0x44b   : > { %1846 = vmatpush1.bf16.msra.mxu0 %v1789_v20 }
 0x44c   : > { %1714 = vmatpush1.bf16.msra.mxu1 %v1651_v49  ;;  %1847 = vmatprep.subr.bf16.mxu0 %v2771_v8 }
 0x44d   : > { %v1660_v2 = vpop.permute.xlu0 %1659  ;;  %v1670_v21 = vpop.permute.xlu1 %1669 }
 0x44e   : > { %v1662_v22 = vsel %vm508_vm7, %v1658_v57, %v1660_v2  ;;  %v1672_v50 = vsel %vm517_vm8, %v3421_v56, %v1670_v21 }
 0x44f   : > { %1715 = vmatprep.subr.bf16.mxu1 %v1662_v22  ;;  %1848 = vmatpush1.bf16.msra.mxu0 %v1795_v9  ;;  %v1970_v9 = vld [vmem:[%s3739_s9] sm:$0xff] }
 0x450   : > { %1716 = vmatpush1.bf16.msra.mxu1 %v1661_v23  ;;  %1849 = vmatprep.subr.bf16.mxu0 %v2771_v8  ;;  %v2742_v22 = vld [vmem:[%s3738_s8 + $0x4] ss:$8 sps:$4 sm:$0xff]  }
 0x451   : > { %v1798_v24 = vpop.permute.xlu0 %1797  ;;  %1717 = vmatprep.subr.bf16.mxu1 %v1672_v50  ;;  %v1804_v26 = vpop.permute.xlu1 %1803 }
 0x452   : > { %v1801_v25 = vsel %vm508_vm7, %v1798_v24, %v3372_v52 }
 0x453   : > { %1850 = vmatpush1.bf16.msra.mxu0 %v1801_v25 }
 0x454   : > { %1718 = vmatpush1.bf16.msra.mxu1 %v1671_v51  ;;  %1851 = vmatprep.subr.bf16.mxu0 %v2771_v8 }
 0x455   : > { %v1806_v27 = vpop.permute.xlu0 %1805 }
 0x456   : > { %v1807_v28 = vsel %vm517_vm8, %v1804_v26, %v1806_v27 }
 0x457   : > { %1734 = vmatmul.mubr.bf16.vlgmr.msra.gmra.mrb[12].mxu1 %v3413_v41  ;;  %1852 = vmatpush1.bf16.msra.mxu0 %v1807_v28  ;;  %v1971_v28 = vld [vmem:[%s3739_s9 + $0x8] sm:$0xff] }
 0x458   : > { %2671 = vmatprep.mubr.msk.bf16.mxu1 %vm1070_vm11, %v2742_v22 }
 0x45a   : > { %1868 = vmatmul.mubr.bf16.vlgmr.msra.gmra.mrb[16].mxu0 %v3413_v41 }
 0x45b   : > { %2674 = vmatprep.mubr.msk.bf16.mxu0 %vm1070_vm11, %v2742_v22 }
 0x462   : > { %v1515_v29 = vpop.permute.xlu1 %1514 }
 0x466   : > { %v1520_v33 = vpop.permute.xlu0 %1519  ;;  %v1682_v56 = vpop.permute.xlu1 %1681 }
 0x46a   : > { %v1687_v57 = vpop.permute.xlu0 %1686  ;;  %v1816_v61 = vpop.permute.xlu1 %1815 }
 0x46e   : > { %v1821_v46 = vpop.permute.xlu0 %1820 }
 0x4fa   : > { %v1568_v30 = vpop.f32.mrb[12].mxu0 }
 0x4fb   : > { %v1569_v52 = vadd.f32 %v1568_v30, %v1515_v29  ;;  %v1570_v31 = vpop.f32.mrb[13].mxu0 }
 0x4fc   : > { %v1571_v34 = vadd.f32 %v1570_v31, %v1515_v29  ;;  %v1572_v35 = vpop.f32.mrb[14].mxu0 }
 0x4fd   : > { %v1577_v36 = vmul.f32 0.2, %v1569_v52  ;;  %v1573_v37 = vadd.f32 %v1572_v35, %v1520_v33  ;;  %v1574_v38 = vpop.f32.mrb[15].mxu0 }
 0x4fe   : > { %v1578_v8 = vmul.f32 0.2, %v1571_v34  ;;  %v1575_v39 = vadd.f32 %v1574_v38, %v1520_v33 }
 0x4ff   : > { %v1579_v40 = vmul.f32 0.2, %v1573_v37  ;;  %v1581_v43 = vmax.f32 %v1569_v52, %v1577_v36 }
 0x500   : > { %v1580_v42 = vmul.f32 0.2, %v1575_v39  ;;  %v1582_v53 = vmax.f32 %v1571_v34, %v1578_v8 }
 0x501   : > { %v1583_v44 = vmax.f32 %v1573_v37, %v1579_v40 }
 0x502   : > { %v1584_v54 = vmax.f32 %v1575_v39, %v1580_v42 }
 0x503   : > { %v3469_v55 = vpack.c.bf16 %v1583_v44, %v1581_v43 }
 0x504   : > { %v1586_v41 = vpack.c.bf16 %v1584_v54, %v1582_v53 }
 0x505   : > { %1888 = vrot.lane.b32.xlu1 %v3469_v55, %s2763_s27 }
 0x506   : > { %1994 = vmatprep.subr.bf16.mxu1 %v1586_v41 }
 0x507   : > { %1995 = vmatpush1.bf16.msra.mxu1 %v3469_v55 }
 0x509   : > { %1898 = vrot.lane.b32.xlu1 %v3469_v55, %s2764_s28 }
 0x50d   : > { %1908 = vrot.lane.b32.xlu1 %v3469_v55, %s2765_s29 }
 0x511   : > { %1918 = vrot.lane.b32.xlu1 %v3469_v55, %s2766_s30 }
 0x515   : > { %1928 = vrot.lane.b32.xlu1 %v3469_v55, %s2767_s13 }
 0x519   : > { %1938 = vrot.lane.b32.xlu1 %v3469_v55, %s2768_s14 }
 0x51d   : > { %1948 = vrot.lane.b32.xlu1 %v3469_v55, %s2769_s15 }
 0x521   : > { %1890 = vrot.lane.b32.xlu1 %v1586_v41, %s2763_s27 }
 0x525   : > { %1900 = vrot.lane.b32.xlu1 %v1586_v41, %s2764_s28 }
 0x529   : > { %1910 = vrot.lane.b32.xlu1 %v1586_v41, %s2765_s29 }
 0x52a   : > { %v1735_v58 = vpop.f32.mrb[12].mxu1 }
 0x52b   : > { %v1736_v59 = vadd.f32 %v1735_v58, %v1682_v56  ;;  %v1737_v60 = vpop.f32.mrb[13].mxu1 }
 0x52c   : > { %v1738_v62 = vadd.f32 %v1737_v60, %v1682_v56  ;;  %v1739_v32 = vpop.f32.mrb[14].mxu1 }
 0x52d   : > { %v1744_v63 = vmul.f32 0.2, %v1736_v59  ;;  %v1740_v0 = vadd.f32 %v1739_v32, %v1687_v57  ;;  %v1741_v3 = vpop.f32.mrb[15].mxu1  ;;  %v1869_v4 = vpop.f32.mrb[16].mxu0  ;;  %1920 = vrot.lane.b32.xlu1 %v1586_v41, %s2766_s30 }
 0x52e   : > { %v1745_v6 = vmul.f32 0.2, %v1738_v62  ;;  %v1742_v7 = vadd.f32 %v1741_v3, %v1687_v57  ;;  %v1870_v10 = vadd.f32 %v1869_v4, %v1816_v61  ;;  %v1871_v11 = vpop.f32.mrb[17].mxu0 }
 0x52f   : > { %v1746_v14 = vmul.f32 0.2, %v1740_v0  ;;  %v1872_v15 = vpop.f32.mrb[18].mxu0  ;;  %v1748_v12 = vmax.f32 %v1736_v59, %v1744_v63 }
 0x530   : > { %v1747_v5 = vmul.f32 0.2, %v1742_v7  ;;  %v1876_v47 = vmul.f32 0.2, %v1870_v10  ;;  %v1873_v1 = vadd.f32 %v1872_v15, %v1821_v46  ;;  %v1874_v16 = vpop.f32.mrb[19].mxu0  ;;  %v1749_v18 = vmax.f32 %v1738_v62, %v1745_v6 }
 0x531   : > { %v1750_v17 = vmax.f32 %v1740_v0, %v1746_v14  ;;  %1930 = vrot.lane.b32.xlu1 %v1586_v41, %s2767_s13 }
 0x532   : > { %v1751_v48 = vmax.f32 %v1742_v7, %v1747_v5  ;;  %v1877_v13 = vmul.f32 0.2, %v1873_v1  ;;  %v1878_v49 = vmax.f32 %v1870_v10, %v1876_v47 }
 0x533   : > { %v1752_v19 = vpack.c.bf16 %v1750_v17, %v1748_v12 }
 0x534   : > { %v1753_v20 = vpack.c.bf16 %v1751_v48, %v1749_v18  ;;  %v1879_v2 = vmax.f32 %v1873_v1, %v1877_v13  ;;  %v2744_v13 = vld [vmem:[%s3738_s8] ss:$8 sps:$4 sm:$0xff]  }
 0x535   : > { %1940 = vrot.lane.b32.xlu1 %v1586_v41, %s2768_s14  ;;  %1892 = vrot.lane.b32.xlu0 %v1752_v19, %s2763_s27 }
 0x536   : > { %v1880_v21 = vpack.c.bf16 %v1879_v2, %v1878_v49  ;;  %2161 = vmatprep.subr.bf16.mxu0 %v1753_v20 }
 0x537   : > { %2162 = vmatpush1.bf16.msra.mxu0 %v1752_v19 }
 0x539   : > { %1950 = vrot.lane.b32.xlu1 %v1586_v41, %s2769_s15  ;;  %2055 = vrot.lane.b32.xlu0 %v1752_v19, %s2763_s27 }
 0x53d   : > { %1960 = vrot.lane.b32.xlu1 %v1586_v41, %s2770_s16  ;;  %1902 = vrot.lane.b32.xlu0 %v1752_v19, %s2764_s28 }
 0x541   : > { %2057 = vrot.lane.b32.xlu1 %v1753_v20, %s2763_s27  ;;  %2065 = vrot.lane.b32.xlu0 %v1752_v19, %s2764_s28 }
 0x545   : > { %2067 = vrot.lane.b32.xlu1 %v1753_v20, %s2764_s28  ;;  %1912 = vrot.lane.b32.xlu0 %v1752_v19, %s2765_s29 }
 0x549   : > { %2077 = vrot.lane.b32.xlu1 %v1753_v20, %s2765_s29  ;;  %2075 = vrot.lane.b32.xlu0 %v1752_v19, %s2765_s29 }
 0x54d   : > { %2087 = vrot.lane.b32.xlu1 %v1753_v20, %s2766_s30  ;;  %1922 = vrot.lane.b32.xlu0 %v1752_v19, %s2766_s30 }
 0x551   : > { %2097 = vrot.lane.b32.xlu1 %v1753_v20, %s2767_s13  ;;  %2085 = vrot.lane.b32.xlu0 %v1752_v19, %s2766_s30 }
 0x555   : > { %2107 = vrot.lane.b32.xlu1 %v1753_v20, %s2768_s14  ;;  %1932 = vrot.lane.b32.xlu0 %v1752_v19, %s2767_s13 }
 0x559   : > { %2117 = vrot.lane.b32.xlu1 %v1753_v20, %s2769_s15  ;;  %2095 = vrot.lane.b32.xlu0 %v1752_v19, %s2767_s13 }
 0x55d   : > { %2127 = vrot.lane.b32.xlu1 %v1753_v20, %s2770_s16  ;;  %1942 = vrot.lane.b32.xlu0 %v1752_v19, %s2768_s14 }
 0x561   : > { %1958 = vrot.lane.b32.xlu1 %v3469_v55, %s2770_s16  ;;  %2105 = vrot.lane.b32.xlu0 %v1752_v19, %s2768_s14 }
 0x565   : > { %1974 = vperm.xlu1 %2724, %v1970_v9   ;;  %1952 = vrot.lane.b32.xlu0 %v1752_v19, %s2769_s15 }
 0x569   : > { %2141 = vperm.xlu1 %2724, %v1970_v9   ;;  %2115 = vrot.lane.b32.xlu0 %v1752_v19, %s2769_s15 }
 0x56d   : > { %1962 = vrot.lane.b32.xlu0 %v1752_v19, %s2770_s16 }
 0x571   : > { %2059 = vrot.lane.b32.xlu0 %v1880_v21, %s2763_s27 }
 0x575   : > { %2069 = vrot.lane.b32.xlu0 %v1880_v21, %s2764_s28 }
 0x577   : > { %v1889_v23 = vpop.permute.xlu1 %1888 }
 0x579   : > { %2079 = vrot.lane.b32.xlu0 %v1880_v21, %s2765_s29 }
 0x57b   : > { %v1899_v50 = vpop.permute.xlu1 %1898 }
 0x57d   : > { %2089 = vrot.lane.b32.xlu0 %v1880_v21, %s2766_s30 }
 0x57f   : > { %v1909_v24 = vpop.permute.xlu1 %1908 }
 0x581   : > { %2099 = vrot.lane.b32.xlu0 %v1880_v21, %s2767_s13 }
 0x583   : > { %v1919_v25 = vpop.permute.xlu1 %1918 }
 0x585   : > { %2109 = vrot.lane.b32.xlu0 %v1880_v21, %s2768_s14 }
 0x587   : > { %v1929_v51 = vpop.permute.xlu1 %1928 }
 0x589   : > { %2119 = vrot.lane.b32.xlu0 %v1880_v21, %s2769_s15 }
 0x58b   : > { %v1939_v26 = vpop.permute.xlu1 %1938 }
 0x58d   : > { %2129 = vrot.lane.b32.xlu0 %v1880_v21, %s2770_s16 }
 0x58f   : > { %v3535_v27 = vpop.permute.xlu1 %1948 }
 0x591   : > { %2125 = vrot.lane.b32.xlu0 %v1752_v19, %s2770_s16 }
 0x593   : > { %v1891_v29 = vpop.permute.xlu1 %1890 }
 0x594   : > { %v1894_v37 = vsel %vm454_vm0, %v1889_v23, %v1891_v29 }
 0x595   : > { %1979 = vperm.xlu0 %2723, %v1971_v28  }
 0x597   : > { %v1901_v30 = vpop.permute.xlu1 %1900 }
 0x598   : > { %v1904_v43 = vsel %vm463_vm2, %v1899_v50, %v1901_v30 }
 0x599   : > { %2146 = vperm.xlu0 %2723, %v1971_v28  }
 0x59b   : > { %v1911_v52 = vpop.permute.xlu1 %1910 }
 0x59c   : > { %v1914_v56 = vsel %vm472_vm3, %v1909_v24, %v1911_v52 }
 0x59d   : > { %2398 = vrot.lane.b32.xlu0 %v3322_v45, %s2763_s27 }
 0x59f   : > { %v1921_v31 = vpop.permute.xlu1 %1920 }
 0x5a0   : > { %v1924_v62 = vsel %vm481_vm4, %v1919_v25, %v1921_v31 }
 0x5a1   : > { %2408 = vrot.lane.b32.xlu0 %v3322_v45, %s2764_s28 }
 0x5a3   : > { %v1931_v33 = vpop.permute.xlu1 %1930 }
 0x5a4   : > { %v1934_v4 = vsel %vm490_vm5, %v1929_v51, %v1931_v33 }
 0x5a5   : > { %2418 = vrot.lane.b32.xlu0 %v3322_v45, %s2765_s29 }
 0x5a7   : > { %v1893_v34 = vpop.permute.xlu0 %1892  ;;  %v1941_v35 = vpop.permute.xlu1 %1940 }
 0x5a8   : > { %v1895_v36 = vsel %vm454_vm0, %v1891_v29, %v1893_v34  ;;  %v1944_v11 = vsel %vm499_vm6, %v1939_v26, %v1941_v35 }
 0x5a9   : > { %2428 = vrot.lane.b32.xlu0 %v3322_v45, %s2766_s30  ;;  %1996 = vmatprep.subr.bf16.mxu1 %v1895_v36 }
 0x5aa   : > { %1997 = vmatpush1.bf16.msra.mxu1 %v1894_v37 }
 0x5ab   : > { %v2056_v38 = vpop.permute.xlu0 %2055  ;;  %v1951_v8 = vpop.permute.xlu1 %1950 }
 0x5ac   : > { %v1954_v1 = vsel %vm508_vm7, %v3535_v27, %v1951_v8 }
 0x5ad   : > { %2438 = vrot.lane.b32.xlu0 %v3322_v45, %s2767_s13 }
 0x5af   : > { %v1903_v39 = vpop.permute.xlu0 %1902  ;;  %v1961_v40 = vpop.permute.xlu1 %1960 }
 0x5b0   : > { %v1905_v42 = vsel %vm463_vm2, %v1901_v30, %v1903_v39 }
 0x5b1   : > { %2448 = vrot.lane.b32.xlu0 %v3322_v45, %s2768_s14  ;;  %1998 = vmatprep.subr.bf16.mxu1 %v1905_v42 }
 0x5b2   : > { %1999 = vmatpush1.bf16.msra.mxu1 %v1904_v43 }
 0x5b3   : > { %v2066_v44 = vpop.permute.xlu0 %2065  ;;  %v2058_v53 = vpop.permute.xlu1 %2057 }
 0x5b4   : > { %v2061_v49 = vsel %vm454_vm0, %v2056_v38, %v2058_v53 }
 0x5b5   : > { %2458 = vrot.lane.b32.xlu0 %v3322_v45, %s2769_s15 }
 0x5b7   : > { %v1913_v54 = vpop.permute.xlu0 %1912  ;;  %v2068_v55 = vpop.permute.xlu1 %2067 }
 0x5b8   : > { %v1915_v41 = vsel %vm472_vm3, %v1911_v52, %v1913_v54  ;;  %v2071_v9 = vsel %vm463_vm2, %v2066_v44, %v2068_v55 }
 0x5b9   : > { %2468 = vrot.lane.b32.xlu0 %v3322_v45, %s2770_s16  ;;  %2000 = vmatprep.subr.bf16.mxu1 %v1915_v41 }
 0x5ba   : > { %2001 = vmatpush1.bf16.msra.mxu1 %v1914_v56 }
 0x5bb   : > { %v2076_v57 = vpop.permute.xlu0 %2075  ;;  %v2078_v58 = vpop.permute.xlu1 %2077 }
 0x5bc   : > { %v2081_v50 = vsel %vm472_vm3, %v2076_v57, %v2078_v58 }
 0x5bf   : > { %v1923_v59 = vpop.permute.xlu0 %1922  ;;  %v2088_v60 = vpop.permute.xlu1 %2087 }
 0x5c0   : > { %v1925_v61 = vsel %vm481_vm4, %v1921_v31, %v1923_v59 }
 0x5c1   : > { %2002 = vmatprep.subr.bf16.mxu1 %v1925_v61 }
 0x5c2   : > { %2003 = vmatpush1.bf16.msra.mxu1 %v1924_v62 }
 0x5c3   : > { %v2086_v32 = vpop.permute.xlu0 %2085  ;;  %v2098_v63 = vpop.permute.xlu1 %2097 }
 0x5c4   : > { %v2091_v51 = vsel %vm481_vm4, %v2086_v32, %v2088_v60 }
 0x5c7   : > { %v1933_v0 = vpop.permute.xlu0 %1932  ;;  %v2108_v6 = vpop.permute.xlu1 %2107 }
 0x5c8   : > { %v1935_v3 = vsel %vm490_vm5, %v1931_v33, %v1933_v0 }
 0x5c9   : > { %2004 = vmatprep.subr.bf16.mxu1 %v1935_v3 }
 0x5ca   : > { %2005 = vmatpush1.bf16.msra.mxu1 %v1934_v4 }
 0x5cb   : > { %v2096_v45 = vpop.permute.xlu0 %2095  ;;  %v2118_v46 = vpop.permute.xlu1 %2117 }
 0x5cc   : > { %v2101_v28 = vsel %vm490_vm5, %v2096_v45, %v2098_v63 }
 0x5cf   : > { %v1943_v7 = vpop.permute.xlu0 %1942  ;;  %v2128_v5 = vpop.permute.xlu1 %2127 }
 0x5d0   : > { %v1945_v10 = vsel %vm499_vm6, %v1941_v35, %v1943_v7 }
 0x5d1   : > { %2006 = vmatprep.subr.bf16.mxu1 %v1945_v10 }
 0x5d2   : > { %2007 = vmatpush1.bf16.msra.mxu1 %v1944_v11 }
 0x5d3   : > { %v2106_v14 = vpop.permute.xlu0 %2105  ;;  %v1959_v12 = vpop.permute.xlu1 %1958 }
 0x5d4   : > { %v1964_v48 = vsel %vm517_vm8, %v1959_v12, %v1961_v40  ;;  %v2111_v52 = vsel %vm499_vm6, %v2106_v14, %v2108_v6 }
 0x5d7   : > { %v1953_v15 = vpop.permute.xlu0 %1952 }
 0x5d8   : > { %v1955_v47 = vsel %vm508_vm7, %v1951_v8, %v1953_v15 }
 0x5d9   : > { %2008 = vmatprep.subr.bf16.mxu1 %v1955_v47 }
 0x5da   : > { %2009 = vmatpush1.bf16.msra.mxu1 %v1954_v1 }
 0x5db   : > { %v2116_v16 = vpop.permute.xlu0 %2115 }
 0x5dc   : > { %v2121_v34 = vsel %vm508_vm7, %v2116_v16, %v2118_v46 }
 0x5df   : > { %v1963_v17 = vpop.permute.xlu0 %1962 }
 0x5e0   : > { %v1965_v18 = vsel %vm517_vm8, %v1961_v40, %v1963_v17 }
 0x5e1   : > { %2010 = vmatprep.subr.bf16.mxu1 %v1965_v18 }
 0x5e2   : > { %2011 = vmatpush1.bf16.msra.mxu1 %v1964_v48 }
 0x5e3   : > { %v2060_v19 = vpop.permute.xlu0 %2059 }
 0x5e4   : > { %v2062_v20 = vsel %vm454_vm0, %v2058_v53, %v2060_v19  ;;  %v1975_v8 = vpop.permute.xlu1 %1974 }
 0x5e5   : > { %2027 = vmatmul.mubr.bf16.vlgmr.msra.gmra.mrb[16].mxu1 %v2744_v13  ;;  %2163 = vmatprep.subr.bf16.mxu0 %v2062_v20  ;;  %v3638_v20 = vld.sshfl [vmem:[%s3740_s10] sm:$0x33 pattern:$0x76325410] }
 0x5e6   : > { %2164 = vmatpush1.bf16.msra.mxu0 %v2061_v49  ;;  %v2317_v49 = vcombine.high %v3638_v20, %v3638_v20 }
 0x5e7   : > { %v2070_v2 = vpop.permute.xlu0 %2069 }
 0x5e8   : > { %v2072_v21 = vsel %vm463_vm2, %v2068_v55, %v2070_v2  ;;  %v2142_v3 = vpop.permute.xlu1 %2141  ;;  %2676 = vmatprep.mubr.msk.bf16.mxu1 %vm1070_vm11, %v2317_v49  ;;  %v2303_v2 = vld [vmem:[%s3741_s11] sm:$0x7] }
 0x5e9   : > { %2165 = vmatprep.subr.bf16.mxu0 %v2072_v21  ;;  %v2475_v21 = vld [vmem:[%s3741_s11] sm:$0x7] }
 0x5ea   : > { %2166 = vmatpush1.bf16.msra.mxu0 %v2071_v9  ;;  %v2363_v9 = vld [vmem:[%s428_s17 + $0x4] sm:$0x77] }
 0x5eb   : > { %v2080_v22 = vpop.permute.xlu0 %2079 }
 0x5ec   : > { %v2082_v23 = vsel %vm472_vm3, %v2078_v58, %v2080_v22  ;;  %v2369_v22 = vcombine.high %v2363_v9, %v2363_v9 }
 0x5ed   : > { %2167 = vmatprep.subr.bf16.mxu0 %v2082_v23  ;;  %v2364_v23 = vld [vmem:[%s428_s17 + $0xc] sm:$0x7] }
 0x5ee   : > { %2168 = vmatpush1.bf16.msra.mxu0 %v2081_v50  ;;  %v2535_v50 = vld [vmem:[%s428_s17 + $0xc] sm:$0x77] }
 0x5ef   : > { %v2090_v24 = vpop.permute.xlu0 %2089 }
 0x5f0   : > { %v2092_v25 = vsel %vm481_vm4, %v2088_v60, %v2090_v24 }
 0x5f1   : > { %2169 = vmatprep.subr.bf16.mxu0 %v2092_v25  ;;  %v2541_v25 = vcombine.high %v2535_v50, %v2535_v50 }
 0x5f2   : > { %2170 = vmatpush1.bf16.msra.mxu0 %v2091_v51  ;;  %v2536_v51 = vld [vmem:[%s428_s17 + $0x14] sm:$0x7] }
 0x5f3   : > { %v2100_v26 = vpop.permute.xlu0 %2099 }
 0x5f4   : > { %v2102_v27 = vsel %vm490_vm5, %v2098_v63, %v2100_v26 }
 0x5f5   : > { %2171 = vmatprep.subr.bf16.mxu0 %v2102_v27 }
 0x5f6   : > { %2172 = vmatpush1.bf16.msra.mxu0 %v2101_v28 }
 0x5f7   : > { %v2110_v29 = vpop.permute.xlu0 %2109 }
 0x5f8   : > { %v2112_v30 = vsel %vm499_vm6, %v2108_v6, %v2110_v29 }
 0x5f9   : > { %2173 = vmatprep.subr.bf16.mxu0 %v2112_v30 }
 0x5fa   : > { %2174 = vmatpush1.bf16.msra.mxu0 %v2111_v52 }
 0x5fb   : > { %v2120_v31 = vpop.permute.xlu0 %2119 }
 0x5fc   : > { %v2122_v33 = vsel %vm508_vm7, %v2118_v46, %v2120_v31 }
 0x5fd   : > { %2175 = vmatprep.subr.bf16.mxu0 %v2122_v33 }
 0x5fe   : > { %2176 = vmatpush1.bf16.msra.mxu0 %v2121_v34 }
 0x5ff   : > { %v2130_v35 = vpop.permute.xlu0 %2129 }
 0x600   : > { %v2132_v36 = vsel %vm517_vm8, %v2128_v5, %v2130_v35 }
 0x601   : > { %2177 = vmatprep.subr.bf16.mxu0 %v2132_v36 }
 0x603   : > { %v2126_v37 = vpop.permute.xlu0 %2125 }
 0x604   : > { %v2131_v38 = vsel %vm517_vm8, %v2126_v37, %v2128_v5 }
 0x605   : > { %2178 = vmatpush1.bf16.msra.mxu0 %v2131_v38 }
 0x608   : > { %2194 = vmatmul.mubr.bf16.vlgmr.msra.gmra.mrb[20].mxu0 %v2744_v13 }
 0x609   : > { %2678 = vmatprep.mubr.msk.bf16.mxu0 %vm1070_vm11, %v2317_v49 }
 0x614   : > { %v1980_v43 = vpop.permute.xlu0 %1979 }
 0x618   : > { %v2147_v7 = vpop.permute.xlu0 %2146 }
 0x61c   : > { %v2399_v24 = vpop.permute.xlu0 %2398 }
 0x620   : > { %v2409_v26 = vpop.permute.xlu0 %2408 }
 0x624   : > { %v2419_v28 = vpop.permute.xlu0 %2418 }
 0x628   : > { %v3664_v30 = vpop.permute.xlu0 %2428 }
 0x62c   : > { %v3666_v33 = vpop.permute.xlu0 %2438 }
 0x630   : > { %v3668_v35 = vpop.permute.xlu0 %2448 }
 0x634   : > { %v3674_v38 = vpop.permute.xlu0 %2458 }
 0x6b8   : > { %v2028_v39 = vpop.f32.mrb[16].mxu1 }
 0x6b9   : > { %v2029_v40 = vadd.f32 %v2028_v39, %v1975_v8  ;;  %v2030_v42 = vpop.f32.mrb[17].mxu1  ;;  %v3676_v39 = vpop.permute.xlu0 %2468 }
 0x6ba   : > { %v2031_v44 = vadd.f32 %v2030_v42, %v1975_v8  ;;  %v2032_v53 = vpop.f32.mrb[18].mxu1 }
 0x6bb   : > { %v2037_v54 = vmul.f32 0.2, %v2029_v40  ;;  %v2033_v55 = vadd.f32 %v2032_v53, %v1980_v43  ;;  %v2034_v41 = vpop.f32.mrb[19].mxu1 }
 0x6bc   : > { %v2038_v56 = vmul.f32 0.2, %v2031_v44  ;;  %v2035_v57 = vadd.f32 %v2034_v41, %v1980_v43 }
 0x6bd   : > { %v2039_v58 = vmul.f32 0.2, %v2033_v55  ;;  %v2041_v60 = vmax.f32 %v2029_v40, %v2037_v54 }
 0x6be   : > { %v2040_v59 = vmul.f32 0.2, %v2035_v57  ;;  %v2042_v62 = vmax.f32 %v2031_v44, %v2038_v56 }
 0x6bf   : > { %v2043_v61 = vmax.f32 %v2033_v55, %v2039_v58 }
 0x6c0   : > { %v2044_v32 = vmax.f32 %v2035_v57, %v2040_v59 }
 0x6c1   : > { %v3593_v63 = vpack.c.bf16 %v2043_v61, %v2041_v60 }
 0x6c2   : > { %v2046_v0 = vpack.c.bf16 %v2044_v32, %v2042_v62 }
 0x6c3   : > { %2222 = vrot.lane.b32.xlu1 %v3593_v63, %s2763_s27 }
 0x6c4   : > { %2322 = vmatprep.subr.bf16.mxu1 %v2046_v0 }
 0x6c5   : > { %2323 = vmatpush1.bf16.msra.mxu1 %v3593_v63 }
 0x6c7   : > { %2232 = vrot.lane.b32.xlu1 %v3593_v63, %s2764_s28 }
 0x6cb   : > { %2242 = vrot.lane.b32.xlu1 %v3593_v63, %s2765_s29 }
 0x6cf   : > { %2252 = vrot.lane.b32.xlu1 %v3593_v63, %s2766_s30 }
 0x6d3   : > { %2262 = vrot.lane.b32.xlu1 %v3593_v63, %s2767_s13 }
 0x6d7   : > { %2272 = vrot.lane.b32.xlu1 %v3593_v63, %s2768_s14 }
 0x6db   : > { %v2195_v4 = vpop.f32.mrb[20].mxu0  ;;  %2282 = vrot.lane.b32.xlu1 %v3593_v63, %s2769_s15 }
 0x6dc   : > { %v2196_v45 = vadd.f32 %v2195_v4, %v2142_v3  ;;  %v2197_v6 = vpop.f32.mrb[21].mxu0 }
 0x6dd   : > { %v2198_v10 = vadd.f32 %v2197_v6, %v2142_v3  ;;  %v2199_v11 = vpop.f32.mrb[22].mxu0 }
 0x6de   : > { %v2204_v46 = vmul.f32 0.2, %v2196_v45  ;;  %v2200_v14 = vadd.f32 %v2199_v11, %v2147_v7  ;;  %v2201_v15 = vpop.f32.mrb[23].mxu0 }
 0x6df   : > { %v2205_v5 = vmul.f32 0.2, %v2198_v10  ;;  %v2202_v47 = vadd.f32 %v2201_v15, %v2147_v7  ;;  %2224 = vrot.lane.b32.xlu1 %v2046_v0, %s2763_s27 }
 0x6e0   : > { %v2206_v1 = vmul.f32 0.2, %v2200_v14  ;;  %v2208_v12 = vmax.f32 %v2196_v45, %v2204_v46 }
 0x6e1   : > { %v2207_v16 = vmul.f32 0.2, %v2202_v47  ;;  %v2209_v18 = vmax.f32 %v2198_v10, %v2205_v5 }
 0x6e2   : > { %v2210_v17 = vmax.f32 %v2200_v14, %v2206_v1 }
 0x6e3   : > { %v2211_v48 = vmax.f32 %v2202_v47, %v2207_v16  ;;  %2234 = vrot.lane.b32.xlu1 %v2046_v0, %s2764_s28 }
 0x6e4   : > { %v2212_v13 = vpack.c.bf16 %v2210_v17, %v2208_v12 }
 0x6e5   : > { %v2213_v19 = vpack.c.bf16 %v2211_v48, %v2209_v18 }
 0x6e6   : > { %2226 = vrot.lane.b32.xlu0 %v2212_v13, %s2763_s27 }
 0x6e7   : > { %2244 = vrot.lane.b32.xlu1 %v2046_v0, %s2765_s29  ;;  %2494 = vmatprep.subr.bf16.mxu0 %v2213_v19 }
 0x6e8   : > { %2495 = vmatpush1.bf16.msra.mxu0 %v2212_v13 }
 0x6ea   : > { %2394 = vrot.lane.b32.xlu0 %v2212_v13, %s2763_s27 }
 0x6eb   : > { %2254 = vrot.lane.b32.xlu1 %v2046_v0, %s2766_s30 }
 0x6ee   : > { %2236 = vrot.lane.b32.xlu0 %v2212_v13, %s2764_s28 }
 0x6ef   : > { %2264 = vrot.lane.b32.xlu1 %v2046_v0, %s2767_s13 }
 0x6f2   : > { %2404 = vrot.lane.b32.xlu0 %v2212_v13, %s2764_s28 }
 0x6f3   : > { %2274 = vrot.lane.b32.xlu1 %v2046_v0, %s2768_s14 }
 0x6f6   : > { %2246 = vrot.lane.b32.xlu0 %v2212_v13, %s2765_s29 }
 0x6f7   : > { %2284 = vrot.lane.b32.xlu1 %v2046_v0, %s2769_s15 }
 0x6fa   : > { %2414 = vrot.lane.b32.xlu0 %v2212_v13, %s2765_s29 }
 0x6fb   : > { %2294 = vrot.lane.b32.xlu1 %v2046_v0, %s2770_s16 }
 0x6fe   : > { %2256 = vrot.lane.b32.xlu0 %v2212_v13, %s2766_s30 }
 0x6ff   : > { %2396 = vrot.lane.b32.xlu1 %v2213_v19, %s2763_s27 }
 0x702   : > { %2424 = vrot.lane.b32.xlu0 %v2212_v13, %s2766_s30 }
 0x703   : > { %2406 = vrot.lane.b32.xlu1 %v2213_v19, %s2764_s28 }
 0x706   : > { %2266 = vrot.lane.b32.xlu0 %v2212_v13, %s2767_s13 }
 0x707   : > { %2416 = vrot.lane.b32.xlu1 %v2213_v19, %s2765_s29 }
 0x70a   : > { %2434 = vrot.lane.b32.xlu0 %v2212_v13, %s2767_s13 }
 0x70b   : > { %2426 = vrot.lane.b32.xlu1 %v2213_v19, %s2766_s30 }
 0x70e   : > { %2276 = vrot.lane.b32.xlu0 %v2212_v13, %s2768_s14 }
 0x70f   : > { %2436 = vrot.lane.b32.xlu1 %v2213_v19, %s2767_s13 }
 0x712   : > { %2444 = vrot.lane.b32.xlu0 %v2212_v13, %s2768_s14 }
 0x713   : > { %2446 = vrot.lane.b32.xlu1 %v2213_v19, %s2768_s14 }
 0x716   : > { %2286 = vrot.lane.b32.xlu0 %v2212_v13, %s2769_s15 }
 0x717   : > { %2456 = vrot.lane.b32.xlu1 %v2213_v19, %s2769_s15 }
 0x71a   : > { %2454 = vrot.lane.b32.xlu0 %v2212_v13, %s2769_s15 }
 0x71b   : > { %2466 = vrot.lane.b32.xlu1 %v2213_v19, %s2770_s16 }
 0x71e   : > { %2296 = vrot.lane.b32.xlu0 %v2212_v13, %s2770_s16 }
 0x71f   : > { %2292 = vrot.lane.b32.xlu1 %v3593_v63, %s2770_s16 }
 0x722   : > { %2464 = vrot.lane.b32.xlu0 %v2212_v13, %s2770_s16 }
 0x723   : > { %2306 = vperm.xlu1 %2724, %v2303_v2  }
 0x726   : > { %2478 = vperm.xlu0 %2723, %v2475_v21  }
 0x727   : > { %2370 = vrot.lane.b32.xlu1 %v2363_v9, %s2774_s18 }
 0x72a   : > { %2372 = vrot.lane.b32.xlu0 %v2369_v22, %s2774_s18 }
 0x72b   : > { %2374 = vrot.lane.b32.xlu1 %v2364_v23, %s2774_s18 }
 0x72e   : > { %2542 = vrot.lane.b32.xlu0 %v2535_v50, %s2774_s18 }
 0x72f   : > { %2544 = vrot.lane.b32.xlu1 %v2541_v25, %s2774_s18 }
 0x732   : > { %2546 = vrot.lane.b32.xlu0 %v2536_v51, %s2774_s18 }
 0x735   : > { %v2223_v27 = vpop.permute.xlu1 %2222 }
 0x739   : > { %v2233_v29 = vpop.permute.xlu1 %2232 }
 0x73d   : > { %v2243_v52 = vpop.permute.xlu1 %2242 }
 0x741   : > { %v2253_v31 = vpop.permute.xlu1 %2252 }
 0x745   : > { %v2263_v34 = vpop.permute.xlu1 %2262 }
 0x749   : > { %v3670_v36 = vpop.permute.xlu1 %2272 }
 0x74d   : > { %v3672_v37 = vpop.permute.xlu1 %2282 }
 0x751   : > { %v2225_v8 = vpop.permute.xlu1 %2224 }
 0x752   : > { %v2228_v53 = vsel %vm454_vm0, %v2223_v27, %v2225_v8 }
 0x755   : > { %v2235_v40 = vpop.permute.xlu1 %2234 }
 0x756   : > { %v2238_v58 = vsel %vm463_vm2, %v2233_v29, %v2235_v40 }
 0x758   : > { %v2227_v42 = vpop.permute.xlu0 %2226 }
 0x759   : > { %v2245_v43 = vpop.permute.xlu1 %2244  ;;  %v2229_v44 = vsel %vm454_vm0, %v2225_v8, %v2227_v42 }
 0x75a   : > { %2324 = vmatprep.subr.bf16.mxu1 %v2229_v44  ;;  %v2248_v63 = vsel %vm472_vm3, %v2243_v52, %v2245_v43 }
 0x75b   : > { %2325 = vmatpush1.bf16.msra.mxu1 %v2228_v53 }
 0x75c   : > { %v2395_v54 = vpop.permute.xlu0 %2394 }
 0x75d   : > { %v2255_v55 = vpop.permute.xlu1 %2254 }
 0x75e   : > { %v2258_v7 = vsel %vm481_vm4, %v2253_v31, %v2255_v55 }
 0x760   : > { %v2237_v41 = vpop.permute.xlu0 %2236 }
 0x761   : > { %v2265_v56 = vpop.permute.xlu1 %2264  ;;  %v2239_v57 = vsel %vm463_vm2, %v2235_v40, %v2237_v41 }
 0x762   : > { %2326 = vmatprep.subr.bf16.mxu1 %v2239_v57  ;;  %v2268_v12 = vsel %vm490_vm5, %v2263_v34, %v2265_v56 }
 0x763   : > { %2327 = vmatpush1.bf16.msra.mxu1 %v2238_v58 }
 0x764   : > { %v2405_v59 = vpop.permute.xlu0 %2404 }
 0x765   : > { %v2275_v60 = vpop.permute.xlu1 %2274 }
 0x766   : > { %v2278_v22 = vsel %vm499_vm6, %v3670_v36, %v2275_v60 }
 0x768   : > { %v2247_v61 = vpop.permute.xlu0 %2246 }
 0x769   : > { %v2285_v62 = vpop.permute.xlu1 %2284  ;;  %v2249_v32 = vsel %vm472_vm3, %v2245_v43, %v2247_v61 }
 0x76a   : > { %2328 = vmatprep.subr.bf16.mxu1 %v2249_v32 }
 0x76b   : > { %2329 = vmatpush1.bf16.msra.mxu1 %v2248_v63 }
 0x76c   : > { %v2415_v0 = vpop.permute.xlu0 %2414 }
 0x76d   : > { %v3684_v3 = vpop.permute.xlu1 %2294 }
 0x770   : > { %v2257_v4 = vpop.permute.xlu0 %2256 }
 0x771   : > { %v2397_v45 = vpop.permute.xlu1 %2396  ;;  %v2259_v6 = vsel %vm481_vm4, %v2255_v55, %v2257_v4 }
 0x772   : > { %v2400_v10 = vsel %vm454_vm0, %v2395_v54, %v2397_v45  ;;  %2330 = vmatprep.subr.bf16.mxu1 %v2259_v6  ;;  %v2401_v11 = vsel %vm454_vm0, %v2397_v45, %v2399_v24 }
 0x773   : > { %2331 = vmatpush1.bf16.msra.mxu1 %v2258_v7  ;;  %2496 = vmatprep.subr.bf16.mxu0 %v2401_v11 }
 0x774   : > { %v2425_v46 = vpop.permute.xlu0 %2424  ;;  %2497 = vmatpush1.bf16.msra.mxu0 %v2400_v10 }
 0x775   : > { %v2407_v14 = vpop.permute.xlu1 %2406 }
 0x776   : > { %v2410_v15 = vsel %vm463_vm2, %v2405_v59, %v2407_v14  ;;  %v2411_v5 = vsel %vm463_vm2, %v2407_v14, %v2409_v26 }
 0x777   : > { %2498 = vmatprep.subr.bf16.mxu0 %v2411_v5 }
 0x778   : > { %v2267_v47 = vpop.permute.xlu0 %2266  ;;  %2499 = vmatpush1.bf16.msra.mxu0 %v2410_v15 }
 0x779   : > { %v2417_v1 = vpop.permute.xlu1 %2416  ;;  %v2269_v16 = vsel %vm490_vm5, %v2265_v56, %v2267_v47 }
 0x77a   : > { %v2420_v17 = vsel %vm472_vm3, %v2415_v0, %v2417_v1  ;;  %2332 = vmatprep.subr.bf16.mxu1 %v2269_v16  ;;  %v2421_v18 = vsel %vm472_vm3, %v2417_v1, %v2419_v28 }
 0x77b   : > { %2333 = vmatpush1.bf16.msra.mxu1 %v2268_v12  ;;  %2500 = vmatprep.subr.bf16.mxu0 %v2421_v18 }
 0x77c   : > { %v2435_v48 = vpop.permute.xlu0 %2434  ;;  %2501 = vmatpush1.bf16.msra.mxu0 %v2420_v17 }
 0x77d   : > { %v2427_v13 = vpop.permute.xlu1 %2426 }
 0x77e   : > { %v2430_v19 = vsel %vm481_vm4, %v2425_v46, %v2427_v13  ;;  %v2431_v49 = vsel %vm481_vm4, %v2427_v13, %v3664_v30  ;;  %v2288_v30 = vsel %vm508_vm7, %v3672_v37, %v2285_v62 }
 0x77f   : > { %2502 = vmatprep.subr.bf16.mxu0 %v2431_v49 }
 0x780   : > { %v2277_v2 = vpop.permute.xlu0 %2276  ;;  %2503 = vmatpush1.bf16.msra.mxu0 %v2430_v19 }
 0x781   : > { %v2437_v21 = vpop.permute.xlu1 %2436  ;;  %v2279_v9 = vsel %vm499_vm6, %v2275_v60, %v2277_v2 }
 0x782   : > { %v2440_v23 = vsel %vm490_vm5, %v2435_v48, %v2437_v21  ;;  %2334 = vmatprep.subr.bf16.mxu1 %v2279_v9  ;;  %v2441_v50 = vsel %vm490_vm5, %v2437_v21, %v3666_v33 }
 0x783   : > { %2335 = vmatpush1.bf16.msra.mxu1 %v2278_v22  ;;  %2504 = vmatprep.subr.bf16.mxu0 %v2441_v50 }
 0x784   : > { %v2445_v24 = vpop.permute.xlu0 %2444  ;;  %2505 = vmatpush1.bf16.msra.mxu0 %v2440_v23 }
 0x785   : > { %v2447_v25 = vpop.permute.xlu1 %2446 }
 0x786   : > { %v2450_v51 = vsel %vm499_vm6, %v2445_v24, %v2447_v25  ;;  %v2451_v26 = vsel %vm499_vm6, %v2447_v25, %v3668_v35 }
 0x787   : > { %2506 = vmatprep.subr.bf16.mxu0 %v2451_v26 }
 0x788   : > { %v2287_v27 = vpop.permute.xlu0 %2286  ;;  %2507 = vmatpush1.bf16.msra.mxu0 %v2450_v51 }
 0x789   : > { %v2457_v28 = vpop.permute.xlu1 %2456  ;;  %v2289_v29 = vsel %vm508_vm7, %v2285_v62, %v2287_v27 }
 0x78a   : > { %2336 = vmatprep.subr.bf16.mxu1 %v2289_v29  ;;  %v2461_v52 = vsel %vm508_vm7, %v2457_v28, %v3674_v38 }
 0x78b   : > { %2337 = vmatpush1.bf16.msra.mxu1 %v2288_v30  ;;  %2508 = vmatprep.subr.bf16.mxu0 %v2461_v52 }
 0x78c   : > { %v2455_v31 = vpop.permute.xlu0 %2454 }
 0x78d   : > { %v2460_v33 = vsel %vm508_vm7, %v2455_v31, %v2457_v28  ;;  %v2467_v34 = vpop.permute.xlu1 %2466 }
 0x78e   : > { %2509 = vmatpush1.bf16.msra.mxu0 %v2460_v33  ;;  %v2471_v35 = vsel %vm517_vm8, %v2467_v34, %v3676_v39 }
 0x78f   : > { %2510 = vmatprep.subr.bf16.mxu0 %v2471_v35 }
 0x790   : > { %v2297_v36 = vpop.permute.xlu0 %2296 }
 0x791   : > { %v2293_v8 = vpop.permute.xlu1 %2292  ;;  %v2299_v37 = vsel %vm517_vm8, %v3684_v3, %v2297_v36 }
 0x792   : > { %v2298_v40 = vsel %vm517_vm8, %v2293_v8, %v3684_v3  ;;  %2338 = vmatprep.subr.bf16.mxu1 %v2299_v37 }
 0x793   : > { %2339 = vmatpush1.bf16.msra.mxu1 %v2298_v40 }
 0x794   : > { %v2465_v38 = vpop.permute.xlu0 %2464 }
 0x795   : > { %v2470_v42 = vsel %vm517_vm8, %v2465_v38, %v2467_v34 }
 0x796   : > { %2355 = vmatmul.mubr.bf16.vlgmr.msra.gmra.mrb[20].mxu1 %v3638_v20  ;;  %2511 = vmatpush1.bf16.msra.mxu0 %v2470_v42 }
 0x799   : > { %2527 = vmatmul.mubr.bf16.vlgmr.msra.gmra.mrb[24].mxu0 %v3638_v20 }
 0x7a2   : > { %v2307_v43 = vpop.permute.xlu1 %2306 }
 0x7a5   : > { %v2479_v39 = vpop.permute.xlu0 %2478 }
 0x7a6   : > { %v2371_v41 = vpop.permute.xlu1 %2370 }
 0x7a9   : > { %v2373_v53 = vpop.permute.xlu0 %2372 }
 0x7aa   : > { %v2375_v0 = vpop.permute.xlu1 %2374  ;;  %v2377_v45 = vsel %vm2376_vm12, %v2371_v41, %v2373_v53 }
 0x7ab   : > { %v2378_v11 = vsel %vm2376_vm12, %v2373_v53, %v2375_v0 }
 0x7ad   : > { %v2543_v63 = vpop.permute.xlu0 %2542 }
 0x7ae   : > { %v2545_v6 = vpop.permute.xlu1 %2544 }
 0x7af   : > { %v2548_v5 = vsel %vm2376_vm12, %v2543_v63, %v2545_v6 }
 0x7b1   : > { %v2547_v3 = vpop.permute.xlu0 %2546 }
 0x7b2   : > { %v2549_v14 = vsel %vm2376_vm12, %v2545_v6, %v2547_v3 }
 0x869   : > { %v2356_v44 = vpop.f32.mrb[20].mxu1 }
 0x86a   : > { %v2357_v54 = vadd.f32 %v2356_v44, %v2307_v43  ;;  %v2358_v55 = vpop.f32.mrb[21].mxu1 }
 0x86b   : > { %v2359_v56 = vadd.f32 %v2358_v55, %v2307_v43  ;;  %v2360_v57 = vpop.f32.mrb[22].mxu1 }
 0x86c   : > { %2747 = vtanh.f32 %v2357_v54  ;;  %v2361_v58 = vpop.f32.mrb[23].mxu1  ;;  %v2528_v59 = vpop.f32.mrb[24].mxu0 }
 0x86d   : > { %2749 = vtanh.f32 %v2359_v56  ;;  %v2529_v60 = vadd.f32 %v2528_v59, %v2479_v39  ;;  %v2530_v61 = vpop.f32.mrb[25].mxu0 }
 0x86e   : > { %v2531_v62 = vadd.f32 %v2530_v61, %v2479_v39  ;;  %v2532_v32 = vpop.f32.mrb[26].mxu0 }
 0x86f   : > { %2751 = vtanh.f32 %v2529_v60  ;;  %v2533_v20 = vpop.f32.mrb[27].mxu0 }
 0x870   : > { %2753 = vtanh.f32 %v2531_v62 }
 0x876   : > { %v2748_v4 = vpop.eup %2747 }
 0x877   : > { %v2750_v7 = vpop.eup %2749  ;;  %v2381_v10 = vadd.f32 %v2748_v4, %v2377_v45 }
 0x878   : > { %v2382_v46 = vadd.f32 %v2750_v7, %v2378_v11 }
 0x879   : > { %v2752_v15 = vpop.eup %2751 }
 0x87a   : > { %v2754_v47 = vpop.eup %2753  ;;  %v2385_v1 = vcombine.low %v2381_v10, %v2382_v46  ;;  %v2552_v16 = vadd.f32 %v2752_v15, %v2548_v5 }
 0x87b   : > { %v2553_v12 = vadd.f32 %v2754_v47, %v2549_v14 }
 0x87c   : > { %2387 = vst [vmem:[%s433_s20] sm:$0x77] %v2385_v1 }
 0x87d   : > { %v2556_v17 = vcombine.low %v2552_v16, %v2553_v12 }
 0x87f   : > { %2558 = vst [vmem:[%s433_s20 + $0x8] sm:$0x77] %v2556_v17 }
 0x880 PF: > { %s22_s21 = sadd.s32 1, %s2761_s21  }
 0x881   : > { %p19_p4 = scmp.ge.s32.totalorder %s22_s21, 4  }
 0x883   :  { %21 = sbr.rel (!%p19_p4) target bundleno = 1 (0x1), region = 101 }

</bundles_post_ra>
